<compile_context>
chip_gen: v7x
topology: tpu7x:2x2x1
jax: 0.10.0
libtpu: 0.0.40
codegen_flags: <defaults>
</compile_context>

<pallas_src>
import functools
import math

import jax
import jax.numpy as jnp
from jax.experimental import pallas as pl
from jax.experimental.pallas import tpu as pltpu

_GELU_C = math.sqrt(2.0 / math.pi)   # hoisted GELU constant
_NEG_INF = -1e18                     # matches torch masked_fill value


def _round_up(a, b):
    return ((a + b - 1) // b) * b


def _vmem_capacity_bytes():
    """Physical VMEM per core (generation aware: 128 MiB v5e/v6e, 64 MiB v7x)."""
    try:
        info = pltpu.get_tpu_info()
        cap = int(getattr(info, "vmem_capacity_bytes", 0))
        if cap > 0:
            return cap
    except Exception:
        pass
    return 64 * 2 ** 20  # conservative (v7x-sized) fallback


# ---------------------------------------------------------------------------
# Kernel 1: fused masked multi-head attention
#   grid = (batch, q_tile).  K/V projected once per batch (q-tile 0) into resident
#   bf16 scratch; all projections are lane-dense bf16 MXU matmuls w/ f32 accumulation.
# ---------------------------------------------------------------------------
def _attn_kernel(q_ref, kv_ref, pad_ref, g_ref, b_ref,
                 wq_ref, bq_ref, wkv_ref, bkv_ref, wo_ref, bo_ref,
                 *refs, heads, causal, ln_kv, emit_qnorm, scale):
    if emit_qnorm:
        out_ref, qn_ref, k_buf, v_buf = refs
    else:
        out_ref, k_buf, v_buf = refs
        qn_ref = None

    D = wq_ref.shape[0]
    dh = D // heads
    block_q = q_ref.shape[1]
    Lk = kv_ref.shape[1]
    qt = pl.program_id(1)

    gamma = g_ref[...].astype(jnp.float32)    # (1, D)
    beta = b_ref[...].astype(jnp.float32)     # (1, D)

    def layer_norm(x):
        mean = jnp.mean(x, axis=-1, keepdims=True)
        c = x - mean
        var = jnp.mean(c * c, axis=-1, keepdims=True)
        return c * jax.lax.rsqrt(var + 1e-6) * gamma + beta

    # ---- K/V projection: once per batch element (q-tile 0), resident across q-tiles ----
    @pl.when(qt == 0)
    def _():
        kv = kv_ref[0].astype(jnp.float32)                   # (Lk, D)
        kvn = layer_norm(kv) if ln_kv else kv                # self-attn normalizes k/v too
        kvp = jnp.dot(kvn.astype(jnp.bfloat16), wkv_ref[...],
                      preferred_element_type=jnp.float32)    # (Lk, 2D)
        kvp = kvp + bkv_ref[...].astype(jnp.float32)
        k_buf[...] = kvp[:, :D].astype(jnp.bfloat16)
        v_buf[...] = kvp[:, D:].astype(jnp.bfloat16)

    # ---- Q projection for this tile (LayerNorm computed once, not per head) ----
    q_raw = q_ref[0].astype(jnp.float32)                     # (block_q, D) residual source
    qn = layer_norm(q_raw)
    q = jnp.dot(qn.astype(jnp.bfloat16), wq_ref[...],
                preferred_element_type=jnp.float32)
    q = ((q + bq_ref[...].astype(jnp.float32)) * scale).astype(jnp.bfloat16)

    # ---- mask: per-key padding row (+ in-kernel causal triangle), no HBM mask traffic ----
    pad_row = pad_ref[0]                                      # (1, Lk) int32
    if causal:
        q_pos = qt * block_q + jax.lax.broadcasted_iota(jnp.int32, (block_q, Lk), 0)
        k_pos = jax.lax.broadcasted_iota(jnp.int32, (block_q, Lk), 1)
        masked = (pad_row + (k_pos > q_pos).astype(jnp.int32)) > 0
    else:
        masked = jnp.broadcast_to(pad_row > 0, (block_q, Lk))

    kk = k_buf[...]                                           # (Lk, D) bf16
    vv = v_buf[...]

    # ---- per-head scaled masked softmax attention ----
    ctx_parts = []
    for h in range(heads):
        sl = slice(h * dh, (h + 1) * dh)
        s = jax.lax.dot_general(q[:, sl], kk[:, sl], (((1,), (1,)), ((), ())),
                                preferred_element_type=jnp.float32)   # (block_q, Lk)
        s = jnp.where(masked, _NEG_INF, s)
        m = jnp.max(s, axis=-1, keepdims=True)
        e = jnp.exp(s - m)
        attn = e * pl.reciprocal(jnp.sum(e, axis=-1, keepdims=True), approx=True)
        ctx_parts.append(jnp.dot(attn.astype(jnp.bfloat16), vv[:, sl],
                                 preferred_element_type=jnp.float32))  # (block_q, dh)
    ctx = jnp.concatenate(ctx_parts, axis=-1).astype(jnp.bfloat16)     # (block_q, D)

    # ---- merged output projection + bias + residual ----
    out = jnp.dot(ctx, wo_ref[...], preferred_element_type=jnp.float32)
    out = out + bo_ref[...].astype(jnp.float32) + q_raw
    out_ref[0] = out.astype(out_ref.dtype)
    if emit_qnorm:
        qn_ref[0] = qn.astype(qn_ref.dtype)    # "all_input" for the self-attn call


def _mha_pallas(q_src, kv_src, key_pad, gamma, beta, p, *, heads, ln_kv, causal,
                emit_qnorm, block_q=256):
    """MHA with fused LayerNorm + residual of q_src.

    Returns attn_output + q_src (and LayerNorm(q_src) if emit_qnorm)."""
    B, Lq, D = q_src.shape
    Lk = kv_src.shape[1]
    assert D % heads == 0
    dh = D // heads

    # q-row tiling (pad Lq instead of asserting divisibility)
    block_q = max(8, min(_round_up(block_q, 8), _round_up(Lq, 8)))
    Lq_pad = _round_up(Lq, block_q)
    q_in = q_src
    if Lq_pad != Lq:
        q_in = jnp.pad(q_src, ((0, 0), (0, Lq_pad - Lq), (0, 0)))
    n_qt = Lq_pad // block_q

    # bf16 weights for the MXU (f32 accumulation); wk/wv fused into a single operand.
    wq = p["wq"].astype(jnp.bfloat16)                                       # (D, D)
    wkv = jnp.concatenate([p["wk"], p["wv"]], axis=1).astype(jnp.bfloat16)  # (D, 2D)
    wo = p["wo"].astype(jnp.bfloat16)                                       # (D, D)
    bq = p["bq"].reshape(1, D)
    bkv = jnp.concatenate([p["bk"], p["bv"]]).reshape(1, 2 * D)
    bo = p["bo"].reshape(1, D)
    gamma2 = gamma.reshape(1, D)
    beta2 = beta.reshape(1, D)
    pad3 = key_pad.reshape(B, 1, Lk).astype(jnp.int32)

    kernel = functools.partial(_attn_kernel, heads=heads, causal=causal, ln_kv=ln_kv,
                               emit_qnorm=emit_qnorm, scale=1.0 / math.sqrt(dh))

    q_spec = pl.BlockSpec((1, block_q, D), lambda b, t: (b, t, 0))

    def const_spec(shp):
        # constant index_map -> fetched once, resident across the whole grid
        return pl.BlockSpec(shp, lambda b, t: (0, 0))

    in_specs = [
        q_spec,                                                  # q_src tile
        pl.BlockSpec((1, Lk, D), lambda b, t: (b, 0, 0)),        # kv_src (per batch)
        pl.BlockSpec((1, 1, Lk), lambda b, t: (b, 0, 0)),        # key pad row
        const_spec((1, D)), const_spec((1, D)),                  # gamma, beta
        const_spec((D, D)), const_spec((1, D)),                  # wq, bq
        const_spec((D, 2 * D)), const_spec((1, 2 * D)),          # wkv, bkv
        const_spec((D, D)), const_spec((1, D)),                  # wo, bo
    ]

    out_dtype = q_src.dtype
    if emit_qnorm:
        out_shape = (jax.ShapeDtypeStruct((B, Lq_pad, D), out_dtype),
                     jax.ShapeDtypeStruct((B, Lq_pad, D), out_dtype))
        out_specs = [q_spec, q_spec]
    else:
        out_shape = jax.ShapeDtypeStruct((B, Lq_pad, D), out_dtype)
        out_specs = q_spec

    itemsize = q_src.dtype.itemsize
    n_out = 2 if emit_qnorm else 1
    cost = pl.CostEstimate(
        flops=int(B * (4 * Lq_pad * D * D + 4 * Lk * D * D + 4 * Lq_pad * Lk * D)),
        transcendentals=int(B * heads * Lq_pad * Lk + B * (Lq_pad + Lk)),
        bytes_accessed=int(B * (Lq_pad * D * itemsize * (1 + n_out)
                                + Lk * D * itemsize + Lk * 4)
                           + 4 * D * D * 2 + 8 * D * 4),
    )

    cap = _vmem_capacity_bytes()
    need = (2 * (block_q * D * itemsize + Lk * D * itemsize + Lk * 4
                 + n_out * block_q * D * itemsize)          # pipelined in/out blocks
            + 2 * (4 * D * D * 2)                            # bf16 weights (headroom)
            + 8 * D * 4                                      # biases + gamma/beta
            + 2 * Lk * D * 2                                 # K/V scratch
            + (block_q * (Lk + 4 * D) + Lk * 2 * D) * 4)     # intermediates headroom
    vmem_limit = int(min(int(0.85 * cap), max(32 * 2 ** 20, int(1.5 * need))))

    result = pl.pallas_call(
        kernel,
        out_shape=out_shape,
        grid_spec=pltpu.PrefetchScalarGridSpec(
            num_scalar_prefetch=0,
            grid=(B, n_qt),
            in_specs=in_specs,
            out_specs=out_specs,
            scratch_shapes=[pltpu.VMEM((Lk, D), jnp.bfloat16),   # K (resident per batch)
                            pltpu.VMEM((Lk, D), jnp.bfloat16)],  # V
        ),
        compiler_params=pltpu.CompilerParams(
            dimension_semantics=("parallel", "arbitrary"),
            vmem_limit_bytes=vmem_limit),
        cost_estimate=cost,
    )(q_in, kv_src, pad3, gamma2, beta2, wq, bq, wkv, bkv, wo, bo)

    if emit_qnorm:
        out, qn = result
        return out[:, :Lq], qn[:, :Lq]
    return result[:, :Lq]


# ---------------------------------------------------------------------------
# Kernel 2: PositionwiseFeedForward
#   Preferred path: weights fully resident (no d_ff grid axis); fallback: d_ff chunking.
# ---------------------------------------------------------------------------
def _ffn_kernel_resident(x_ref, g_ref, b_ref, w1_ref, b1_ref, w2_ref, b2_ref, o_ref):
    x = x_ref[...].astype(jnp.float32)
    mean = jnp.mean(x, axis=-1, keepdims=True)
    c = x - mean
    var = jnp.mean(c * c, axis=-1, keepdims=True)
    xn = c * jax.lax.rsqrt(var + 1e-6)
    xn = xn * g_ref[...].astype(jnp.float32) + b_ref[...].astype(jnp.float32)
    h = jnp.dot(xn.astype(jnp.bfloat16), w1_ref[...], preferred_element_type=jnp.float32)
    h = h + b1_ref[...].astype(jnp.float32)
    h2 = h * h                                   # f32 GELU (v5e-safe, padded rows finite)
    h = 0.5 * h * (1.0 + jnp.tanh(_GELU_C * (h + 0.044715 * (h * h2))))
    out = jnp.dot(h.astype(jnp.bfloat16), w2_ref[...], preferred_element_type=jnp.float32)
    out = out + b2_ref[...].astype(jnp.float32) + x
    o_ref[...] = out.astype(o_ref.dtype)


def _ffn_kernel_chunked(x_ref, g_ref, b_ref, w1_ref, b1_ref, w2_ref, b2_ref,
                        o_ref, xn_ref, acc_ref):
    k = pl.program_id(1)

    @pl.when(k == 0)
    def _():
        x = x_ref[...].astype(jnp.float32)
        mean = jnp.mean(x, axis=-1, keepdims=True)
        c = x - mean
        var = jnp.mean(c * c, axis=-1, keepdims=True)
        xn = c * jax.lax.rsqrt(var + 1e-6)
        xn = xn * g_ref[...].astype(jnp.float32) + b_ref[...].astype(jnp.float32)
        xn_ref[...] = xn.astype(jnp.bfloat16)
        acc_ref[...] = jnp.zeros_like(acc_ref)

    h = jnp.dot(xn_ref[...], w1_ref[...], preferred_element_type=jnp.float32)
    h = h + b1_ref[...].astype(jnp.float32)
    h2 = h * h
    h = 0.5 * h * (1.0 + jnp.tanh(_GELU_C * (h + 0.044715 * (h * h2))))
    acc_ref[...] += jnp.dot(h.astype(jnp.bfloat16), w2_ref[...],
                            preferred_element_type=jnp.float32)

    @pl.when(k == pl.num_programs(1) - 1)
    def _():
        out = acc_ref[...] + b2_ref[...].astype(jnp.float32) + x_ref[...].astype(jnp.float32)
        o_ref[...] = out.astype(o_ref.dtype)


def _ffn_pallas(x, gamma, beta, w1, b1, w2, b2, *, block_rows=512, block_ff=512):
    B, L, D = x.shape
    d_ff = w1.shape[1]
    n_tokens = B * L
    itemsize = x.dtype.itemsize

    cap = _vmem_capacity_bytes()
    budget = int(0.8 * cap)

    block_rows = max(8, min(_round_up(block_rows, 8), _round_up(n_tokens, 8)))

    w_bytes = 2 * 2 * D * d_ff * 2        # w1 + w2 bf16, 2x headroom

    def nochunk_need(br):
        io = 2 * 2 * br * D * itemsize                       # x in + out, double-buffered
        inter = br * d_ff * 4 + 4 * br * D * 4               # GELU intermediate + headroom
        return w_bytes + io + inter + 4 * (2 * D + d_ff + D)

    while block_rows > 64 and nochunk_need(block_rows) > budget:
        block_rows = max(64, _round_up(block_rows // 2, 8))
    use_chunk = nochunk_need(block_rows) > budget

    n_pad = _round_up(n_tokens, block_rows)
    x2d = x.reshape(n_tokens, D)
    if n_pad != n_tokens:
        x2d = jnp.pad(x2d, ((0, n_pad - n_tokens), (0, 0)))

    gamma2 = gamma.reshape(1, D)
    beta2 = beta.reshape(1, D)
    w1_bf = w1.astype(jnp.bfloat16)
    w2_bf = w2.astype(jnp.bfloat16)
    b1_2 = b1.reshape(1, d_ff)
    b2_2 = b2.reshape(1, D)

    if not use_chunk:
        # ---- resident-weight path: each weight byte read from HBM exactly once ----
        cost = pl.CostEstimate(
            flops=int(4 * n_pad * D * d_ff),
            transcendentals=int(n_pad * d_ff),
            bytes_accessed=int(2 * n_pad * D * itemsize + 2 * D * d_ff * 2
                               + (d_ff + 3 * D) * 4))
        vmem_limit = int(min(int(0.85 * cap),
                             max(32 * 2 ** 20, int(1.3 * nochunk_need(block_rows)))))
        out2d = pl.pallas_call(
            _ffn_kernel_resident,
            out_shape=jax.ShapeDtypeStruct((n_pad, D), x.dtype),
            grid_spec=pltpu.PrefetchScalarGridSpec(
                num_scalar_prefetch=0,
                grid=(n_pad // block_rows,),
                in_specs=[
                    pl.BlockSpec((block_rows, D), lambda i: (i, 0)),   # x rows
                    pl.BlockSpec((1, D), lambda i: (0, 0)),            # gamma
                    pl.BlockSpec((1, D), lambda i: (0, 0)),            # beta
                    pl.BlockSpec((D, d_ff), lambda i: (0, 0)),         # w1 (resident)
                    pl.BlockSpec((1, d_ff), lambda i: (0, 0)),         # b1
                    pl.BlockSpec((d_ff, D), lambda i: (0, 0)),         # w2 (resident)
                    pl.BlockSpec((1, D), lambda i: (0, 0)),            # b2
                ],
                out_specs=pl.BlockSpec((block_rows, D), lambda i: (i, 0))),
            compiler_params=pltpu.CompilerParams(
                dimension_semantics=("parallel",),
                vmem_limit_bytes=vmem_limit),
            cost_estimate=cost,
        )(x2d, gamma2, beta2, w1_bf, b1_2, w2_bf, b2_2)
        return out2d[:n_tokens].reshape(B, L, D)

    # ---- fallback: d_ff reduction axis with resident f32 accumulator ----
    block_ff = _round_up(block_ff, 128)
    if d_ff <= block_ff:
        block_ff = d_ff
        d_ff_pad = d_ff
    else:
        d_ff_pad = _round_up(d_ff, block_ff)
    if d_ff_pad != d_ff:
        w1_bf = jnp.pad(w1_bf, ((0, 0), (0, d_ff_pad - d_ff)))
        b1_2 = jnp.pad(b1_2, ((0, 0), (0, d_ff_pad - d_ff)))
        w2_bf = jnp.pad(w2_bf, ((0, d_ff_pad - d_ff), (0, 0)))

    grid = (n_pad // block_rows, d_ff_pad // block_ff)
    cost = pl.CostEstimate(
        flops=int(4 * n_pad * D * d_ff_pad),
        transcendentals=int(n_pad * d_ff_pad),
        bytes_accessed=int(n_pad * D * 4 + n_pad * D * itemsize
                           + w1_bf.size * 2 + w2_bf.size * 2
                           + (b1_2.size + b2_2.size + 2 * D) * 4))
    need = 2 * (block_rows * D * 4 + block_rows * D * itemsize
                + D * block_ff * 2 + block_ff * D * 2 + block_ff * 4 + 4 * D * 4)
    need += block_rows * D * 6 + 2 * block_rows * block_ff * 4
    vmem_limit = int(min(int(0.85 * cap), max(32 * 2 ** 20, int(1.5 * need))))

    out2d = pl.pallas_call(
        _ffn_kernel_chunked,
        out_shape=jax.ShapeDtypeStruct((n_pad, D), x.dtype),
        grid_spec=pltpu.PrefetchScalarGridSpec(
            num_scalar_prefetch=0,
            grid=grid,
            in_specs=[
                pl.BlockSpec((block_rows, D), lambda i, k: (i, 0)),   # x rows (resident over k)
                pl.BlockSpec((1, D), lambda i, k: (0, 0)),            # gamma
                pl.BlockSpec((1, D), lambda i, k: (0, 0)),            # beta
                pl.BlockSpec((D, block_ff), lambda i, k: (0, k)),     # w1 chunk
                pl.BlockSpec((1, block_ff), lambda i, k: (0, k)),     # b1 chunk
                pl.BlockSpec((block_ff, D), lambda i, k: (k, 0)),     # w2 chunk
                pl.BlockSpec((1, D), lambda i, k: (0, 0)),            # b2
            ],
            out_specs=pl.BlockSpec((block_rows, D), lambda i, k: (i, 0)),
            scratch_shapes=[pltpu.VMEM((block_rows, D), jnp.bfloat16),  # LN(x) bf16
                            pltpu.VMEM((block_rows, D), jnp.float32)],  # f32 accumulator
        ),
        compiler_params=pltpu.CompilerParams(
            dimension_semantics=("parallel", "arbitrary"),
            vmem_limit_bytes=vmem_limit),
        cost_estimate=cost,
    )(x2d, gamma2, beta2, w1_bf, b1_2, w2_bf, b2_2)

    return out2d[:n_tokens].reshape(B, L, D)


# ---------------------------------------------------------------------------
# Full decoder layer
# ---------------------------------------------------------------------------
@functools.partial(jax.jit, static_argnames=("heads", "block_q", "block_rows", "block_ff"))
def transformer_decoder_layer(inputs, memory_bank, src_pad_mask, tgt_pad_mask,
                              params, *, heads, block_q=256, block_rows=512, block_ff=512):
    """Eval-mode forward of TransformerDecoderLayer. Returns (output, all_input)."""
    # Pad masks are key-padding masks broadcast along the query axis (standard usage);
    # reduce to one row per key so the kernel never DMAs an O(Lq*Lk) mask.  The causal
    # subsequent-mask is generated inside the self-attention kernel.
    tgt_key_pad = (tgt_pad_mask > 0).any(axis=1).astype(jnp.int32)   # (B, Lq)
    src_key_pad = (src_pad_mask > 0).any(axis=1).astype(jnp.int32)   # (B, Lsrc)

    # Self-attention: q/k/v from LayerNorm1(inputs); residual adds inputs; causal+pad mask.
    query, all_input = _mha_pallas(
        inputs, inputs, tgt_key_pad, params["ln1"]["g"], params["ln1"]["b"],
        params["self_attn"], heads=heads, ln_kv=True, causal=True,
        emit_qnorm=True, block_q=block_q)

    # Context attention: query from LayerNorm2(query); key/value from memory_bank (raw).
    mid = _mha_pallas(
        query, memory_bank, src_key_pad, params["ln2"]["g"], params["ln2"]["b"],
        params["ctx_attn"], heads=heads, ln_kv=False, causal=False,
        emit_qnorm=False, block_q=block_q)

    # Position-wise feed-forward (LayerNorm -> Linear -> GELU -> Linear -> +residual).
    f = params["ffn"]
    output = _ffn_pallas(mid, f["ln_g"], f["ln_b"], f["w1"], f["b1"], f["w2"], f["b2"],
                         block_rows=block_rows, block_ff=block_ff)
    return output, all_input


# ---------------------------------------------------------------------------
# Pure-JAX reference (dropout = identity).  emulate_bf16=True mirrors the kernel's
# bf16 MXU operand casts (attention + FFN) with f32 accumulation.
# ---------------------------------------------------------------------------
def reference_decoder_layer(inputs, memory_bank, src_pad_mask, tgt_pad_mask, params,
                            *, heads, emulate_bf16):
    cast = ((lambda a: a.astype(jnp.bfloat16).astype(jnp.float32))
            if emulate_bf16 else (lambda a: a))

    def layer_norm(x, g, b):
        m = jnp.mean(x, axis=-1, keepdims=True)
        v = jnp.mean((x - m) ** 2, axis=-1, keepdims=True)
        return (x - m) / jnp.sqrt(v + 1e-6) * g + b

    def mha(q_in, kv_in, mask, p):
        B, Lq, D = q_in.shape
        Lk = kv_in.shape[1]
        dh = D // heads
        q = cast(q_in) @ cast(p["wq"]) + p["bq"]
        k = cast(kv_in) @ cast(p["wk"]) + p["bk"]
        v = cast(kv_in) @ cast(p["wv"]) + p["bv"]
        sh = lambda t, L: t.reshape(B, L, heads, dh).transpose(0, 2, 1, 3)
        q = cast(sh(q, Lq) / math.sqrt(dh))
        k = cast(sh(k, Lk))
        v = cast(sh(v, Lk))
        scores = jnp.einsum("bhqd,bhkd->bhqk", q, k)
        scores = jnp.where(mask[:, None, :, :], -1e18, scores)
        attn = jax.nn.softmax(scores, axis=-1)
        ctx = jnp.einsum("bhqk,bhkd->bhqd", cast(attn), v)
        ctx = cast(ctx.transpose(0, 2, 1, 3).reshape(B, Lq, D))
        return ctx @ cast(p["wo"]) + p["bo"]

    L = inputs.shape[1]
    causal = jnp.triu(jnp.ones((L, L), jnp.int32), k=1)
    dec_mask = (tgt_pad_mask.astype(jnp.int32) + causal[None]) > 0
    src_mask = src_pad_mask.astype(jnp.int32) > 0

    input_norm = layer_norm(inputs, params["ln1"]["g"], params["ln1"]["b"])
    all_input = input_norm
    query = mha(input_norm, input_norm, dec_mask, params["self_attn"]) + inputs
    query_norm = layer_norm(query, params["ln2"]["g"], params["ln2"]["b"])
    mid = mha(query_norm, memory_bank, src_mask, params["ctx_attn"]) + query

    f = params["ffn"]
    xn = layer_norm(mid, f["ln_g"], f["ln_b"])
    h = cast(xn) @ cast(f["w1"]) + f["b1"]
    h = 0.5 * h * (1.0 + jnp.tanh(_GELU_C * (h + 0.044715 * h ** 3)))
    out = cast(h) @ cast(f["w2"]) + f["b2"] + mid
    return out, all_input


if __name__ == "__main__":
    batch, tgt_len, src_len = 2, 8, 16
    d_model, heads, d_ff = 256, 4, 512     # dim_per_head = 64

    key = jax.random.PRNGKey(0)
    k_in, k_mem, k_p = jax.random.split(key, 3)
    inputs = jax.random.normal(k_in, (batch, tgt_len, d_model), jnp.float32)
    memory_bank = jax.random.normal(k_mem, (batch, src_len, d_model), jnp.float32)

    # pad masks (1 = padded key position), expanded along the query dimension
    tgt_pad = jnp.zeros((batch, tgt_len), jnp.int32).at[1, -2:].set(1)
    src_pad = jnp.zeros((batch, src_len), jnp.int32).at[0, -3:].set(1)
    tgt_pad_mask = jnp.broadcast_to(tgt_pad[:, None, :], (batch, tgt_len, tgt_len))
    src_pad_mask = jnp.broadcast_to(src_pad[:, None, :], (batch, tgt_len, src_len))

    def linear(k, fan_in, fan_out):
        kw, kb = jax.random.split(k)
        lim = 1.0 / math.sqrt(fan_in)
        return (jax.random.uniform(kw, (fan_in, fan_out), jnp.float32, -lim, lim),
                jax.random.uniform(kb, (fan_out,), jnp.float32, -lim, lim))

    ks = jax.random.split(k_p, 4)

    def attn_params(k4):
        ka, kb_, kc, kd = jax.random.split(k4, 4)
        wq, bq = linear(ka, d_model, d_model)
        wk, bk = linear(kb_, d_model, d_model)
        wv, bv = linear(kc, d_model, d_model)
        wo, bo = linear(kd, d_model, d_model)
        return dict(wq=wq, bq=bq, wk=wk, bk=bk, wv=wv, bv=bv, wo=wo, bo=bo)

    w1, b1 = linear(ks[2], d_model, d_ff)
    w2, b2 = linear(ks[3], d_ff, d_model)
    ones = jnp.ones((d_model,), jnp.float32)
    zeros = jnp.zeros((d_model,), jnp.float32)
    params = {
        "ln1": {"g": ones, "b": zeros},
        "ln2": {"g": ones, "b": zeros},
        "self_attn": attn_params(ks[0]),
        "ctx_attn": attn_params(ks[1]),
        "ffn": {"ln_g": ones, "ln_b": zeros, "w1": w1, "b1": b1, "w2": w2, "b2": b2},
    }

    output, all_input = transformer_decoder_layer(
        inputs, memory_bank, src_pad_mask, tgt_pad_mask, params, heads=heads)
    output = jax.block_until_ready(output)
    all_input = jax.block_until_ready(all_input)

    assert output.shape == (batch, tgt_len, d_model)
    assert all_input.shape == (batch, tgt_len, d_model)

    ref_out_bf, ref_all = reference_decoder_layer(
        inputs, memory_bank, src_pad_mask, tgt_pad_mask, params,
        heads=heads, emulate_bf16=True)
    ref_out_f32, _ = reference_decoder_layer(
        inputs, memory_bank, src_pad_mask, tgt_pad_mask, params,
        heads=heads, emulate_bf16=False)

    err_all = float(jnp.max(jnp.abs(all_input - ref_all)))
    err_bf = float(jnp.max(jnp.abs(output - ref_out_bf)))
    err_f32 = float(jnp.max(jnp.abs(output - ref_out_f32)))
    assert err_all < 5e-4, err_all    # LayerNorm(inputs) path is pure f32
    assert err_bf < 1e-2, err_bf      # vs reference emulating the kernel's bf16 matmuls
    assert err_f32 < 6e-2, err_f32    # bounded bf16 quantization vs pure-f32 reference

    print("KERNEL_OK")
</pallas_src>

<mosaic_0001>
module attributes {stable_mosaic.version = 11 : i64} {
  func.func @_attn_kernel(%arg0: i32, %arg1: i32, %arg2: memref<1x8x256xf32, #tpu.memory_space<vmem>>, %arg3: memref<1x16x256xf32, #tpu.memory_space<vmem>>, %arg4: memref<1x1x16xi32, #tpu.memory_space<vmem>>, %arg5: memref<1x256xf32, #tpu.memory_space<vmem>>, %arg6: memref<1x256xf32, #tpu.memory_space<vmem>>, %arg7: memref<256x256xbf16, #tpu.memory_space<vmem>>, %arg8: memref<1x256xf32, #tpu.memory_space<vmem>>, %arg9: memref<256x512xbf16, #tpu.memory_space<vmem>>, %arg10: memref<1x512xf32, #tpu.memory_space<vmem>>, %arg11: memref<256x256xbf16, #tpu.memory_space<vmem>>, %arg12: memref<1x256xf32, #tpu.memory_space<vmem>>, %arg13: memref<1x8x256xf32, #tpu.memory_space<vmem>>, %arg14: memref<16x256xbf16, #tpu.memory_space<vmem>>, %arg15: memref<16x256xbf16, #tpu.memory_space<vmem>>) attributes {dimension_semantics = [#tpu.dimension_semantics<parallel>, #tpu.dimension_semantics<arbitrary>], iteration_bounds = array<i64: 2, 1>, scalar_prefetch = 0 : i64, scratch_operands = 2 : i64, tpu.core_type = #tpu.core_type<tc>, window_params = [{transform_indices = @transform_0, window_bounds = array<i64: 1, 8, 256>}, {transform_indices = @transform_1, window_bounds = array<i64: 1, 16, 256>}, {transform_indices = @transform_2, window_bounds = array<i64: 1, 1, 16>}, {pipeline_mode = #tpu.pipeline_mode<synchronous>, transform_indices = @transform_3, window_bounds = array<i64: 1, 256>}, {pipeline_mode = #tpu.pipeline_mode<synchronous>, transform_indices = @transform_4, window_bounds = array<i64: 1, 256>}, {pipeline_mode = #tpu.pipeline_mode<synchronous>, transform_indices = @transform_5, window_bounds = array<i64: 256, 256>}, {pipeline_mode = #tpu.pipeline_mode<synchronous>, transform_indices = @transform_6, window_bounds = array<i64: 1, 256>}, {pipeline_mode = #tpu.pipeline_mode<synchronous>, transform_indices = @transform_7, window_bounds = array<i64: 256, 512>}, {pipeline_mode = #tpu.pipeline_mode<synchronous>, transform_indices = @transform_8, window_bounds = array<i64: 1, 512>}, {pipeline_mode = #tpu.pipeline_mode<synchronous>, transform_indices = @transform_9, window_bounds = array<i64: 256, 256>}, {pipeline_mode = #tpu.pipeline_mode<synchronous>, transform_indices = @transform_10, window_bounds = array<i64: 1, 256>}, {transform_indices = @transform_11, window_bounds = array<i64: 1, 8, 256>}]} {
    %c0 = arith.constant 0 : index
    %c0_0 = arith.constant 0 : index
    %0 = vector.load %arg5[%c0, %c0_0] : memref<1x256xf32, #tpu.memory_space<vmem>>, vector<1x256xf32>
    %c0_1 = arith.constant 0 : index
    %c0_2 = arith.constant 0 : index
    %1 = vector.load %arg6[%c0_1, %c0_2] : memref<1x256xf32, #tpu.memory_space<vmem>>, vector<1x256xf32>
    %c0_i32 = arith.constant 0 : i32
    %2 = arith.cmpi eq, %arg1, %c0_i32 : i32
    %3 = arith.extui %2 : i1 to i32
    %c0_i32_3 = arith.constant 0 : i32
    %4 = arith.cmpi ne, %3, %c0_i32_3 : i32
    scf.if %4 {
      %c0_53 = arith.constant 0 : index
      %c0_54 = arith.constant 0 : index
      %c0_55 = arith.constant 0 : index
      %127 = vector.load %arg3[%c0_53, %c0_54, %c0_55] : memref<1x16x256xf32, #tpu.memory_space<vmem>>, vector<1x16x256xf32>
      %128 = vector.shape_cast %127 : vector<1x16x256xf32> to vector<16x256xf32>
      %129 = arith.truncf %128 : vector<16x256xf32> to vector<16x256xbf16>
      %c0_56 = arith.constant 0 : index
      %c0_57 = arith.constant 0 : index
      %130 = vector.load %arg9[%c0_56, %c0_57] : memref<256x512xbf16, #tpu.memory_space<vmem>>, vector<256x512xbf16>
      %cst_58 = arith.constant dense<0.000000e+00> : vector<16x512xf32>
      %131 = tpu.matmul %129, %130, %cst_58 {dimension_numbers = #tpu.dot_dimension_numbers<[1], [0], [0], [1], [0, 0, 1, 1], [], []>} : vector<16x256xbf16>, vector<256x512xbf16>, vector<16x512xf32> -> vector<16x512xf32>
      %c0_59 = arith.constant 0 : index
      %c0_60 = arith.constant 0 : index
      %132 = vector.load %arg10[%c0_59, %c0_60] : memref<1x512xf32, #tpu.memory_space<vmem>>, vector<1x512xf32>
      %133 = vector.broadcast %132 : vector<1x512xf32> to vector<16x512xf32>
      %134 = arith.addf %131, %133 : vector<16x512xf32>
      %135 = vector.extract_strided_slice %134 {offsets = [0, 0], sizes = [16, 256], strides = [1, 1]} : vector<16x512xf32> to vector<16x256xf32>
      %136 = arith.truncf %135 : vector<16x256xf32> to vector<16x256xbf16>
      %c0_61 = arith.constant 0 : index
      %c0_62 = arith.constant 0 : index
      %137 = vector.load %arg14[%c0_61, %c0_62] : memref<16x256xbf16, #tpu.memory_space<vmem>>, vector<16x256xbf16>
      tpu.vector_store %arg14[%c0_61, %c0_62], %136 {strides = array<i32>} : memref<16x256xbf16, #tpu.memory_space<vmem>>, vector<16x256xbf16>,
      %138 = vector.extract_strided_slice %134 {offsets = [0, 256], sizes = [16, 256], strides = [1, 1]} : vector<16x512xf32> to vector<16x256xf32>
      %139 = arith.truncf %138 : vector<16x256xf32> to vector<16x256xbf16>
      %c0_63 = arith.constant 0 : index
      %c0_64 = arith.constant 0 : index
      %140 = vector.load %arg15[%c0_63, %c0_64] : memref<16x256xbf16, #tpu.memory_space<vmem>>, vector<16x256xbf16>
      tpu.vector_store %arg15[%c0_63, %c0_64], %139 {strides = array<i32>} : memref<16x256xbf16, #tpu.memory_space<vmem>>, vector<16x256xbf16>,
    } else {
    }
    %c0_4 = arith.constant 0 : index
    %c0_5 = arith.constant 0 : index
    %c0_6 = arith.constant 0 : index
    %5 = vector.load %arg2[%c0_4, %c0_5, %c0_6] : memref<1x8x256xf32, #tpu.memory_space<vmem>>, vector<1x8x256xf32>
    %6 = vector.shape_cast %5 : vector<1x8x256xf32> to vector<8x256xf32>
    %cst = arith.constant dense<0.000000e+00> : vector<8xf32>
    %7 = vector.multi_reduction <add>, %6, %cst [1] : vector<8x256xf32> to vector<8xf32>
    %8 = vector.shape_cast %7 : vector<8xf32> to vector<8x1xf32>
    %cst_7 = arith.constant 2.560000e+02 : f32
    %9 = vector.broadcast %cst_7 : f32 to vector<8x1xf32>
    %10 = arith.divf %8, %9 : vector<8x1xf32>
    %11 = vector.broadcast %10 : vector<8x1xf32> to vector<8x256xf32>
    %12 = arith.subf %6, %11 : vector<8x256xf32>
    %13 = arith.mulf %12, %12 : vector<8x256xf32>
    %cst_8 = arith.constant dense<0.000000e+00> : vector<8xf32>
    %14 = vector.multi_reduction <add>, %13, %cst_8 [1] : vector<8x256xf32> to vector<8xf32>
    %15 = vector.shape_cast %14 : vector<8xf32> to vector<8x1xf32>
    %cst_9 = arith.constant 2.560000e+02 : f32
    %16 = vector.broadcast %cst_9 : f32 to vector<8x1xf32>
    %17 = arith.divf %15, %16 : vector<8x1xf32>
    %cst_10 = arith.constant 9.99999997E-7 : f32
    %18 = vector.broadcast %cst_10 : f32 to vector<8x1xf32>
    %19 = arith.addf %17, %18 : vector<8x1xf32>
    %20 = math.rsqrt %19 : vector<8x1xf32>
    %21 = vector.broadcast %20 : vector<8x1xf32> to vector<8x256xf32>
    %22 = arith.mulf %12, %21 : vector<8x256xf32>
    %23 = vector.broadcast %0 : vector<1x256xf32> to vector<8x256xf32>
    %24 = arith.mulf %22, %23 : vector<8x256xf32>
    %25 = vector.broadcast %1 : vector<1x256xf32> to vector<8x256xf32>
    %26 = arith.addf %24, %25 : vector<8x256xf32>
    %27 = arith.truncf %26 : vector<8x256xf32> to vector<8x256xbf16>
    %c0_11 = arith.constant 0 : index
    %c0_12 = arith.constant 0 : index
    %28 = vector.load %arg7[%c0_11, %c0_12] : memref<256x256xbf16, #tpu.memory_space<vmem>>, vector<256x256xbf16>
    %cst_13 = arith.constant dense<0.000000e+00> : vector<8x256xf32>
    %29 = tpu.matmul %27, %28, %cst_13 {dimension_numbers = #tpu.dot_dimension_numbers<[1], [0], [0], [1], [0, 0, 1, 1], [], []>} : vector<8x256xbf16>, vector<256x256xbf16>, vector<8x256xf32> -> vector<8x256xf32>
    %c0_14 = arith.constant 0 : index
    %c0_15 = arith.constant 0 : index
    %30 = vector.load %arg8[%c0_14, %c0_15] : memref<1x256xf32, #tpu.memory_space<vmem>>, vector<1x256xf32>
    %31 = vector.broadcast %30 : vector<1x256xf32> to vector<8x256xf32>
    %32 = arith.addf %29, %31 : vector<8x256xf32>
    %cst_16 = arith.constant 1.250000e-01 : f32
    %33 = vector.broadcast %cst_16 : f32 to vector<8x256xf32>
    %34 = arith.mulf %32, %33 : vector<8x256xf32>
    %35 = arith.truncf %34 : vector<8x256xf32> to vector<8x256xbf16>
    %c0_17 = arith.constant 0 : index
    %c0_18 = arith.constant 0 : index
    %c0_19 = arith.constant 0 : index
    %36 = vector.load %arg4[%c0_17, %c0_18, %c0_19] : memref<1x1x16xi32, #tpu.memory_space<vmem>>, vector<1x1x16xi32>
    %37 = vector.shape_cast %36 : vector<1x1x16xi32> to vector<1x16xi32>
    %c0_i32_20 = arith.constant 0 : i32
    %38 = vector.broadcast %c0_i32_20 : i32 to vector<1x16xi32>
    %39 = arith.cmpi sgt, %37, %38 : vector<1x16xi32>
    %40 = vector.shape_cast %39 : vector<1x16xi1> to vector<1x16xi1>
    %41 = vector.broadcast %40 : vector<1x16xi1> to vector<8x16xi1>
    %c0_21 = arith.constant 0 : index
    %c0_22 = arith.constant 0 : index
    %42 = vector.load %arg14[%c0_21, %c0_22] : memref<16x256xbf16, #tpu.memory_space<vmem>>, vector<16x256xbf16>
    %c0_23 = arith.constant 0 : index
    %c0_24 = arith.constant 0 : index
    %43 = vector.load %arg15[%c0_23, %c0_24] : memref<16x256xbf16, #tpu.memory_space<vmem>>, vector<16x256xbf16>
    %44 = vector.extract_strided_slice %35 {offsets = [0, 0], sizes = [8, 64], strides = [1, 1]} : vector<8x256xbf16> to vector<8x64xbf16>
    %45 = vector.extract_strided_slice %42 {offsets = [0, 0], sizes = [16, 64], strides = [1, 1]} : vector<16x256xbf16> to vector<16x64xbf16>
    %cst_25 = arith.constant dense<0.000000e+00> : vector<8x16xf32>
    %46 = tpu.matmul %44, %45, %cst_25 {dimension_numbers = #tpu.dot_dimension_numbers<[1], [1], [0], [0], [0, 0, 1, 0], [], []>} : vector<8x64xbf16>, vector<16x64xbf16>, vector<8x16xf32> -> vector<8x16xf32>
    %cst_26 = arith.constant -9.99999984E+17 : f32
    %47 = vector.broadcast %cst_26 : f32 to vector<8x16xf32>
    %48 = arith.select %41, %47, %46 : vector<8x16xi1>, vector<8x16xf32>
    %cst_27 = arith.constant dense<0xFF800000> : vector<8xf32>
    %49 = vector.multi_reduction <maximumf>, %48, %cst_27 [1] : vector<8x16xf32> to vector<8xf32>
    %50 = vector.shape_cast %49 : vector<8xf32> to vector<8x1xf32>
    %51 = vector.broadcast %50 : vector<8x1xf32> to vector<8x16xf32>
    %52 = arith.subf %48, %51 : vector<8x16xf32>
    %53 = math.exp %52 : vector<8x16xf32>
    %cst_28 = arith.constant dense<0.000000e+00> : vector<8xf32>
    %54 = vector.multi_reduction <add>, %53, %cst_28 [1] : vector<8x16xf32> to vector<8xf32>
    %55 = vector.shape_cast %54 : vector<8xf32> to vector<8x1xf32>
    %56 = tpu.reciprocal %55 {approx = true} : vector<8x1xf32> -> vector<8x1xf32>
    %57 = vector.broadcast %56 : vector<8x1xf32> to vector<8x16xf32>
    %58 = arith.mulf %53, %57 : vector<8x16xf32>
    %59 = arith.truncf %58 : vector<8x16xf32> to vector<8x16xbf16>
    %60 = vector.extract_strided_slice %43 {offsets = [0, 0], sizes = [16, 64], strides = [1, 1]} : vector<16x256xbf16> to vector<16x64xbf16>
    %cst_29 = arith.constant dense<0.000000e+00> : vector<8x64xf32>
    %61 = tpu.matmul %59, %60, %cst_29 {dimension_numbers = #tpu.dot_dimension_numbers<[1], [0], [0], [1], [0, 0, 1, 1], [], []>} : vector<8x16xbf16>, vector<16x64xbf16>, vector<8x64xf32> -> vector<8x64xf32>
    %62 = vector.extract_strided_slice %35 {offsets = [0, 64], sizes = [8, 64], strides = [1, 1]} : vector<8x256xbf16> to vector<8x64xbf16>
    %63 = vector.extract_strided_slice %42 {offsets = [0, 64], sizes = [16, 64], strides = [1, 1]} : vector<16x256xbf16> to vector<16x64xbf16>
    %cst_30 = arith.constant dense<0.000000e+00> : vector<8x16xf32>
    %64 = tpu.matmul %62, %63, %cst_30 {dimension_numbers = #tpu.dot_dimension_numbers<[1], [1], [0], [0], [0, 0, 1, 0], [], []>} : vector<8x64xbf16>, vector<16x64xbf16>, vector<8x16xf32> -> vector<8x16xf32>
    %cst_31 = arith.constant -9.99999984E+17 : f32
    %65 = vector.broadcast %cst_31 : f32 to vector<8x16xf32>
    %66 = arith.select %41, %65, %64 : vector<8x16xi1>, vector<8x16xf32>
    %cst_32 = arith.constant dense<0xFF800000> : vector<8xf32>
    %67 = vector.multi_reduction <maximumf>, %66, %cst_32 [1] : vector<8x16xf32> to vector<8xf32>
    %68 = vector.shape_cast %67 : vector<8xf32> to vector<8x1xf32>
    %69 = vector.broadcast %68 : vector<8x1xf32> to vector<8x16xf32>
    %70 = arith.subf %66, %69 : vector<8x16xf32>
    %71 = math.exp %70 : vector<8x16xf32>
    %cst_33 = arith.constant dense<0.000000e+00> : vector<8xf32>
    %72 = vector.multi_reduction <add>, %71, %cst_33 [1] : vector<8x16xf32> to vector<8xf32>
    %73 = vector.shape_cast %72 : vector<8xf32> to vector<8x1xf32>
    %74 = tpu.reciprocal %73 {approx = true} : vector<8x1xf32> -> vector<8x1xf32>
    %75 = vector.broadcast %74 : vector<8x1xf32> to vector<8x16xf32>
    %76 = arith.mulf %71, %75 : vector<8x16xf32>
    %77 = arith.truncf %76 : vector<8x16xf32> to vector<8x16xbf16>
    %78 = vector.extract_strided_slice %43 {offsets = [0, 64], sizes = [16, 64], strides = [1, 1]} : vector<16x256xbf16> to vector<16x64xbf16>
    %cst_34 = arith.constant dense<0.000000e+00> : vector<8x64xf32>
    %79 = tpu.matmul %77, %78, %cst_34 {dimension_numbers = #tpu.dot_dimension_numbers<[1], [0], [0], [1], [0, 0, 1, 1], [], []>} : vector<8x16xbf16>, vector<16x64xbf16>, vector<8x64xf32> -> vector<8x64xf32>
    %80 = vector.extract_strided_slice %35 {offsets = [0, 128], sizes = [8, 64], strides = [1, 1]} : vector<8x256xbf16> to vector<8x64xbf16>
    %81 = vector.extract_strided_slice %42 {offsets = [0, 128], sizes = [16, 64], strides = [1, 1]} : vector<16x256xbf16> to vector<16x64xbf16>
    %cst_35 = arith.constant dense<0.000000e+00> : vector<8x16xf32>
    %82 = tpu.matmul %80, %81, %cst_35 {dimension_numbers = #tpu.dot_dimension_numbers<[1], [1], [0], [0], [0, 0, 1, 0], [], []>} : vector<8x64xbf16>, vector<16x64xbf16>, vector<8x16xf32> -> vector<8x16xf32>
    %cst_36 = arith.constant -9.99999984E+17 : f32
    %83 = vector.broadcast %cst_36 : f32 to vector<8x16xf32>
    %84 = arith.select %41, %83, %82 : vector<8x16xi1>, vector<8x16xf32>
    %cst_37 = arith.constant dense<0xFF800000> : vector<8xf32>
    %85 = vector.multi_reduction <maximumf>, %84, %cst_37 [1] : vector<8x16xf32> to vector<8xf32>
    %86 = vector.shape_cast %85 : vector<8xf32> to vector<8x1xf32>
    %87 = vector.broadcast %86 : vector<8x1xf32> to vector<8x16xf32>
    %88 = arith.subf %84, %87 : vector<8x16xf32>
    %89 = math.exp %88 : vector<8x16xf32>
    %cst_38 = arith.constant dense<0.000000e+00> : vector<8xf32>
    %90 = vector.multi_reduction <add>, %89, %cst_38 [1] : vector<8x16xf32> to vector<8xf32>
    %91 = vector.shape_cast %90 : vector<8xf32> to vector<8x1xf32>
    %92 = tpu.reciprocal %91 {approx = true} : vector<8x1xf32> -> vector<8x1xf32>
    %93 = vector.broadcast %92 : vector<8x1xf32> to vector<8x16xf32>
    %94 = arith.mulf %89, %93 : vector<8x16xf32>
    %95 = arith.truncf %94 : vector<8x16xf32> to vector<8x16xbf16>
    %96 = vector.extract_strided_slice %43 {offsets = [0, 128], sizes = [16, 64], strides = [1, 1]} : vector<16x256xbf16> to vector<16x64xbf16>
    %cst_39 = arith.constant dense<0.000000e+00> : vector<8x64xf32>
    %97 = tpu.matmul %95, %96, %cst_39 {dimension_numbers = #tpu.dot_dimension_numbers<[1], [0], [0], [1], [0, 0, 1, 1], [], []>} : vector<8x16xbf16>, vector<16x64xbf16>, vector<8x64xf32> -> vector<8x64xf32>
    %98 = vector.extract_strided_slice %35 {offsets = [0, 192], sizes = [8, 64], strides = [1, 1]} : vector<8x256xbf16> to vector<8x64xbf16>
    %99 = vector.extract_strided_slice %42 {offsets = [0, 192], sizes = [16, 64], strides = [1, 1]} : vector<16x256xbf16> to vector<16x64xbf16>
    %cst_40 = arith.constant dense<0.000000e+00> : vector<8x16xf32>
    %100 = tpu.matmul %98, %99, %cst_40 {dimension_numbers = #tpu.dot_dimension_numbers<[1], [1], [0], [0], [0, 0, 1, 0], [], []>} : vector<8x64xbf16>, vector<16x64xbf16>, vector<8x16xf32> -> vector<8x16xf32>
    %cst_41 = arith.constant -9.99999984E+17 : f32
    %101 = vector.broadcast %cst_41 : f32 to vector<8x16xf32>
    %102 = arith.select %41, %101, %100 : vector<8x16xi1>, vector<8x16xf32>
    %cst_42 = arith.constant dense<0xFF800000> : vector<8xf32>
    %103 = vector.multi_reduction <maximumf>, %102, %cst_42 [1] : vector<8x16xf32> to vector<8xf32>
    %104 = vector.shape_cast %103 : vector<8xf32> to vector<8x1xf32>
    %105 = vector.broadcast %104 : vector<8x1xf32> to vector<8x16xf32>
    %106 = arith.subf %102, %105 : vector<8x16xf32>
    %107 = math.exp %106 : vector<8x16xf32>
    %cst_43 = arith.constant dense<0.000000e+00> : vector<8xf32>
    %108 = vector.multi_reduction <add>, %107, %cst_43 [1] : vector<8x16xf32> to vector<8xf32>
    %109 = vector.shape_cast %108 : vector<8xf32> to vector<8x1xf32>
    %110 = tpu.reciprocal %109 {approx = true} : vector<8x1xf32> -> vector<8x1xf32>
    %111 = vector.broadcast %110 : vector<8x1xf32> to vector<8x16xf32>
    %112 = arith.mulf %107, %111 : vector<8x16xf32>
    %113 = arith.truncf %112 : vector<8x16xf32> to vector<8x16xbf16>
    %114 = vector.extract_strided_slice %43 {offsets = [0, 192], sizes = [16, 64], strides = [1, 1]} : vector<16x256xbf16> to vector<16x64xbf16>
    %cst_44 = arith.constant dense<0.000000e+00> : vector<8x64xf32>
    %115 = tpu.matmul %113, %114, %cst_44 {dimension_numbers = #tpu.dot_dimension_numbers<[1], [0], [0], [1], [0, 0, 1, 1], [], []>} : vector<8x16xbf16>, vector<16x64xbf16>, vector<8x64xf32> -> vector<8x64xf32>
    %116 = tpu.concatenate %61, %79, %97, %115 in 1 : vector<8x64xf32>, vector<8x64xf32>, vector<8x64xf32>, vector<8x64xf32> -> vector<8x256xf32>
    %117 = arith.truncf %116 : vector<8x256xf32> to vector<8x256xbf16>
    %c0_45 = arith.constant 0 : index
    %c0_46 = arith.constant 0 : index
    %118 = vector.load %arg11[%c0_45, %c0_46] : memref<256x256xbf16, #tpu.memory_space<vmem>>, vector<256x256xbf16>
    %cst_47 = arith.constant dense<0.000000e+00> : vector<8x256xf32>
    %119 = tpu.matmul %117, %118, %cst_47 {dimension_numbers = #tpu.dot_dimension_numbers<[1], [0], [0], [1], [0, 0, 1, 1], [], []>} : vector<8x256xbf16>, vector<256x256xbf16>, vector<8x256xf32> -> vector<8x256xf32>
    %c0_48 = arith.constant 0 : index
    %c0_49 = arith.constant 0 : index
    %120 = vector.load %arg12[%c0_48, %c0_49] : memref<1x256xf32, #tpu.memory_space<vmem>>, vector<1x256xf32>
    %121 = vector.broadcast %120 : vector<1x256xf32> to vector<8x256xf32>
    %122 = arith.addf %119, %121 : vector<8x256xf32>
    %123 = arith.addf %122, %6 : vector<8x256xf32>
    %c0_50 = arith.constant 0 : index
    %c0_51 = arith.constant 0 : index
    %c0_52 = arith.constant 0 : index
    %124 = vector.load %arg13[%c0_50, %c0_51, %c0_52] : memref<1x8x256xf32, #tpu.memory_space<vmem>>, vector<1x8x256xf32>
    %125 = vector.shape_cast %124 : vector<1x8x256xf32> to vector<8x256xf32>
    %126 = vector.shape_cast %123 : vector<8x256xf32> to vector<1x8x256xf32>
    tpu.vector_store %arg13[%c0_50, %c0_51, %c0_52], %126 {strides = array<i32>} : memref<1x8x256xf32, #tpu.memory_space<vmem>>, vector<1x8x256xf32>,
    return
  }
  func.func @transform_0(%arg0: i32, %arg1: i32) -> (i32, i32, i32) {
    %c0_i32 = arith.constant 0 : i32
    %c0_i32_0 = arith.constant 0 : i32
    return %arg0, %arg1, %c0_i32 : i32, i32, i32
  }
  func.func @transform_1(%arg0: i32, %arg1: i32) -> (i32, i32, i32) {
    %c0_i32 = arith.constant 0 : i32
    %c0_i32_0 = arith.constant 0 : i32
    %c0_i32_1 = arith.constant 0 : i32
    return %arg0, %c0_i32, %c0_i32_0 : i32, i32, i32
  }
  func.func @transform_2(%arg0: i32, %arg1: i32) -> (i32, i32, i32) {
    %c0_i32 = arith.constant 0 : i32
    %c0_i32_0 = arith.constant 0 : i32
    %c0_i32_1 = arith.constant 0 : i32
    return %arg0, %c0_i32, %c0_i32_0 : i32, i32, i32
  }
  func.func @transform_3(%arg0: i32, %arg1: i32) -> (i32, i32) {
    %c0_i32 = arith.constant 0 : i32
    %c0_i32_0 = arith.constant 0 : i32
    %c0_i32_1 = arith.constant 0 : i32
    return %c0_i32, %c0_i32_0 : i32, i32
  }
  func.func @transform_4(%arg0: i32, %arg1: i32) -> (i32, i32) {
    %c0_i32 = arith.constant 0 : i32
    %c0_i32_0 = arith.constant 0 : i32
    %c0_i32_1 = arith.constant 0 : i32
    return %c0_i32, %c0_i32_0 : i32, i32
  }
  func.func @transform_5(%arg0: i32, %arg1: i32) -> (i32, i32) {
    %c0_i32 = arith.constant 0 : i32
    %c0_i32_0 = arith.constant 0 : i32
    %c0_i32_1 = arith.constant 0 : i32
    return %c0_i32, %c0_i32_0 : i32, i32
  }
  func.func @transform_6(%arg0: i32, %arg1: i32) -> (i32, i32) {
    %c0_i32 = arith.constant 0 : i32
    %c0_i32_0 = arith.constant 0 : i32
    %c0_i32_1 = arith.constant 0 : i32
    return %c0_i32, %c0_i32_0 : i32, i32
  }
  func.func @transform_7(%arg0: i32, %arg1: i32) -> (i32, i32) {
    %c0_i32 = arith.constant 0 : i32
    %c0_i32_0 = arith.constant 0 : i32
    %c0_i32_1 = arith.constant 0 : i32
    return %c0_i32, %c0_i32_0 : i32, i32
  }
  func.func @transform_8(%arg0: i32, %arg1: i32) -> (i32, i32) {
    %c0_i32 = arith.constant 0 : i32
    %c0_i32_0 = arith.constant 0 : i32
    %c0_i32_1 = arith.constant 0 : i32
    return %c0_i32, %c0_i32_0 : i32, i32
  }
  func.func @transform_9(%arg0: i32, %arg1: i32) -> (i32, i32) {
    %c0_i32 = arith.constant 0 : i32
    %c0_i32_0 = arith.constant 0 : i32
    %c0_i32_1 = arith.constant 0 : i32
    return %c0_i32, %c0_i32_0 : i32, i32
  }
  func.func @transform_10(%arg0: i32, %arg1: i32) -> (i32, i32) {
    %c0_i32 = arith.constant 0 : i32
    %c0_i32_0 = arith.constant 0 : i32
    %c0_i32_1 = arith.constant 0 : i32
    return %c0_i32, %c0_i32_0 : i32, i32
  }
  func.func @transform_11(%arg0: i32, %arg1: i32) -> (i32, i32, i32) {
    %c0_i32 = arith.constant 0 : i32
    %c0_i32_0 = arith.constant 0 : i32
    return %arg0, %arg1, %c0_i32 : i32, i32, i32
  }
}

module attributes {stable_mosaic.version = 11 : i64} {
  func.func @_attn_kernel(%arg0: i32, %arg1: i32, %arg2: memref<1x8x256xf32, #tpu.memory_space<vmem>>, %arg3: memref<1x8x256xf32, #tpu.memory_space<vmem>>, %arg4: memref<1x1x8xi32, #tpu.memory_space<vmem>>, %arg5: memref<1x256xf32, #tpu.memory_space<vmem>>, %arg6: memref<1x256xf32, #tpu.memory_space<vmem>>, %arg7: memref<256x256xbf16, #tpu.memory_space<vmem>>, %arg8: memref<1x256xf32, #tpu.memory_space<vmem>>, %arg9: memref<256x512xbf16, #tpu.memory_space<vmem>>, %arg10: memref<1x512xf32, #tpu.memory_space<vmem>>, %arg11: memref<256x256xbf16, #tpu.memory_space<vmem>>, %arg12: memref<1x256xf32, #tpu.memory_space<vmem>>, %arg13: memref<1x8x256xf32, #tpu.memory_space<vmem>>, %arg14: memref<1x8x256xf32, #tpu.memory_space<vmem>>, %arg15: memref<8x256xbf16, #tpu.memory_space<vmem>>, %arg16: memref<8x256xbf16, #tpu.memory_space<vmem>>) attributes {dimension_semantics = [#tpu.dimension_semantics<parallel>, #tpu.dimension_semantics<arbitrary>], iteration_bounds = array<i64: 2, 1>, scalar_prefetch = 0 : i64, scratch_operands = 2 : i64, tpu.core_type = #tpu.core_type<tc>, window_params = [{transform_indices = @transform_0, window_bounds = array<i64: 1, 8, 256>}, {transform_indices = @transform_1, window_bounds = array<i64: 1, 8, 256>}, {transform_indices = @transform_2, window_bounds = array<i64: 1, 1, 8>}, {pipeline_mode = #tpu.pipeline_mode<synchronous>, transform_indices = @transform_3, window_bounds = array<i64: 1, 256>}, {pipeline_mode = #tpu.pipeline_mode<synchronous>, transform_indices = @transform_4, window_bounds = array<i64: 1, 256>}, {pipeline_mode = #tpu.pipeline_mode<synchronous>, transform_indices = @transform_5, window_bounds = array<i64: 256, 256>}, {pipeline_mode = #tpu.pipeline_mode<synchronous>, transform_indices = @transform_6, window_bounds = array<i64: 1, 256>}, {pipeline_mode = #tpu.pipeline_mode<synchronous>, transform_indices = @transform_7, window_bounds = array<i64: 256, 512>}, {pipeline_mode = #tpu.pipeline_mode<synchronous>, transform_indices = @transform_8, window_bounds = array<i64: 1, 512>}, {pipeline_mode = #tpu.pipeline_mode<synchronous>, transform_indices = @transform_9, window_bounds = array<i64: 256, 256>}, {pipeline_mode = #tpu.pipeline_mode<synchronous>, transform_indices = @transform_10, window_bounds = array<i64: 1, 256>}, {transform_indices = @transform_11, window_bounds = array<i64: 1, 8, 256>}, {transform_indices = @transform_12, window_bounds = array<i64: 1, 8, 256>}]} {
    %c0 = arith.constant 0 : index
    %c0_0 = arith.constant 0 : index
    %0 = vector.load %arg5[%c0, %c0_0] : memref<1x256xf32, #tpu.memory_space<vmem>>, vector<1x256xf32>
    %c0_1 = arith.constant 0 : index
    %c0_2 = arith.constant 0 : index
    %1 = vector.load %arg6[%c0_1, %c0_2] : memref<1x256xf32, #tpu.memory_space<vmem>>, vector<1x256xf32>
    %c0_i32 = arith.constant 0 : i32
    %2 = arith.cmpi eq, %arg1, %c0_i32 : i32
    %3 = arith.extui %2 : i1 to i32
    %c0_i32_3 = arith.constant 0 : i32
    %4 = arith.cmpi ne, %3, %c0_i32_3 : i32
    scf.if %4 {
      %c0_56 = arith.constant 0 : index
      %c0_57 = arith.constant 0 : index
      %c0_58 = arith.constant 0 : index
      %137 = vector.load %arg3[%c0_56, %c0_57, %c0_58] : memref<1x8x256xf32, #tpu.memory_space<vmem>>, vector<1x8x256xf32>
      %138 = vector.shape_cast %137 : vector<1x8x256xf32> to vector<8x256xf32>
      %cst_59 = arith.constant dense<0.000000e+00> : vector<8xf32>
      %139 = vector.multi_reduction <add>, %138, %cst_59 [1] : vector<8x256xf32> to vector<8xf32>
      %140 = vector.shape_cast %139 : vector<8xf32> to vector<8x1xf32>
      %cst_60 = arith.constant 2.560000e+02 : f32
      %141 = vector.broadcast %cst_60 : f32 to vector<8x1xf32>
      %142 = arith.divf %140, %141 : vector<8x1xf32>
      %143 = vector.broadcast %142 : vector<8x1xf32> to vector<8x256xf32>
      %144 = arith.subf %138, %143 : vector<8x256xf32>
      %145 = arith.mulf %144, %144 : vector<8x256xf32>
      %cst_61 = arith.constant dense<0.000000e+00> : vector<8xf32>
      %146 = vector.multi_reduction <add>, %145, %cst_61 [1] : vector<8x256xf32> to vector<8xf32>
      %147 = vector.shape_cast %146 : vector<8xf32> to vector<8x1xf32>
      %cst_62 = arith.constant 2.560000e+02 : f32
      %148 = vector.broadcast %cst_62 : f32 to vector<8x1xf32>
      %149 = arith.divf %147, %148 : vector<8x1xf32>
      %cst_63 = arith.constant 9.99999997E-7 : f32
      %150 = vector.broadcast %cst_63 : f32 to vector<8x1xf32>
      %151 = arith.addf %149, %150 : vector<8x1xf32>
      %152 = math.rsqrt %151 : vector<8x1xf32>
      %153 = vector.broadcast %152 : vector<8x1xf32> to vector<8x256xf32>
      %154 = arith.mulf %144, %153 : vector<8x256xf32>
      %155 = vector.broadcast %0 : vector<1x256xf32> to vector<8x256xf32>
      %156 = arith.mulf %154, %155 : vector<8x256xf32>
      %157 = vector.broadcast %1 : vector<1x256xf32> to vector<8x256xf32>
      %158 = arith.addf %156, %157 : vector<8x256xf32>
      %159 = arith.truncf %158 : vector<8x256xf32> to vector<8x256xbf16>
      %c0_64 = arith.constant 0 : index
      %c0_65 = arith.constant 0 : index
      %160 = vector.load %arg9[%c0_64, %c0_65] : memref<256x512xbf16, #tpu.memory_space<vmem>>, vector<256x512xbf16>
      %cst_66 = arith.constant dense<0.000000e+00> : vector<8x512xf32>
      %161 = tpu.matmul %159, %160, %cst_66 {dimension_numbers = #tpu.dot_dimension_numbers<[1], [0], [0], [1], [0, 0, 1, 1], [], []>} : vector<8x256xbf16>, vector<256x512xbf16>, vector<8x512xf32> -> vector<8x512xf32>
      %c0_67 = arith.constant 0 : index
      %c0_68 = arith.constant 0 : index
      %162 = vector.load %arg10[%c0_67, %c0_68] : memref<1x512xf32, #tpu.memory_space<vmem>>, vector<1x512xf32>
      %163 = vector.broadcast %162 : vector<1x512xf32> to vector<8x512xf32>
      %164 = arith.addf %161, %163 : vector<8x512xf32>
      %165 = vector.extract_strided_slice %164 {offsets = [0, 0], sizes = [8, 256], strides = [1, 1]} : vector<8x512xf32> to vector<8x256xf32>
      %166 = arith.truncf %165 : vector<8x256xf32> to vector<8x256xbf16>
      %c0_69 = arith.constant 0 : index
      %c0_70 = arith.constant 0 : index
      %167 = vector.load %arg15[%c0_69, %c0_70] : memref<8x256xbf16, #tpu.memory_space<vmem>>, vector<8x256xbf16>
      tpu.vector_store %arg15[%c0_69, %c0_70], %166 {strides = array<i32>} : memref<8x256xbf16, #tpu.memory_space<vmem>>, vector<8x256xbf16>,
      %168 = vector.extract_strided_slice %164 {offsets = [0, 256], sizes = [8, 256], strides = [1, 1]} : vector<8x512xf32> to vector<8x256xf32>
      %169 = arith.truncf %168 : vector<8x256xf32> to vector<8x256xbf16>
      %c0_71 = arith.constant 0 : index
      %c0_72 = arith.constant 0 : index
      %170 = vector.load %arg16[%c0_71, %c0_72] : memref<8x256xbf16, #tpu.memory_space<vmem>>, vector<8x256xbf16>
      tpu.vector_store %arg16[%c0_71, %c0_72], %169 {strides = array<i32>} : memref<8x256xbf16, #tpu.memory_space<vmem>>, vector<8x256xbf16>,
    } else {
    }
    %c0_4 = arith.constant 0 : index
    %c0_5 = arith.constant 0 : index
    %c0_6 = arith.constant 0 : index
    %5 = vector.load %arg2[%c0_4, %c0_5, %c0_6] : memref<1x8x256xf32, #tpu.memory_space<vmem>>, vector<1x8x256xf32>
    %6 = vector.shape_cast %5 : vector<1x8x256xf32> to vector<8x256xf32>
    %cst = arith.constant dense<0.000000e+00> : vector<8xf32>
    %7 = vector.multi_reduction <add>, %6, %cst [1] : vector<8x256xf32> to vector<8xf32>
    %8 = vector.shape_cast %7 : vector<8xf32> to vector<8x1xf32>
    %cst_7 = arith.constant 2.560000e+02 : f32
    %9 = vector.broadcast %cst_7 : f32 to vector<8x1xf32>
    %10 = arith.divf %8, %9 : vector<8x1xf32>
    %11 = vector.broadcast %10 : vector<8x1xf32> to vector<8x256xf32>
    %12 = arith.subf %6, %11 : vector<8x256xf32>
    %13 = arith.mulf %12, %12 : vector<8x256xf32>
    %cst_8 = arith.constant dense<0.000000e+00> : vector<8xf32>
    %14 = vector.multi_reduction <add>, %13, %cst_8 [1] : vector<8x256xf32> to vector<8xf32>
    %15 = vector.shape_cast %14 : vector<8xf32> to vector<8x1xf32>
    %cst_9 = arith.constant 2.560000e+02 : f32
    %16 = vector.broadcast %cst_9 : f32 to vector<8x1xf32>
    %17 = arith.divf %15, %16 : vector<8x1xf32>
    %cst_10 = arith.constant 9.99999997E-7 : f32
    %18 = vector.broadcast %cst_10 : f32 to vector<8x1xf32>
    %19 = arith.addf %17, %18 : vector<8x1xf32>
    %20 = math.rsqrt %19 : vector<8x1xf32>
    %21 = vector.broadcast %20 : vector<8x1xf32> to vector<8x256xf32>
    %22 = arith.mulf %12, %21 : vector<8x256xf32>
    %23 = vector.broadcast %0 : vector<1x256xf32> to vector<8x256xf32>
    %24 = arith.mulf %22, %23 : vector<8x256xf32>
    %25 = vector.broadcast %1 : vector<1x256xf32> to vector<8x256xf32>
    %26 = arith.addf %24, %25 : vector<8x256xf32>
    %27 = arith.truncf %26 : vector<8x256xf32> to vector<8x256xbf16>
    %c0_11 = arith.constant 0 : index
    %c0_12 = arith.constant 0 : index
    %28 = vector.load %arg7[%c0_11, %c0_12] : memref<256x256xbf16, #tpu.memory_space<vmem>>, vector<256x256xbf16>
    %cst_13 = arith.constant dense<0.000000e+00> : vector<8x256xf32>
    %29 = tpu.matmul %27, %28, %cst_13 {dimension_numbers = #tpu.dot_dimension_numbers<[1], [0], [0], [1], [0, 0, 1, 1], [], []>} : vector<8x256xbf16>, vector<256x256xbf16>, vector<8x256xf32> -> vector<8x256xf32>
    %c0_14 = arith.constant 0 : index
    %c0_15 = arith.constant 0 : index
    %30 = vector.load %arg8[%c0_14, %c0_15] : memref<1x256xf32, #tpu.memory_space<vmem>>, vector<1x256xf32>
    %31 = vector.broadcast %30 : vector<1x256xf32> to vector<8x256xf32>
    %32 = arith.addf %29, %31 : vector<8x256xf32>
    %cst_16 = arith.constant 1.250000e-01 : f32
    %33 = vector.broadcast %cst_16 : f32 to vector<8x256xf32>
    %34 = arith.mulf %32, %33 : vector<8x256xf32>
    %35 = arith.truncf %34 : vector<8x256xf32> to vector<8x256xbf16>
    %c0_17 = arith.constant 0 : index
    %c0_18 = arith.constant 0 : index
    %c0_19 = arith.constant 0 : index
    %36 = vector.load %arg4[%c0_17, %c0_18, %c0_19] : memref<1x1x8xi32, #tpu.memory_space<vmem>>, vector<1x1x8xi32>
    %37 = vector.shape_cast %36 : vector<1x1x8xi32> to vector<1x8xi32>
    %c8_i32 = arith.constant 8 : i32
    %38 = arith.muli %arg1, %c8_i32 : i32
    %39 = tpu.iota {dimensions = array<i32: 0>} : vector<8x8xi32>
    %40 = vector.broadcast %38 : i32 to vector<8x8xi32>
    %41 = arith.addi %40, %39 : vector<8x8xi32>
    %42 = tpu.iota {dimensions = array<i32: 1>} : vector<8x8xi32>
    %43 = arith.cmpi sgt, %42, %41 : vector<8x8xi32>
    %44 = arith.extui %43 : vector<8x8xi1> to vector<8x8xi32>
    %45 = vector.broadcast %37 : vector<1x8xi32> to vector<8x8xi32>
    %46 = arith.addi %45, %44 : vector<8x8xi32>
    %c0_i32_20 = arith.constant 0 : i32
    %47 = vector.broadcast %c0_i32_20 : i32 to vector<8x8xi32>
    %48 = arith.cmpi sgt, %46, %47 : vector<8x8xi32>
    %c0_21 = arith.constant 0 : index
    %c0_22 = arith.constant 0 : index
    %49 = vector.load %arg15[%c0_21, %c0_22] : memref<8x256xbf16, #tpu.memory_space<vmem>>, vector<8x256xbf16>
    %c0_23 = arith.constant 0 : index
    %c0_24 = arith.constant 0 : index
    %50 = vector.load %arg16[%c0_23, %c0_24] : memref<8x256xbf16, #tpu.memory_space<vmem>>, vector<8x256xbf16>
    %51 = vector.extract_strided_slice %35 {offsets = [0, 0], sizes = [8, 64], strides = [1, 1]} : vector<8x256xbf16> to vector<8x64xbf16>
    %52 = vector.extract_strided_slice %49 {offsets = [0, 0], sizes = [8, 64], strides = [1, 1]} : vector<8x256xbf16> to vector<8x64xbf16>
    %cst_25 = arith.constant dense<0.000000e+00> : vector<8x8xf32>
    %53 = tpu.matmul %51, %52, %cst_25 {dimension_numbers = #tpu.dot_dimension_numbers<[1], [1], [0], [0], [0, 0, 1, 0], [], []>} : vector<8x64xbf16>, vector<8x64xbf16>, vector<8x8xf32> -> vector<8x8xf32>
    %cst_26 = arith.constant -9.99999984E+17 : f32
    %54 = vector.broadcast %cst_26 : f32 to vector<8x8xf32>
    %55 = arith.select %48, %54, %53 : vector<8x8xi1>, vector<8x8xf32>
    %cst_27 = arith.constant dense<0xFF800000> : vector<8xf32>
    %56 = vector.multi_reduction <maximumf>, %55, %cst_27 [1] : vector<8x8xf32> to vector<8xf32>
    %57 = vector.shape_cast %56 : vector<8xf32> to vector<8x1xf32>
    %58 = vector.broadcast %57 : vector<8x1xf32> to vector<8x8xf32>
    %59 = arith.subf %55, %58 : vector<8x8xf32>
    %60 = math.exp %59 : vector<8x8xf32>
    %cst_28 = arith.constant dense<0.000000e+00> : vector<8xf32>
    %61 = vector.multi_reduction <add>, %60, %cst_28 [1] : vector<8x8xf32> to vector<8xf32>
    %62 = vector.shape_cast %61 : vector<8xf32> to vector<8x1xf32>
    %63 = tpu.reciprocal %62 {approx = true} : vector<8x1xf32> -> vector<8x1xf32>
    %64 = vector.broadcast %63 : vector<8x1xf32> to vector<8x8xf32>
    %65 = arith.mulf %60, %64 : vector<8x8xf32>
    %66 = arith.truncf %65 : vector<8x8xf32> to vector<8x8xbf16>
    %67 = vector.extract_strided_slice %50 {offsets = [0, 0], sizes = [8, 64], strides = [1, 1]} : vector<8x256xbf16> to vector<8x64xbf16>
    %cst_29 = arith.constant dense<0.000000e+00> : vector<8x64xf32>
    %68 = tpu.matmul %66, %67, %cst_29 {dimension_numbers = #tpu.dot_dimension_numbers<[1], [0], [0], [1], [0, 0, 1, 1], [], []>} : vector<8x8xbf16>, vector<8x64xbf16>, vector<8x64xf32> -> vector<8x64xf32>
    %69 = vector.extract_strided_slice %35 {offsets = [0, 64], sizes = [8, 64], strides = [1, 1]} : vector<8x256xbf16> to vector<8x64xbf16>
    %70 = vector.extract_strided_slice %49 {offsets = [0, 64], sizes = [8, 64], strides = [1, 1]} : vector<8x256xbf16> to vector<8x64xbf16>
    %cst_30 = arith.constant dense<0.000000e+00> : vector<8x8xf32>
    %71 = tpu.matmul %69, %70, %cst_30 {dimension_numbers = #tpu.dot_dimension_numbers<[1], [1], [0], [0], [0, 0, 1, 0], [], []>} : vector<8x64xbf16>, vector<8x64xbf16>, vector<8x8xf32> -> vector<8x8xf32>
    %cst_31 = arith.constant -9.99999984E+17 : f32
    %72 = vector.broadcast %cst_31 : f32 to vector<8x8xf32>
    %73 = arith.select %48, %72, %71 : vector<8x8xi1>, vector<8x8xf32>
    %cst_32 = arith.constant dense<0xFF800000> : vector<8xf32>
    %74 = vector.multi_reduction <maximumf>, %73, %cst_32 [1] : vector<8x8xf32> to vector<8xf32>
    %75 = vector.shape_cast %74 : vector<8xf32> to vector<8x1xf32>
    %76 = vector.broadcast %75 : vector<8x1xf32> to vector<8x8xf32>
    %77 = arith.subf %73, %76 : vector<8x8xf32>
    %78 = math.exp %77 : vector<8x8xf32>
    %cst_33 = arith.constant dense<0.000000e+00> : vector<8xf32>
    %79 = vector.multi_reduction <add>, %78, %cst_33 [1] : vector<8x8xf32> to vector<8xf32>
    %80 = vector.shape_cast %79 : vector<8xf32> to vector<8x1xf32>
    %81 = tpu.reciprocal %80 {approx = true} : vector<8x1xf32> -> vector<8x1xf32>
    %82 = vector.broadcast %81 : vector<8x1xf32> to vector<8x8xf32>
    %83 = arith.mulf %78, %82 : vector<8x8xf32>
    %84 = arith.truncf %83 : vector<8x8xf32> to vector<8x8xbf16>
    %85 = vector.extract_strided_slice %50 {offsets = [0, 64], sizes = [8, 64], strides = [1, 1]} : vector<8x256xbf16> to vector<8x64xbf16>
    %cst_34 = arith.constant dense<0.000000e+00> : vector<8x64xf32>
    %86 = tpu.matmul %84, %85, %cst_34 {dimension_numbers = #tpu.dot_dimension_numbers<[1], [0], [0], [1], [0, 0, 1, 1], [], []>} : vector<8x8xbf16>, vector<8x64xbf16>, vector<8x64xf32> -> vector<8x64xf32>
    %87 = vector.extract_strided_slice %35 {offsets = [0, 128], sizes = [8, 64], strides = [1, 1]} : vector<8x256xbf16> to vector<8x64xbf16>
    %88 = vector.extract_strided_slice %49 {offsets = [0, 128], sizes = [8, 64], strides = [1, 1]} : vector<8x256xbf16> to vector<8x64xbf16>
    %cst_35 = arith.constant dense<0.000000e+00> : vector<8x8xf32>
    %89 = tpu.matmul %87, %88, %cst_35 {dimension_numbers = #tpu.dot_dimension_numbers<[1], [1], [0], [0], [0, 0, 1, 0], [], []>} : vector<8x64xbf16>, vector<8x64xbf16>, vector<8x8xf32> -> vector<8x8xf32>
    %cst_36 = arith.constant -9.99999984E+17 : f32
    %90 = vector.broadcast %cst_36 : f32 to vector<8x8xf32>
    %91 = arith.select %48, %90, %89 : vector<8x8xi1>, vector<8x8xf32>
    %cst_37 = arith.constant dense<0xFF800000> : vector<8xf32>
    %92 = vector.multi_reduction <maximumf>, %91, %cst_37 [1] : vector<8x8xf32> to vector<8xf32>
    %93 = vector.shape_cast %92 : vector<8xf32> to vector<8x1xf32>
    %94 = vector.broadcast %93 : vector<8x1xf32> to vector<8x8xf32>
    %95 = arith.subf %91, %94 : vector<8x8xf32>
    %96 = math.exp %95 : vector<8x8xf32>
    %cst_38 = arith.constant dense<0.000000e+00> : vector<8xf32>
    %97 = vector.multi_reduction <add>, %96, %cst_38 [1] : vector<8x8xf32> to vector<8xf32>
    %98 = vector.shape_cast %97 : vector<8xf32> to vector<8x1xf32>
    %99 = tpu.reciprocal %98 {approx = true} : vector<8x1xf32> -> vector<8x1xf32>
    %100 = vector.broadcast %99 : vector<8x1xf32> to vector<8x8xf32>
    %101 = arith.mulf %96, %100 : vector<8x8xf32>
    %102 = arith.truncf %101 : vector<8x8xf32> to vector<8x8xbf16>
    %103 = vector.extract_strided_slice %50 {offsets = [0, 128], sizes = [8, 64], strides = [1, 1]} : vector<8x256xbf16> to vector<8x64xbf16>
    %cst_39 = arith.constant dense<0.000000e+00> : vector<8x64xf32>
    %104 = tpu.matmul %102, %103, %cst_39 {dimension_numbers = #tpu.dot_dimension_numbers<[1], [0], [0], [1], [0, 0, 1, 1], [], []>} : vector<8x8xbf16>, vector<8x64xbf16>, vector<8x64xf32> -> vector<8x64xf32>
    %105 = vector.extract_strided_slice %35 {offsets = [0, 192], sizes = [8, 64], strides = [1, 1]} : vector<8x256xbf16> to vector<8x64xbf16>
    %106 = vector.extract_strided_slice %49 {offsets = [0, 192], sizes = [8, 64], strides = [1, 1]} : vector<8x256xbf16> to vector<8x64xbf16>
    %cst_40 = arith.constant dense<0.000000e+00> : vector<8x8xf32>
    %107 = tpu.matmul %105, %106, %cst_40 {dimension_numbers = #tpu.dot_dimension_numbers<[1], [1], [0], [0], [0, 0, 1, 0], [], []>} : vector<8x64xbf16>, vector<8x64xbf16>, vector<8x8xf32> -> vector<8x8xf32>
    %cst_41 = arith.constant -9.99999984E+17 : f32
    %108 = vector.broadcast %cst_41 : f32 to vector<8x8xf32>
    %109 = arith.select %48, %108, %107 : vector<8x8xi1>, vector<8x8xf32>
    %cst_42 = arith.constant dense<0xFF800000> : vector<8xf32>
    %110 = vector.multi_reduction <maximumf>, %109, %cst_42 [1] : vector<8x8xf32> to vector<8xf32>
    %111 = vector.shape_cast %110 : vector<8xf32> to vector<8x1xf32>
    %112 = vector.broadcast %111 : vector<8x1xf32> to vector<8x8xf32>
    %113 = arith.subf %109, %112 : vector<8x8xf32>
    %114 = math.exp %113 : vector<8x8xf32>
    %cst_43 = arith.constant dense<0.000000e+00> : vector<8xf32>
    %115 = vector.multi_reduction <add>, %114, %cst_43 [1] : vector<8x8xf32> to vector<8xf32>
    %116 = vector.shape_cast %115 : vector<8xf32> to vector<8x1xf32>
    %117 = tpu.reciprocal %116 {approx = true} : vector<8x1xf32> -> vector<8x1xf32>
    %118 = vector.broadcast %117 : vector<8x1xf32> to vector<8x8xf32>
    %119 = arith.mulf %114, %118 : vector<8x8xf32>
    %120 = arith.truncf %119 : vector<8x8xf32> to vector<8x8xbf16>
    %121 = vector.extract_strided_slice %50 {offsets = [0, 192], sizes = [8, 64], strides = [1, 1]} : vector<8x256xbf16> to vector<8x64xbf16>
    %cst_44 = arith.constant dense<0.000000e+00> : vector<8x64xf32>
    %122 = tpu.matmul %120, %121, %cst_44 {dimension_numbers = #tpu.dot_dimension_numbers<[1], [0], [0], [1], [0, 0, 1, 1], [], []>} : vector<8x8xbf16>, vector<8x64xbf16>, vector<8x64xf32> -> vector<8x64xf32>
    %123 = tpu.concatenate %68, %86, %104, %122 in 1 : vector<8x64xf32>, vector<8x64xf32>, vector<8x64xf32>, vector<8x64xf32> -> vector<8x256xf32>
    %124 = arith.truncf %123 : vector<8x256xf32> to vector<8x256xbf16>
    %c0_45 = arith.constant 0 : index
    %c0_46 = arith.constant 0 : index
    %125 = vector.load %arg11[%c0_45, %c0_46] : memref<256x256xbf16, #tpu.memory_space<vmem>>, vector<256x256xbf16>
    %cst_47 = arith.constant dense<0.000000e+00> : vector<8x256xf32>
    %126 = tpu.matmul %124, %125, %cst_47 {dimension_numbers = #tpu.dot_dimension_numbers<[1], [0], [0], [1], [0, 0, 1, 1], [], []>} : vector<8x256xbf16>, vector<256x256xbf16>, vector<8x256xf32> -> vector<8x256xf32>
    %c0_48 = arith.constant 0 : index
    %c0_49 = arith.constant 0 : index
    %127 = vector.load %arg12[%c0_48, %c0_49] : memref<1x256xf32, #tpu.memory_space<vmem>>, vector<1x256xf32>
    %128 = vector.broadcast %127 : vector<1x256xf32> to vector<8x256xf32>
    %129 = arith.addf %126, %128 : vector<8x256xf32>
    %130 = arith.addf %129, %6 : vector<8x256xf32>
    %c0_50 = arith.constant 0 : index
    %c0_51 = arith.constant 0 : index
    %c0_52 = arith.constant 0 : index
    %131 = vector.load %arg13[%c0_50, %c0_51, %c0_52] : memref<1x8x256xf32, #tpu.memory_space<vmem>>, vector<1x8x256xf32>
    %132 = vector.shape_cast %131 : vector<1x8x256xf32> to vector<8x256xf32>
    %133 = vector.shape_cast %130 : vector<8x256xf32> to vector<1x8x256xf32>
    tpu.vector_store %arg13[%c0_50, %c0_51, %c0_52], %133 {strides = array<i32>} : memref<1x8x256xf32, #tpu.memory_space<vmem>>, vector<1x8x256xf32>,
    %c0_53 = arith.constant 0 : index
    %c0_54 = arith.constant 0 : index
    %c0_55 = arith.constant 0 : index
    %134 = vector.load %arg14[%c0_53, %c0_54, %c0_55] : memref<1x8x256xf32, #tpu.memory_space<vmem>>, vector<1x8x256xf32>
    %135 = vector.shape_cast %134 : vector<1x8x256xf32> to vector<8x256xf32>
    %136 = vector.shape_cast %26 : vector<8x256xf32> to vector<1x8x256xf32>
    tpu.vector_store %arg14[%c0_53, %c0_54, %c0_55], %136 {strides = array<i32>} : memref<1x8x256xf32, #tpu.memory_space<vmem>>, vector<1x8x256xf32>,
    return
  }
  func.func @transform_0(%arg0: i32, %arg1: i32) -> (i32, i32, i32) {
    %c0_i32 = arith.constant 0 : i32
    %c0_i32_0 = arith.constant 0 : i32
    return %arg0, %arg1, %c0_i32 : i32, i32, i32
  }
  func.func @transform_1(%arg0: i32, %arg1: i32) -> (i32, i32, i32) {
    %c0_i32 = arith.constant 0 : i32
    %c0_i32_0 = arith.constant 0 : i32
    %c0_i32_1 = arith.constant 0 : i32
    return %arg0, %c0_i32, %c0_i32_0 : i32, i32, i32
  }
  func.func @transform_2(%arg0: i32, %arg1: i32) -> (i32, i32, i32) {
    %c0_i32 = arith.constant 0 : i32
    %c0_i32_0 = arith.constant 0 : i32
    %c0_i32_1 = arith.constant 0 : i32
    return %arg0, %c0_i32, %c0_i32_0 : i32, i32, i32
  }
  func.func @transform_3(%arg0: i32, %arg1: i32) -> (i32, i32) {
    %c0_i32 = arith.constant 0 : i32
    %c0_i32_0 = arith.constant 0 : i32
    %c0_i32_1 = arith.constant 0 : i32
    return %c0_i32, %c0_i32_0 : i32, i32
  }
  func.func @transform_4(%arg0: i32, %arg1: i32) -> (i32, i32) {
    %c0_i32 = arith.constant 0 : i32
    %c0_i32_0 = arith.constant 0 : i32
    %c0_i32_1 = arith.constant 0 : i32
    return %c0_i32, %c0_i32_0 : i32, i32
  }
  func.func @transform_5(%arg0: i32, %arg1: i32) -> (i32, i32) {
    %c0_i32 = arith.constant 0 : i32
    %c0_i32_0 = arith.constant 0 : i32
    %c0_i32_1 = arith.constant 0 : i32
    return %c0_i32, %c0_i32_0 : i32, i32
  }
  func.func @transform_6(%arg0: i32, %arg1: i32) -> (i32, i32) {
    %c0_i32 = arith.constant 0 : i32
    %c0_i32_0 = arith.constant 0 : i32
    %c0_i32_1 = arith.constant 0 : i32
    return %c0_i32, %c0_i32_0 : i32, i32
  }
  func.func @transform_7(%arg0: i32, %arg1: i32) -> (i32, i32) {
    %c0_i32 = arith.constant 0 : i32
    %c0_i32_0 = arith.constant 0 : i32
    %c0_i32_1 = arith.constant 0 : i32
    return %c0_i32, %c0_i32_0 : i32, i32
  }
  func.func @transform_8(%arg0: i32, %arg1: i32) -> (i32, i32) {
    %c0_i32 = arith.constant 0 : i32
    %c0_i32_0 = arith.constant 0 : i32
    %c0_i32_1 = arith.constant 0 : i32
    return %c0_i32, %c0_i32_0 : i32, i32
  }
  func.func @transform_9(%arg0: i32, %arg1: i32) -> (i32, i32) {
    %c0_i32 = arith.constant 0 : i32
    %c0_i32_0 = arith.constant 0 : i32
    %c0_i32_1 = arith.constant 0 : i32
    return %c0_i32, %c0_i32_0 : i32, i32
  }
  func.func @transform_10(%arg0: i32, %arg1: i32) -> (i32, i32) {
    %c0_i32 = arith.constant 0 : i32
    %c0_i32_0 = arith.constant 0 : i32
    %c0_i32_1 = arith.constant 0 : i32
    return %c0_i32, %c0_i32_0 : i32, i32
  }
  func.func @transform_11(%arg0: i32, %arg1: i32) -> (i32, i32, i32) {
    %c0_i32 = arith.constant 0 : i32
    %c0_i32_0 = arith.constant 0 : i32
    return %arg0, %arg1, %c0_i32 : i32, i32, i32
  }
  func.func @transform_12(%arg0: i32, %arg1: i32) -> (i32, i32, i32) {
    %c0_i32 = arith.constant 0 : i32
    %c0_i32_0 = arith.constant 0 : i32
    return %arg0, %arg1, %c0_i32 : i32, i32, i32
  }
}

module attributes {stable_mosaic.version = 11 : i64} {
  func.func @_ffn_kernel_resident(%arg0: i32, %arg1: memref<16x256xf32, #tpu.memory_space<vmem>>, %arg2: memref<1x256xf32, #tpu.memory_space<vmem>>, %arg3: memref<1x256xf32, #tpu.memory_space<vmem>>, %arg4: memref<256x512xbf16, #tpu.memory_space<vmem>>, %arg5: memref<1x512xf32, #tpu.memory_space<vmem>>, %arg6: memref<512x256xbf16, #tpu.memory_space<vmem>>, %arg7: memref<1x256xf32, #tpu.memory_space<vmem>>, %arg8: memref<16x256xf32, #tpu.memory_space<vmem>>) attributes {dimension_semantics = [#tpu.dimension_semantics<parallel>], iteration_bounds = array<i64: 1>, scalar_prefetch = 0 : i64, scratch_operands = 0 : i64, tpu.core_type = #tpu.core_type<tc>, window_params = [{transform_indices = @transform_0, window_bounds = array<i64: 16, 256>}, {pipeline_mode = #tpu.pipeline_mode<synchronous>, transform_indices = @transform_1, window_bounds = array<i64: 1, 256>}, {pipeline_mode = #tpu.pipeline_mode<synchronous>, transform_indices = @transform_2, window_bounds = array<i64: 1, 256>}, {pipeline_mode = #tpu.pipeline_mode<synchronous>, transform_indices = @transform_3, window_bounds = array<i64: 256, 512>}, {pipeline_mode = #tpu.pipeline_mode<synchronous>, transform_indices = @transform_4, window_bounds = array<i64: 1, 512>}, {pipeline_mode = #tpu.pipeline_mode<synchronous>, transform_indices = @transform_5, window_bounds = array<i64: 512, 256>}, {pipeline_mode = #tpu.pipeline_mode<synchronous>, transform_indices = @transform_6, window_bounds = array<i64: 1, 256>}, {transform_indices = @transform_7, window_bounds = array<i64: 16, 256>}]} {
    %c0 = arith.constant 0 : index
    %c0_0 = arith.constant 0 : index
    %0 = vector.load %arg1[%c0, %c0_0] : memref<16x256xf32, #tpu.memory_space<vmem>>, vector<16x256xf32>
    %cst = arith.constant dense<0.000000e+00> : vector<16xf32>
    %1 = vector.multi_reduction <add>, %0, %cst [1] : vector<16x256xf32> to vector<16xf32>
    %2 = vector.shape_cast %1 : vector<16xf32> to vector<16x1xf32>
    %cst_1 = arith.constant 2.560000e+02 : f32
    %3 = vector.broadcast %cst_1 : f32 to vector<16x1xf32>
    %4 = arith.divf %2, %3 : vector<16x1xf32>
    %5 = vector.broadcast %4 : vector<16x1xf32> to vector<16x256xf32>
    %6 = arith.subf %0, %5 : vector<16x256xf32>
    %7 = arith.mulf %6, %6 : vector<16x256xf32>
    %cst_2 = arith.constant dense<0.000000e+00> : vector<16xf32>
    %8 = vector.multi_reduction <add>, %7, %cst_2 [1] : vector<16x256xf32> to vector<16xf32>
    %9 = vector.shape_cast %8 : vector<16xf32> to vector<16x1xf32>
    %cst_3 = arith.constant 2.560000e+02 : f32
    %10 = vector.broadcast %cst_3 : f32 to vector<16x1xf32>
    %11 = arith.divf %9, %10 : vector<16x1xf32>
    %cst_4 = arith.constant 9.99999997E-7 : f32
    %12 = vector.broadcast %cst_4 : f32 to vector<16x1xf32>
    %13 = arith.addf %11, %12 : vector<16x1xf32>
    %14 = math.rsqrt %13 : vector<16x1xf32>
    %15 = vector.broadcast %14 : vector<16x1xf32> to vector<16x256xf32>
    %16 = arith.mulf %6, %15 : vector<16x256xf32>
    %c0_5 = arith.constant 0 : index
    %c0_6 = arith.constant 0 : index
    %17 = vector.load %arg2[%c0_5, %c0_6] : memref<1x256xf32, #tpu.memory_space<vmem>>, vector<1x256xf32>
    %18 = vector.broadcast %17 : vector<1x256xf32> to vector<16x256xf32>
    %19 = arith.mulf %16, %18 : vector<16x256xf32>
    %c0_7 = arith.constant 0 : index
    %c0_8 = arith.constant 0 : index
    %20 = vector.load %arg3[%c0_7, %c0_8] : memref<1x256xf32, #tpu.memory_space<vmem>>, vector<1x256xf32>
    %21 = vector.broadcast %20 : vector<1x256xf32> to vector<16x256xf32>
    %22 = arith.addf %19, %21 : vector<16x256xf32>
    %23 = arith.truncf %22 : vector<16x256xf32> to vector<16x256xbf16>
    %c0_9 = arith.constant 0 : index
    %c0_10 = arith.constant 0 : index
    %24 = vector.load %arg4[%c0_9, %c0_10] : memref<256x512xbf16, #tpu.memory_space<vmem>>, vector<256x512xbf16>
    %cst_11 = arith.constant dense<0.000000e+00> : vector<16x512xf32>
    %25 = tpu.matmul %23, %24, %cst_11 {dimension_numbers = #tpu.dot_dimension_numbers<[1], [0], [0], [1], [0, 0, 1, 1], [], []>} : vector<16x256xbf16>, vector<256x512xbf16>, vector<16x512xf32> -> vector<16x512xf32>
    %c0_12 = arith.constant 0 : index
    %c0_13 = arith.constant 0 : index
    %26 = vector.load %arg5[%c0_12, %c0_13] : memref<1x512xf32, #tpu.memory_space<vmem>>, vector<1x512xf32>
    %27 = vector.broadcast %26 : vector<1x512xf32> to vector<16x512xf32>
    %28 = arith.addf %25, %27 : vector<16x512xf32>
    %29 = arith.mulf %28, %28 : vector<16x512xf32>
    %cst_14 = arith.constant 5.000000e-01 : f32
    %30 = vector.broadcast %cst_14 : f32 to vector<16x512xf32>
    %31 = arith.mulf %30, %28 : vector<16x512xf32>
    %32 = arith.mulf %28, %29 : vector<16x512xf32>
    %cst_15 = arith.constant 4.471500e-02 : f32
    %33 = vector.broadcast %cst_15 : f32 to vector<16x512xf32>
    %34 = arith.mulf %33, %32 : vector<16x512xf32>
    %35 = arith.addf %28, %34 : vector<16x512xf32>
    %cst_16 = arith.constant 0.797884583 : f32
    %36 = vector.broadcast %cst_16 : f32 to vector<16x512xf32>
    %37 = arith.mulf %36, %35 : vector<16x512xf32>
    %38 = math.tanh %37 : vector<16x512xf32>
    %cst_17 = arith.constant 1.000000e+00 : f32
    %39 = vector.broadcast %cst_17 : f32 to vector<16x512xf32>
    %40 = arith.addf %39, %38 : vector<16x512xf32>
    %41 = arith.mulf %31, %40 : vector<16x512xf32>
    %42 = arith.truncf %41 : vector<16x512xf32> to vector<16x512xbf16>
    %c0_18 = arith.constant 0 : index
    %c0_19 = arith.constant 0 : index
    %43 = vector.load %arg6[%c0_18, %c0_19] : memref<512x256xbf16, #tpu.memory_space<vmem>>, vector<512x256xbf16>
    %cst_20 = arith.constant dense<0.000000e+00> : vector<16x256xf32>
    %44 = tpu.matmul %42, %43, %cst_20 {dimension_numbers = #tpu.dot_dimension_numbers<[1], [0], [0], [1], [0, 0, 1, 1], [], []>} : vector<16x512xbf16>, vector<512x256xbf16>, vector<16x256xf32> -> vector<16x256xf32>
    %c0_21 = arith.constant 0 : index
    %c0_22 = arith.constant 0 : index
    %45 = vector.load %arg7[%c0_21, %c0_22] : memref<1x256xf32, #tpu.memory_space<vmem>>, vector<1x256xf32>
    %46 = vector.broadcast %45 : vector<1x256xf32> to vector<16x256xf32>
    %47 = arith.addf %44, %46 : vector<16x256xf32>
    %48 = arith.addf %47, %0 : vector<16x256xf32>
    %c0_23 = arith.constant 0 : index
    %c0_24 = arith.constant 0 : index
    %49 = vector.load %arg8[%c0_23, %c0_24] : memref<16x256xf32, #tpu.memory_space<vmem>>, vector<16x256xf32>
    tpu.vector_store %arg8[%c0_23, %c0_24], %48 {strides = array<i32>} : memref<16x256xf32, #tpu.memory_space<vmem>>, vector<16x256xf32>,
    return
  }
  func.func @transform_0(%arg0: i32) -> (i32, i32) {
    %c0_i32 = arith.constant 0 : i32
    %c0_i32_0 = arith.constant 0 : i32
    return %arg0, %c0_i32 : i32, i32
  }
  func.func @transform_1(%arg0: i32) -> (i32, i32) {
    %c0_i32 = arith.constant 0 : i32
    %c0_i32_0 = arith.constant 0 : i32
    %c0_i32_1 = arith.constant 0 : i32
    return %c0_i32, %c0_i32_0 : i32, i32
  }
  func.func @transform_2(%arg0: i32) -> (i32, i32) {
    %c0_i32 = arith.constant 0 : i32
    %c0_i32_0 = arith.constant 0 : i32
    %c0_i32_1 = arith.constant 0 : i32
    return %c0_i32, %c0_i32_0 : i32, i32
  }
  func.func @transform_3(%arg0: i32) -> (i32, i32) {
    %c0_i32 = arith.constant 0 : i32
    %c0_i32_0 = arith.constant 0 : i32
    %c0_i32_1 = arith.constant 0 : i32
    return %c0_i32, %c0_i32_0 : i32, i32
  }
  func.func @transform_4(%arg0: i32) -> (i32, i32) {
    %c0_i32 = arith.constant 0 : i32
    %c0_i32_0 = arith.constant 0 : i32
    %c0_i32_1 = arith.constant 0 : i32
    return %c0_i32, %c0_i32_0 : i32, i32
  }
  func.func @transform_5(%arg0: i32) -> (i32, i32) {
    %c0_i32 = arith.constant 0 : i32
    %c0_i32_0 = arith.constant 0 : i32
    %c0_i32_1 = arith.constant 0 : i32
    return %c0_i32, %c0_i32_0 : i32, i32
  }
  func.func @transform_6(%arg0: i32) -> (i32, i32) {
    %c0_i32 = arith.constant 0 : i32
    %c0_i32_0 = arith.constant 0 : i32
    %c0_i32_1 = arith.constant 0 : i32
    return %c0_i32, %c0_i32_0 : i32, i32
  }
  func.func @transform_7(%arg0: i32) -> (i32, i32) {
    %c0_i32 = arith.constant 0 : i32
    %c0_i32_0 = arith.constant 0 : i32
    return %arg0, %c0_i32 : i32, i32
  }
}

</mosaic_0001>

<bundles_post_ra>
// kernel: transformer_decoder_layer.4
= control target key start
LH: loop header
LB: loop body
LE: loop exit
PB: predicated region body
PF: predicated region fallthrough
CT: control target
= control target key end

     0   :  { %s2631_s17 = smov 0   ;;  %s2633_s18 = smov 0   ;;  %s3220_s0 = inlined_call_operand.vmem [shape: f32[2,8,256], index: 0, kind: input, shape index: {}]   ;;  %s3221_s1 = inlined_call_operand.vmem [shape: f32[2,16,256], index: 1, kind: input, shape index: {}]   ;;  %s3222_s2 = inlined_call_operand.vmem [shape: s32[2,1,16], index: 2, kind: input, shape index: {}]   ;;  %s3223_s3 = inlined_call_operand.vmem [shape: f32[1,256], index: 3, kind: input, shape index: {}]   ;;  %s3224_s4 = inlined_call_operand.vmem [shape: f32[1,256], index: 4, kind: input, shape index: {}]   ;;  %s3225_s5 = inlined_call_operand.vmem [shape: bf16[256,256], index: 5, kind: input, shape index: {}]   ;;  %s3226_s6 = inlined_call_operand.vmem [shape: f32[1,256], index: 6, kind: input, shape index: {}]   ;;  %s3227_s7 = inlined_call_operand.vmem [shape: bf16[256,512], index: 7, kind: input, shape index: {}]   ;;  %s3228_s8 = inlined_call_operand.vmem [shape: f32[1,512], index: 8, kind: input, shape index: {}]   ;;  %s3229_s9 = inlined_call_operand.vmem [shape: bf16[256,256], index: 9, kind: input, shape index: {}]   ;;  %s3230_s10 = inlined_call_operand.vmem [shape: f32[1,256], index: 10, kind: input, shape index: {}]   ;;  %s3231_s11 = inlined_call_operand.vmem [shape: f32[2,8,256], index: 11, kind: output, shape index: {}]  }
   0x1   :  { %s2635_s19 = smov 0  }
   0x2 LB: > { %s33_s20 = sadd.s32 1, %s2561_s18  ;;  %p2086_p0 = scmp.ge.s32.totalorder %s2565_s19, 1  ;;  %s2565_s19 = sphi %s2635_s19, %s21_s19   ;;  %s2561_s18 = sphi %s2633_s18, %s3235_s18   ;;  %s2557_s17 = sphi %s2631_s17, %s3234_s17  }
   0x3   : > { %p35_p1 = scmp.ge.s32.totalorder %s33_s20, 2  ;;  %p375_p2 = scmp.lt.s32.totalorder %s2565_s19, 3 }
   0x5   : > { %s3237_s20 = smov (%p35_p1, %s33_s20), 0  ;;  %p376_p3 = pnand %p2086_p0, %p375_p2 }
   0x6   : > { %p431_p4 = scmp.lt.s32.totalorder (!%p376_p3), %s2557_s17, 1  ;;  %v2331_v3 = vld [vmem:[%s3227_s7 + $0x4] ss:$16 sps:$4 sm:$0xff] (!%p376_p3)   ;;  %v2333_v4 = vld [vmem:[%s3227_s7] ss:$16 sps:$4 sm:$0xff] (!%p376_p3)   ;;  %vm1278_vm0 = vcmask (!%p376_p3), 523264  }
   0x7   : > { %379 = sbr.rel (%p376_p3) target bundleno = 3247 (0xcaf), region = 64  ;;  %v2334_v5 = vld [vmem:[%s3227_s7 + $0x24] ss:$16 sps:$4 sm:$0xff] (!%p376_p3)   ;;  %876 = vmatprep.subr.bf16.mxu0 (!%p376_p3), %v2331_v3  ;;  %v2336_v6 = vld [vmem:[%s3227_s7 + $0x20] ss:$16 sps:$4 sm:$0xff] (!%p376_p3)   ;;  %s2568_s22 = smov (!%p376_p3), 64  }
   0x8   : > { %877 = vmatpush1.bf16.msra.mxu0 (!%p376_p3), %v2333_v4  ;;  %v2337_v7 = vld [vmem:[%s3227_s7 + $0x44] ss:$16 sps:$4 sm:$0xff] (!%p376_p3)   ;;  %v2339_v8 = vld [vmem:[%s3227_s7 + $0x40] ss:$16 sps:$4 sm:$0xff] (!%p376_p3)   ;;  %vm2569_vm1 = vmmov (!%p376_p3), 0   ;;  %vm1326_vm4 = vcmask (!%p376_p3), 130048  }
   0x9   : > { %878 = vmatprep.subr.bf16.mxu0 (!%p376_p3), %v2334_v5  ;;  %v2340_v9 = vld [vmem:[%s3227_s7 + $0x64] ss:$16 sps:$4 sm:$0xff] (!%p376_p3)   ;;  %v2342_v10 = vld [vmem:[%s3227_s7 + $0x60] ss:$16 sps:$4 sm:$0xff] (!%p376_p3)  }
   0xa   : > { %v2343_v11 = vld [vmem:[%s3227_s7 + $0x84] ss:$16 sps:$4 sm:$0xff] (!%p376_p3)   ;;  %v2345_v15 = vld [vmem:[%s3227_s7 + $0x80] ss:$16 sps:$4 sm:$0xff] (!%p376_p3)  }
   0xb   : > { %v2346_v16 = vld [vmem:[%s3227_s7 + $0xa4] ss:$16 sps:$4 sm:$0xff] (!%p376_p3)   ;;  %v2348_v17 = vld [vmem:[%s3227_s7 + $0xa0] ss:$16 sps:$4 sm:$0xff] (!%p376_p3)  }
   0xc   : > { %879 = vmatpush1.bf16.msra.mxu0 (!%p376_p3), %v2336_v6  ;;  %v2349_v18 = vld [vmem:[%s3227_s7 + $0xc4] ss:$16 sps:$4 sm:$0xff] (!%p376_p3)   ;;  %v2351_v19 = vld [vmem:[%s3227_s7 + $0xc0] ss:$16 sps:$4 sm:$0xff] (!%p376_p3)  }
   0xd   : > { %880 = vmatprep.subr.bf16.mxu0 (!%p376_p3), %v2337_v7  ;;  %v2352_v20 = vld [vmem:[%s3227_s7 + $0xe4] ss:$16 sps:$4 sm:$0xff] (!%p376_p3)   ;;  %v2354_v21 = vld [vmem:[%s3227_s7 + $0xe0] ss:$16 sps:$4 sm:$0xff] (!%p376_p3)  }
   0xe   : > { %s3239_s17 = smov (!%p431_p4, %s2557_s17), 1  ;;  %v2355_v22 = vld [vmem:[%s3227_s7 + $0x104] ss:$16 sps:$4 sm:$0xff]   ;;  %v2357_v23 = vld [vmem:[%s3227_s7 + $0x100] ss:$16 sps:$4 sm:$0xff]  }
   0xf   : > { %s2231_s21 = sshll.u32 %s3239_s17, 4  ;;  %s2232_s26 = sshll.u32 %s3239_s17, 5  ;;  %v2358_v24 = vld [vmem:[%s3227_s7 + $0x124] ss:$16 sps:$4 sm:$0xff]   ;;  %v2360_v25 = vld [vmem:[%s3227_s7 + $0x120] ss:$16 sps:$4 sm:$0xff]  }
  0x10   : > { %s2657_s24 = scalar_lea.vmem %s3220_s0, %s2231_s21  ;;  %881 = vmatpush1.bf16.msra.mxu0 %v2339_v8  ;;  %s2695_s12 = scalar_lea.vmem %s3221_s1, %s2232_s26  ;;  %v2361_v26 = vld [vmem:[%s3227_s7 + $0x144] ss:$16 sps:$4 sm:$0xff]   ;;  %v2363_v27 = vld [vmem:[%s3227_s7 + $0x140] ss:$16 sps:$4 sm:$0xff]  }
  0x11   : > { %v2660_v0 = vld [vmem:[%s2657_s24] sm:$0xff]  ;;  %v2663_v1 = vld [vmem:[%s2657_s24 + $0x8] sm:$0xff]  ;;  %882 = vmatprep.subr.bf16.mxu0 %v2340_v9  ;;  %v467_v13 = vld [vmem:[%s2695_s12 + $0x18] sm:$0xff]  ;;  %s447_s27 = scalar_lea.vmem %s3222_s2, %s3239_s17  ;;  %s456_s23 = scalar_lea.vmem %s3231_s11, %s2231_s21 }
  0x12   : > { %v972_v2 = vadd.f32 %v2663_v1, %v2660_v0  ;;  %v465_v12 = vld [vmem:[%s2695_s12 + $0x8] sm:$0xff]  ;;  %v2364_v28 = vld [vmem:[%s3227_s7 + $0x164] ss:$16 sps:$4 sm:$0xff]   ;;  %v2366_v29 = vld [vmem:[%s3227_s7 + $0x160] ss:$16 sps:$4 sm:$0xff]  }
  0x13   : > { %v469_v14 = vpack.c.bf16 %v467_v13, %v465_v12  ;;  %v2367_v30 = vld [vmem:[%s3227_s7 + $0x184] ss:$16 sps:$4 sm:$0xff]   ;;  %v2369_v31 = vld [vmem:[%s3227_s7 + $0x180] ss:$16 sps:$4 sm:$0xff]  }
  0x14   : > { %973 = vadd.xlane.f32.xlu0 %v972_v2  ;;  %883 = vmatpush1.bf16.msra.mxu0 %v2342_v10  ;;  %v2370_v32 = vld [vmem:[%s3227_s7 + $0x1a4] ss:$16 sps:$4 sm:$0xff]   ;;  %v2372_v33 = vld [vmem:[%s3227_s7 + $0x1a0] ss:$16 sps:$4 sm:$0xff]  }
  0x15   : > { %908 = vmatprep.mubr.bf16.mxu0 %v469_v14  ;;  %884 = vmatprep.subr.bf16.mxu0 %v2343_v11  ;;  %v2373_v34 = vld [vmem:[%s3227_s7 + $0x1c4] ss:$16 sps:$4 sm:$0xff]   ;;  %v2375_v35 = vld [vmem:[%s3227_s7 + $0x1c0] ss:$16 sps:$4 sm:$0xff]  }
  0x16   : > { %951 = vmatprep.mubr.bf16.mxu1 %v469_v14  ;;  %v2376_v36 = vld [vmem:[%s3227_s7 + $0x1e4] ss:$16 sps:$4 sm:$0xff]   ;;  %v2378_v37 = vld [vmem:[%s3227_s7 + $0x1e0] ss:$16 sps:$4 sm:$0xff]  }
  0x17   : > { %v464_v38 = vld [vmem:[%s2695_s12] sm:$0xff]  ;;  %v466_v39 = vld [vmem:[%s2695_s12 + $0x10] sm:$0xff] }
  0x18   : > { %885 = vmatpush1.bf16.msra.mxu0 %v2345_v15  ;;  %v2381_v40 = vld [vmem:[%s3225_s5 + $0x4] ss:$8 sps:$4 sm:$0xff]   ;;  %v2776_v41 = vpack.c.bf16 %v466_v39, %v464_v38  ;;  %v2379_v42 = vld [vmem:[%s3225_s5] ss:$8 sps:$4 sm:$0xff]   ;;  %v2384_v43 = vld [vmem:[%s3225_s5 + $0x14] ss:$8 sps:$4 sm:$0xff]  }
  0x19   : > { %886 = vmatprep.subr.bf16.mxu0 %v2346_v16  ;;  %v2382_v44 = vld [vmem:[%s3225_s5 + $0x10] ss:$8 sps:$4 sm:$0xff]   ;;  %v2387_v45 = vld [vmem:[%s3225_s5 + $0x24] ss:$8 sps:$4 sm:$0xff]   ;;  %v2385_v46 = vld [vmem:[%s3225_s5 + $0x20] ss:$8 sps:$4 sm:$0xff]  }
  0x1a   : > { %v2390_v47 = vld [vmem:[%s3225_s5 + $0x34] ss:$8 sps:$4 sm:$0xff]   ;;  %v2388_v48 = vld [vmem:[%s3225_s5 + $0x30] ss:$8 sps:$4 sm:$0xff]   ;;  %v2393_v49 = vld [vmem:[%s3225_s5 + $0x44] ss:$8 sps:$4 sm:$0xff]  }
  0x1b   : > { %v2391_v50 = vld [vmem:[%s3225_s5 + $0x40] ss:$8 sps:$4 sm:$0xff]   ;;  %v2396_v51 = vld [vmem:[%s3225_s5 + $0x54] ss:$8 sps:$4 sm:$0xff]   ;;  %v2394_v52 = vld [vmem:[%s3225_s5 + $0x50] ss:$8 sps:$4 sm:$0xff]  }
  0x1c   : > { %887 = vmatpush1.bf16.msra.mxu0 %v2348_v17  ;;  %v2399_v53 = vld [vmem:[%s3225_s5 + $0x64] ss:$8 sps:$4 sm:$0xff]   ;;  %v2397_v54 = vld [vmem:[%s3225_s5 + $0x60] ss:$8 sps:$4 sm:$0xff]   ;;  %v2402_v55 = vld [vmem:[%s3225_s5 + $0x74] ss:$8 sps:$4 sm:$0xff]  }
  0x1d   : > { %888 = vmatprep.subr.bf16.mxu0 %v2349_v18  ;;  %v2400_v56 = vld [vmem:[%s3225_s5 + $0x70] ss:$8 sps:$4 sm:$0xff]   ;;  %v2405_v57 = vld [vmem:[%s3225_s5 + $0x84] ss:$8 sps:$4 sm:$0xff]   ;;  %v2403_v58 = vld [vmem:[%s3225_s5 + $0x80] ss:$8 sps:$4 sm:$0xff]  }
  0x1e   : > { %v2408_v59 = vld [vmem:[%s3225_s5 + $0x94] ss:$8 sps:$4 sm:$0xff]   ;;  %v2406_v60 = vld [vmem:[%s3225_s5 + $0x90] ss:$8 sps:$4 sm:$0xff]   ;;  %v2411_v6 = vld [vmem:[%s3225_s5 + $0xa4] ss:$8 sps:$4 sm:$0xff]  }
  0x1f   : > { %v2412_v7 = vld [vmem:[%s3225_s5 + $0xb0] ss:$8 sps:$4 sm:$0xff]   ;;  %v2417_v8 = vld [vmem:[%s3225_s5 + $0xc4] ss:$8 sps:$4 sm:$0xff]   ;;  %v2415_v9 = vld [vmem:[%s3225_s5 + $0xc0] ss:$8 sps:$4 sm:$0xff]  }
  0x20   : > { %889 = vmatpush1.bf16.msra.mxu0 %v2351_v19  ;;  %v2420_v10 = vld [vmem:[%s3225_s5 + $0xd4] ss:$8 sps:$4 sm:$0xff]   ;;  %v2418_v11 = vld [vmem:[%s3225_s5 + $0xd0] ss:$8 sps:$4 sm:$0xff]   ;;  %v2423_v12 = vld [vmem:[%s3225_s5 + $0xe4] ss:$8 sps:$4 sm:$0xff]  }
  0x21   : > { %890 = vmatprep.subr.bf16.mxu0 %v2352_v20  ;;  %v2421_v13 = vld [vmem:[%s3225_s5 + $0xe0] ss:$8 sps:$4 sm:$0xff]   ;;  %v2426_v14 = vld [vmem:[%s3225_s5 + $0xf4] ss:$8 sps:$4 sm:$0xff]   ;;  %v2424_v15 = vld [vmem:[%s3225_s5 + $0xf0] ss:$8 sps:$4 sm:$0xff]  }
  0x22   : > { %v2427_v16 = vld [vmem:[%s3227_s7 + $0xc] ss:$16 sps:$4 sm:$0xff]   ;;  %v2429_v17 = vld [vmem:[%s3227_s7 + $0x8] ss:$16 sps:$4 sm:$0xff]  }
  0x23   : > { %v2430_v18 = vld [vmem:[%s3227_s7 + $0x2c] ss:$16 sps:$4 sm:$0xff]   ;;  %919 = vmatprep.subr.bf16.mxu1 %v2427_v16  ;;  %v2432_v19 = vld [vmem:[%s3227_s7 + $0x28] ss:$16 sps:$4 sm:$0xff]  }
  0x24   : > { %891 = vmatpush1.bf16.msra.mxu0 %v2354_v21  ;;  %920 = vmatpush1.bf16.msra.mxu1 %v2429_v17  ;;  %v2433_v20 = vld [vmem:[%s3227_s7 + $0x4c] ss:$16 sps:$4 sm:$0xff]   ;;  %v2435_v21 = vld [vmem:[%s3227_s7 + $0x48] ss:$16 sps:$4 sm:$0xff]  }
  0x25   : > { %892 = vmatprep.subr.bf16.mxu0 %v2355_v22  ;;  %921 = vmatprep.subr.bf16.mxu1 %v2430_v18  ;;  %v2436_v22 = vld [vmem:[%s3227_s7 + $0x6c] ss:$16 sps:$4 sm:$0xff]   ;;  %v2462_v39 = vld [vmem:[%s3227_s7 + $0x168] ss:$16 sps:$4 sm:$0xff]  }
  0x26   : > { %v2460_v38 = vld [vmem:[%s3227_s7 + $0x16c] ss:$16 sps:$4 sm:$0xff]  }
  0x28   : > { %893 = vmatpush1.bf16.msra.mxu0 %v2357_v23  ;;  %922 = vmatpush1.bf16.msra.mxu1 %v2432_v19  ;;  %v2438_v23 = vld [vmem:[%s3227_s7 + $0x68] ss:$16 sps:$4 sm:$0xff]  }
  0x29   : > { %894 = vmatprep.subr.bf16.mxu0 %v2358_v24  ;;  %923 = vmatprep.subr.bf16.mxu1 %v2433_v20  ;;  %v2439_v24 = vld [vmem:[%s3227_s7 + $0x8c] ss:$16 sps:$4 sm:$0xff]  }
  0x2c   : > { %895 = vmatpush1.bf16.msra.mxu0 %v2360_v25  ;;  %924 = vmatpush1.bf16.msra.mxu1 %v2435_v21  ;;  %v2441_v25 = vld [vmem:[%s3227_s7 + $0x88] ss:$16 sps:$4 sm:$0xff]  }
  0x2d   : > { %896 = vmatprep.subr.bf16.mxu0 %v2361_v26  ;;  %925 = vmatprep.subr.bf16.mxu1 %v2436_v22  ;;  %v2442_v26 = vld [vmem:[%s3227_s7 + $0xac] ss:$16 sps:$4 sm:$0xff]  }
  0x30   : > { %897 = vmatpush1.bf16.msra.mxu0 %v2363_v27  ;;  %926 = vmatpush1.bf16.msra.mxu1 %v2438_v23  ;;  %v2444_v27 = vld [vmem:[%s3227_s7 + $0xa8] ss:$16 sps:$4 sm:$0xff]  }
  0x31   : > { %898 = vmatprep.subr.bf16.mxu0 %v2364_v28  ;;  %927 = vmatprep.subr.bf16.mxu1 %v2439_v24  ;;  %v2445_v28 = vld [vmem:[%s3227_s7 + $0xcc] ss:$16 sps:$4 sm:$0xff]  }
  0x34   : > { %899 = vmatpush1.bf16.msra.mxu0 %v2366_v29  ;;  %928 = vmatpush1.bf16.msra.mxu1 %v2441_v25  ;;  %v2447_v29 = vld [vmem:[%s3227_s7 + $0xc8] ss:$16 sps:$4 sm:$0xff]  }
  0x35   : > { %900 = vmatprep.subr.bf16.mxu0 %v2367_v30  ;;  %929 = vmatprep.subr.bf16.mxu1 %v2442_v26  ;;  %v2448_v30 = vld [vmem:[%s3227_s7 + $0xec] ss:$16 sps:$4 sm:$0xff]  }
  0x38   : > { %901 = vmatpush1.bf16.msra.mxu0 %v2369_v31  ;;  %930 = vmatpush1.bf16.msra.mxu1 %v2444_v27  ;;  %v2450_v31 = vld [vmem:[%s3227_s7 + $0xe8] ss:$16 sps:$4 sm:$0xff]  }
  0x39   : > { %902 = vmatprep.subr.bf16.mxu0 %v2370_v32  ;;  %931 = vmatprep.subr.bf16.mxu1 %v2445_v28  ;;  %v2451_v32 = vld [vmem:[%s3227_s7 + $0x10c] ss:$16 sps:$4 sm:$0xff]  }
  0x3c   : > { %903 = vmatpush1.bf16.msra.mxu0 %v2372_v33  ;;  %932 = vmatpush1.bf16.msra.mxu1 %v2447_v29  ;;  %v2453_v33 = vld [vmem:[%s3227_s7 + $0x108] ss:$16 sps:$4 sm:$0xff]  }
  0x3d   : > { %904 = vmatprep.subr.bf16.mxu0 %v2373_v34  ;;  %933 = vmatprep.subr.bf16.mxu1 %v2448_v30  ;;  %v2454_v34 = vld [vmem:[%s3227_s7 + $0x12c] ss:$16 sps:$4 sm:$0xff]  }
  0x40   : > { %905 = vmatpush1.bf16.msra.mxu0 %v2375_v35  ;;  %934 = vmatpush1.bf16.msra.mxu1 %v2450_v31  ;;  %v2456_v35 = vld [vmem:[%s3227_s7 + $0x128] ss:$16 sps:$4 sm:$0xff]  }
  0x41   : > { %906 = vmatprep.subr.bf16.mxu0 %v2376_v36  ;;  %935 = vmatprep.subr.bf16.mxu1 %v2451_v32  ;;  %v2457_v36 = vld [vmem:[%s3227_s7 + $0x14c] ss:$16 sps:$4 sm:$0xff]  }
  0x44   : > { %907 = vmatpush1.bf16.msra.mxu0 %v2378_v37  ;;  %936 = vmatpush1.bf16.msra.mxu1 %v2453_v33  ;;  %v2459_v37 = vld [vmem:[%s3227_s7 + $0x148] ss:$16 sps:$4 sm:$0xff]  }
  0x45   : > { %1221 = vmatprep.subr.bf16.mxu0 %v2381_v40  ;;  %937 = vmatprep.subr.bf16.mxu1 %v2454_v34  ;;  %v2463_v40 = vld [vmem:[%s3227_s7 + $0x18c] ss:$16 sps:$4 sm:$0xff]  }
  0x47   : > { %909 = vmatmul.mubr.bf16.vlgmr.msra.gmra.mrb[0].mxu0 %v2776_v41 }
  0x48   : > { %1222 = vmatpush1.bf16.msra.mxu0 %v2379_v42  ;;  %938 = vmatpush1.bf16.msra.mxu1 %v2456_v35  ;;  %v2465_v42 = vld [vmem:[%s3227_s7 + $0x188] ss:$16 sps:$4 sm:$0xff]   ;;  %v3015_v35 = vld [vmem:[%s3226_s6] sm:$0x3] }
  0x49   : > { %1223 = vmatprep.subr.bf16.mxu0 %v2384_v43  ;;  %939 = vmatprep.subr.bf16.mxu1 %v2457_v36  ;;  %v2466_v43 = vld [vmem:[%s3227_s7 + $0x1ac] ss:$16 sps:$4 sm:$0xff]  }
  0x4c   : > { %1224 = vmatpush1.bf16.msra.mxu0 %v2382_v44  ;;  %940 = vmatpush1.bf16.msra.mxu1 %v2459_v37  ;;  %v2468_v44 = vld [vmem:[%s3227_s7 + $0x1a8] ss:$16 sps:$4 sm:$0xff]  }
  0x4d   : > { %1225 = vmatprep.subr.bf16.mxu0 %v2387_v45  ;;  %941 = vmatprep.subr.bf16.mxu1 %v2460_v38  ;;  %v2469_v45 = vld [vmem:[%s3227_s7 + $0x1cc] ss:$16 sps:$4 sm:$0xff]  }
  0x50   : > { %1226 = vmatpush1.bf16.msra.mxu0 %v2385_v46  ;;  %942 = vmatpush1.bf16.msra.mxu1 %v2462_v39  ;;  %v2471_v46 = vld [vmem:[%s3227_s7 + $0x1c8] ss:$16 sps:$4 sm:$0xff]  }
  0x51   : > { %1227 = vmatprep.subr.bf16.mxu0 %v2390_v47  ;;  %943 = vmatprep.subr.bf16.mxu1 %v2463_v40  ;;  %v2472_v47 = vld [vmem:[%s3227_s7 + $0x1ec] ss:$16 sps:$4 sm:$0xff]  }
  0x54   : > { %1228 = vmatpush1.bf16.msra.mxu0 %v2388_v48  ;;  %944 = vmatpush1.bf16.msra.mxu1 %v2465_v42  ;;  %v2474_v48 = vld [vmem:[%s3227_s7 + $0x1e8] ss:$16 sps:$4 sm:$0xff]  }
  0x55   : > { %1229 = vmatprep.subr.bf16.mxu0 %v2393_v49  ;;  %945 = vmatprep.subr.bf16.mxu1 %v2466_v43  ;;  %v2567_v49 = vmov 0.0  }
  0x58   : > { %1230 = vmatpush1.bf16.msra.mxu0 %v2391_v50  ;;  %946 = vmatpush1.bf16.msra.mxu1 %v2468_v44  ;;  %v536_v50 = vlaneseq }
  0x59   : > { %1231 = vmatprep.subr.bf16.mxu0 %v2396_v51  ;;  %947 = vmatprep.subr.bf16.mxu1 %v2469_v45  ;;  %v1266_v45 = vld [vmem:[%s447_s27] sm:$0x1] }
  0x5a   : > { %v537_v51 = vshrl.u32 %v536_v50, 7  ;;  %vm1267_vm2 = vcmp.gt.s32.totalorder %v1266_v45, 0 }
  0x5c   : > { %1232 = vmatpush1.bf16.msra.mxu0 %v2394_v52  ;;  %948 = vmatpush1.bf16.msra.mxu1 %v2471_v46  ;;  %v550_v23 = vsub.s32 3, %v537_v51  ;;  %v2570_v46 = vmov 0  }
  0x5d   : > { %1233 = vmatprep.subr.bf16.mxu0 %v2399_v53  ;;  %949 = vmatprep.subr.bf16.mxu1 %v2472_v47  ;;  %v1268_v47 = vsel %vm1267_vm2, 1, %v2570_v46 }
  0x60   : > { %1234 = vmatpush1.bf16.msra.mxu0 %v2397_v54  ;;  %950 = vmatpush1.bf16.msra.mxu1 %v2474_v48  ;;  %v534_v54 = vld [vmem:[%s3228_s8] sm:$0xf] }
  0x61   : > { %1235 = vmatprep.subr.bf16.mxu0 %v2402_v55  ;;  %2250 = vmatprep.subr.bf16.mxu1 %v2567_v49  ;;  %v551_v25 = vrot.slane %v534_v54, %v550_v23 }
  0x63   : > { %952 = vmatmul.mubr.bf16.vlgmr.msra.gmra.mrb[0].mxu1 %v2776_v41 }
  0x64   : > { %1236 = vmatpush1.bf16.msra.mxu0 %v2400_v56  ;;  %v2983_v56 = vsub.s32 0, %v537_v51  ;;  %2252 = vmatprep.mubr.msk.bf16.mxu1 %vm2569_vm1, %v2567_v49 }
  0x65   : > { %1237 = vmatprep.subr.bf16.mxu0 %v2405_v57  ;;  %v2985_v57 = vsub.s32 1, %v537_v51 }
  0x66   : > { %v1054_v36 = vrot.slane %v3015_v35, %v2983_v56  ;;  %v1272_v48 = vrot.slane %v1268_v47, %v2983_v56 }
  0x67   : > { %v1058_v23 = vrot.slane %v3015_v35, %v2985_v57 }
  0x68   : > { %1238 = vmatpush1.bf16.msra.mxu0 %v2403_v58  ;;  %v539_v58 = vrot.slane %v534_v54, %v2983_v56  ;;  %vm3031_vm3 = vcmp.eq.s32.totalorder %v1272_v48, 1 }
  0x69   : > { %1239 = vmatprep.subr.bf16.mxu0 %v2408_v59  ;;  %v543_v59 = vrot.slane %v534_v54, %v2985_v57 }
  0x6c   : > { %1240 = vmatpush1.bf16.msra.mxu0 %v2406_v60 }
  0x6d   : > { %1241 = vmatprep.subr.bf16.mxu0 %v2411_v6 }
  0xa1   : > { %v974_v61 = vpop.xlane.xlu0 %973 }
  0xa2   : > { %v976_v62 = vmul.f32 0.00390625, %v974_v61 }
  0xa4   : > { %v2837_v63 = vsub.f32 %v2660_v0, %v976_v62  ;;  %v2840_v2 = vsub.f32 %v2663_v1, %v976_v62  ;;  %v2409_v0 = vld [vmem:[%s3225_s5 + $0xa0] ss:$8 sps:$4 sm:$0xff]   ;;  %v2414_v1 = vld [vmem:[%s3225_s5 + $0xb4] ss:$8 sps:$4 sm:$0xff]  }
  0xa5   : > { %1242 = vmatpush1.bf16.msra.mxu0 %v2409_v0 }
  0xa6   : > { %v979_v3 = vmul.f32 %v2837_v63, %v2837_v63  ;;  %v980_v4 = vmul.f32 %v2840_v2, %v2840_v2  ;;  %1243 = vmatprep.subr.bf16.mxu0 %v2414_v1  ;;  %v459_v1 = vld [vmem:[%s3224_s4] sm:$0x3] }
  0xa8   : > { %v981_v5 = vadd.f32 %v980_v4, %v979_v3  ;;  %v458_v4 = vld [vmem:[%s3223_s3] sm:$0x3] }
  0xa9   : > { %1244 = vmatpush1.bf16.msra.mxu0 %v2412_v7 }
  0xaa   : > { %982 = vadd.xlane.f32.xlu0 %v981_v5  ;;  %1245 = vmatprep.subr.bf16.mxu0 %v2417_v8  ;;  %v993_v8 = vrot.slane %v458_v4, %v2983_v56 }
  0xad   : > { %1246 = vmatpush1.bf16.msra.mxu0 %v2415_v9  ;;  %v997_v9 = vrot.slane %v458_v4, %v2985_v57 }
  0xae   : > { %1247 = vmatprep.subr.bf16.mxu0 %v2420_v10 }
  0xb1   : > { %1248 = vmatpush1.bf16.msra.mxu0 %v2418_v11 }
  0xb2   : > { %1249 = vmatprep.subr.bf16.mxu0 %v2423_v12 }
  0xb5   : > { %1250 = vmatpush1.bf16.msra.mxu0 %v2421_v13 }
  0xb6   : > { %1251 = vmatprep.subr.bf16.mxu0 %v2426_v14  ;;  %v1006_v14 = vrot.slane %v459_v1, %v2983_v56 }
  0xb9   : > { %1252 = vmatpush1.bf16.msra.mxu0 %v2424_v15  ;;  %v1010_v15 = vrot.slane %v459_v1, %v2985_v57 }
 0x11a   : > { %v910_v60 = vpop.f32.mrb[0].mxu0 }
 0x11b   : > { %v911_v41 = vadd.f32 %v910_v60, %v539_v58  ;;  %v912_v61 = vpop.f32.mrb[1].mxu0 }
 0x11c   : > { %v913_v62 = vadd.f32 %v912_v61, %v543_v59  ;;  %v914_v3 = vpop.f32.mrb[2].mxu0 }
 0x11d   : > { %v915_v5 = vadd.f32 %v914_v3, %v539_v58  ;;  %v916_v6 = vpop.f32.mrb[3].mxu0 }
 0x11e   : > { %v917_v0 = vadd.f32 %v916_v6, %v543_v59 }
 0x11f   : > { %v962_v7 = vpack.c.bf16 %v915_v5, %v911_v41 }
 0x120   : > { %v2997_v10 = vpack.c.bf16 %v917_v0, %v913_v62 }
 0x121   : > { %1386 = vrot.lane.b32.xlu0 %v962_v7, %s2568_s22  ;;  %v1283_v12 = vsel %vm1278_vm0, %v962_v7, 0 }
 0x122   : > { %2251 = vmatpush3.bf16.xpose.msra.mxu1 %v1283_v12 }
 0x123   : > { %2256 = vmatprep.subr.bf16.mxu1 %v2567_v49 }
 0x137   : > { %v983_v52 = vpop.xlane.xlu0 %982 }
 0x138   : > { %v984_v53 = vmul.f32 0.00390625, %v983_v52 }
 0x13a   : > { %v985_v55 = vadd.f32 1e-06, %v984_v53 }
 0x13c   : > { %2523 = vrsqrt.f32 %v985_v55 }
 0x146   : > { %v2524_v11 = vpop.eup %2523 }
 0x147   : > { %v988_v13 = vmul.f32 %v2524_v11, %v2840_v2  ;;  %v987_v16 = vmul.f32 %v2524_v11, %v2837_v63  ;;  %v546_v2 = vsub.s32 2, %v537_v51  ;;  %v953_v63 = vpop.f32.mrb[0].mxu1 }
 0x148   : > { %v955_v27 = vpop.f32.mrb[1].mxu1 }
 0x149   : > { %v1001_v17 = vmul.f32 %v997_v9, %v988_v13  ;;  %v1000_v18 = vmul.f32 %v993_v8, %v987_v16  ;;  %v547_v24 = vrot.slane %v534_v54, %v546_v2  ;;  %v956_v28 = vadd.f32 %v955_v27, %v551_v25  ;;  %v957_v29 = vpop.f32.mrb[2].mxu1 }
 0x14a   : > { %v959_v31 = vpop.f32.mrb[3].mxu1 }
 0x14b   : > { %v1014_v19 = vadd.f32 %v1010_v15, %v1001_v17  ;;  %v1013_v20 = vadd.f32 %v1006_v14, %v1000_v18  ;;  %v954_v26 = vadd.f32 %v953_v63, %v547_v24  ;;  %v958_v30 = vadd.f32 %v957_v29, %v547_v24 }
 0x14c   : > { %v960_v32 = vadd.f32 %v959_v31, %v551_v25  ;;  %v1498_v31 = vsel %vm1278_vm0, %v2997_v10, 0 }
 0x14d   : > { %v1016_v21 = vpack.c.bf16 %v1014_v19, %v1014_v19  ;;  %v1015_v22 = vpack.c.bf16 %v1013_v20, %v1013_v20  ;;  %v3008_v33 = vpack.c.bf16 %v958_v30, %v954_v26 }
 0x14e   : > { %v3010_v34 = vpack.c.bf16 %v960_v32, %v956_v28 }
 0x14f   : > { %1253 = vmatprep.mubr.bf16.mxu0 %v1016_v21 }
 0x150   : > { %1254 = vmatmul.mubr.bf16.vlgmr.msra.gmra.mrb[4].mxu0 %v1015_v22 }
 0x193   : > { %v1387_v6 = vpop.permute.xlu0 %1386 }
 0x194   : > { %v1392_v1 = vsel %vm1278_vm0, %v1387_v6, 0 }
 0x223   : > { %v1255_v37 = vpop.f32.mrb[4].mxu0 }
 0x224   : > { %v1256_v38 = vadd.f32 %v1255_v37, %v1054_v36  ;;  %v3019_v39 = vpop.f32.mrb[5].mxu0 }
 0x225   : > { %v1259_v40 = vpop.f32.mrb[6].mxu0  ;;  %v1258_v24 = vadd.f32 %v3019_v39, %v1058_v23  ;;  %v2487_v23 = vld [vmem:[%s3229_s9 + $0x40] ss:$8 sps:$4 sm:$0xff]  }
 0x226   : > { %v1262_v42 = vmul.f32 0.125, %v1256_v38  ;;  %v1260_v43 = vpop.f32.mrb[7].mxu0 }
 0x227   : > { %v1263_v25 = vmul.f32 0.125, %v1258_v24  ;;  %v2492_v24 = vld [vmem:[%s3229_s9 + $0x54] ss:$8 sps:$4 sm:$0xff]  }
 0x228   : > { %v1264_v44 = vpack.c.bf16 %v1262_v42, %v1262_v42 }
 0x229   : > { %v1265_v63 = vpack.c.bf16 %v1263_v25, %v1263_v25  ;;  %v2490_v25 = vld [vmem:[%s3229_s9 + $0x50] ss:$8 sps:$4 sm:$0xff]  }
 0x22a   : > { %2253 = vmatmul.mubr.msk.bf16.vlgmr.msra.gmra.mrb[4].mxu1 %vm1278_vm0, %v1264_v44 }
 0x22b   : > { %2257 = vmatpush3.bf16.msra.mxu1 %v3008_v33  ;;  %2258 = vmatprep.mubr.msk.bf16.mxu1 %vm2569_vm1, %v2567_v49 }
 0x22c   : > { %2262 = vmatprep.subr.bf16.mxu1 %v2567_v49 }
 0x2fd   : > { %v1319_v51 = vpop.f32.mrb[4].mxu1 }
 0x2fe   : > { %v1325_v52 = vsel %vm3031_vm3, -1e+18, %v1319_v51  ;;  %v2254_v53 = vpop.f32.mrb[5].mxu1 }
 0x2ff   : > { %v1322_v54 = vpop.f32.mrb[6].mxu1  ;;  %v1327_v55 = vsel %vm1326_vm4, %v1325_v52, -inf }
 0x300   : > { %1328 = vmax.xlane.f32.xlu1 %v1327_v55  ;;  %v2255_v58 = vpop.f32.mrb[7].mxu1 }
 0x38d   : > { %v1329_v59 = vpop.xlane.xlu1 %1328 }
 0x38e   : > { %v1330_v60 = vsub.f32 %v1325_v52, %v1329_v59 }
 0x390   : > { %v1331_v41 = vmul.f32 1.442695, %v1330_v60 }
 0x392   : > { %2525 = vpow2.f32 %v1331_v41 }
 0x39c   : > { %v2526_v61 = vpop.eup %2525 }
 0x39d   : > { %v1333_v62 = vsel %vm1326_vm4, %v2526_v61, 0.0 }
 0x39e   : > { %1334 = vadd.xlane.f32.xlu1 %v1333_v62 }
 0x3af   : > { %1383 = vrot.lane.b32.xlu1 %v1264_v44, %s2568_s22 }
 0x42b   : > { %v1335_v3 = vpop.xlane.xlu1 %1334 }
 0x42c   : > { %2527 = vrcp.f32 %v1335_v3 }
 0x42f   : > { %v1384_v7 = vpop.permute.xlu1 %1383 }
 0x436   : > { %v2528_v4 = vpop.eup %2527 }
 0x437   : > { %v1337_v5 = vmul.f32 %v2528_v4, %v2526_v61 }
 0x439   : > { %v1338_v0 = vpack.c.bf16 %v1337_v5, %v1337_v5 }
 0x43b   : > { %2259 = vmatmul.mubr.msk.bf16.vlgmr.msra.gmra.mrb[8].mxu1 %vm1326_vm4, %v1338_v0 }
 0x43c   : > { %2263 = vmatpush3.bf16.xpose.msra.mxu1 %v1392_v1  ;;  %2264 = vmatprep.mubr.msk.bf16.mxu1 %vm2569_vm1, %v2567_v49 }
 0x43d   : > { %2268 = vmatprep.subr.bf16.mxu1 %v2567_v49 }
 0x443   : > { %2265 = vmatmul.mubr.msk.bf16.vlgmr.msra.gmra.mrb[12].mxu1 %vm1278_vm0, %v1384_v7 }
 0x444   : > { %2270 = vmatprep.mubr.msk.bf16.mxu1 %vm2569_vm1, %v2567_v49 }
 0x50e   : > { %v3048_v8 = vpop.f32.mrb[8].mxu1 }
 0x50f   : > { %v2260_v9 = vpop.f32.mrb[9].mxu1 }
 0x510   : > { %v1379_v11 = vpop.f32.mrb[10].mxu1 }
 0x511   : > { %v2261_v12 = vpop.f32.mrb[11].mxu1 }
 0x516   : > { %v1428_v13 = vpop.f32.mrb[12].mxu1 }
 0x517   : > { %v1434_v14 = vsel %vm3031_vm3, -1e+18, %v1428_v13  ;;  %v2266_v15 = vpop.f32.mrb[13].mxu1 }
 0x518   : > { %v1431_v16 = vpop.f32.mrb[14].mxu1  ;;  %v1435_v17 = vsel %vm1326_vm4, %v1434_v14, -inf }
 0x519   : > { %1436 = vmax.xlane.f32.xlu1 %v1435_v17  ;;  %v2267_v18 = vpop.f32.mrb[15].mxu1  ;;  %v2475_v16 = vld [vmem:[%s3229_s9] ss:$8 sps:$4 sm:$0xff]   ;;  %v2477_v17 = vld [vmem:[%s3229_s9 + $0x4] ss:$8 sps:$4 sm:$0xff]  }
 0x51a   : > { %1924 = vmatprep.subr.bf16.mxu0 %v2477_v17  ;;  %v2478_v18 = vld [vmem:[%s3229_s9 + $0x10] ss:$8 sps:$4 sm:$0xff]  }
 0x51b   : > { %1925 = vmatpush1.bf16.msra.mxu0 %v2475_v16 }
 0x5a6   : > { %v1437_v19 = vpop.xlane.xlu1 %1436 }
 0x5a7   : > { %v1438_v20 = vsub.f32 %v1434_v14, %v1437_v19  ;;  %v2483_v19 = vld [vmem:[%s3229_s9 + $0x24] ss:$8 sps:$4 sm:$0xff]  }
 0x5a9   : > { %v1439_v21 = vmul.f32 1.442695, %v1438_v20  ;;  %v2481_v20 = vld [vmem:[%s3229_s9 + $0x20] ss:$8 sps:$4 sm:$0xff]  }
 0x5ab   : > { %2529 = vpow2.f32 %v1439_v21  ;;  %v2486_v21 = vld [vmem:[%s3229_s9 + $0x34] ss:$8 sps:$4 sm:$0xff]  }
 0x5b5   : > { %v2530_v22 = vpop.eup %2529 }
 0x5b6   : > { %v1441_v2 = vsel %vm1326_vm4, %v2530_v22, 0.0 }
 0x5b7   : > { %1442 = vadd.xlane.f32.xlu0 %v1441_v2  ;;  %v2489_v2 = vld [vmem:[%s3229_s9 + $0x44] ss:$8 sps:$4 sm:$0xff]  }
 0x5cd   : > { %1448 = vrot.lane.b32.xlu0 %v3008_v33, %s2568_s22 }
 0x5d1   : > { %1597 = vrot.lane.b32.xlu0 %v1265_v63, %s2568_s22 }
 0x644   : > { %v1443_v26 = vpop.xlane.xlu0 %1442 }
 0x645   : > { %2531 = vrcp.f32 %v1443_v26  ;;  %v2493_v26 = vld [vmem:[%s3229_s9 + $0x60] ss:$8 sps:$4 sm:$0xff]  }
 0x648   : > { %v1449_v27 = vpop.permute.xlu0 %1448 }
 0x649   : > { %2269 = vmatpush3.bf16.msra.mxu1 %v1449_v27  ;;  %v2498_v27 = vld [vmem:[%s3229_s9 + $0x74] ss:$8 sps:$4 sm:$0xff]  }
 0x64a   : > { %2274 = vmatprep.subr.bf16.mxu1 %v2567_v49 }
 0x64c   : > { %v1598_v59 = vpop.permute.xlu0 %1597 }
 0x64f   : > { %v2532_v28 = vpop.eup %2531 }
 0x650   : > { %v1445_v29 = vmul.f32 %v2532_v28, %v2530_v22  ;;  %v2484_v22 = vld [vmem:[%s3229_s9 + $0x30] ss:$8 sps:$4 sm:$0xff]  }
 0x651   : > { %v2496_v28 = vld [vmem:[%s3229_s9 + $0x70] ss:$8 sps:$4 sm:$0xff]  }
 0x652   : > { %v1446_v30 = vpack.c.bf16 %v1445_v29, %v1445_v29  ;;  %v2501_v29 = vld [vmem:[%s3229_s9 + $0x84] ss:$8 sps:$4 sm:$0xff]  }
 0x654   : > { %2271 = vmatmul.mubr.msk.bf16.vlgmr.msra.gmra.mrb[16].mxu1 %vm1326_vm4, %v1446_v30  ;;  %v2499_v30 = vld [vmem:[%s3229_s9 + $0x80] ss:$8 sps:$4 sm:$0xff]  }
 0x655   : > { %2275 = vmatpush3.bf16.xpose.msra.mxu1 %v1498_v31  ;;  %2276 = vmatprep.mubr.msk.bf16.mxu1 %vm2569_vm1, %v2567_v49  ;;  %v2504_v31 = vld [vmem:[%s3229_s9 + $0x94] ss:$8 sps:$4 sm:$0xff]  }
 0x656   : > { %2280 = vmatprep.subr.bf16.mxu1 %v2567_v49 }
 0x65c   : > { %2277 = vmatmul.mubr.msk.bf16.vlgmr.msra.gmra.mrb[20].mxu1 %vm1278_vm0, %v1265_v63  ;;  %v2495_v63 = vld [vmem:[%s3229_s9 + $0x64] ss:$8 sps:$4 sm:$0xff]  }
 0x65d   : > { %2281 = vmatpush3.bf16.msra.mxu1 %v3010_v34  ;;  %2282 = vmatprep.mubr.msk.bf16.mxu1 %vm2569_vm1, %v2567_v49 }
 0x65e   : > { %2286 = vmatprep.subr.bf16.mxu1 %v2567_v49 }
 0x727   : > { %v3072_v32 = vpop.f32.mrb[16].mxu1 }
 0x728   : > { %v2272_v33 = vpop.f32.mrb[17].mxu1 }
 0x729   : > { %v1491_v35 = vpop.f32.mrb[18].mxu1  ;;  %v2502_v33 = vld [vmem:[%s3229_s9 + $0x90] ss:$8 sps:$4 sm:$0xff]  }
 0x72a   : > { %v2273_v36 = vpop.f32.mrb[19].mxu1  ;;  %v2507_v35 = vld [vmem:[%s3229_s9 + $0xa4] ss:$8 sps:$4 sm:$0xff]  }
 0x72b   : > { %v2505_v36 = vld [vmem:[%s3229_s9 + $0xa0] ss:$8 sps:$4 sm:$0xff]  }
 0x72f   : > { %v1534_v37 = vpop.f32.mrb[20].mxu1 }
 0x730   : > { %v1540_v38 = vsel %vm3031_vm3, -1e+18, %v1534_v37  ;;  %v2278_v39 = vpop.f32.mrb[21].mxu1  ;;  %v2510_v37 = vld [vmem:[%s3229_s9 + $0xb4] ss:$8 sps:$4 sm:$0xff]  }
 0x731   : > { %v1537_v40 = vpop.f32.mrb[22].mxu1  ;;  %v1541_v42 = vsel %vm1326_vm4, %v1540_v38, -inf  ;;  %v2513_v39 = vld [vmem:[%s3229_s9 + $0xc4] ss:$8 sps:$4 sm:$0xff]  }
 0x732   : > { %1542 = vmax.xlane.f32.xlu1 %v1541_v42  ;;  %v2279_v43 = vpop.f32.mrb[23].mxu1  ;;  %v2511_v40 = vld [vmem:[%s3229_s9 + $0xc0] ss:$8 sps:$4 sm:$0xff]   ;;  %v2516_v42 = vld [vmem:[%s3229_s9 + $0xd4] ss:$8 sps:$4 sm:$0xff]  }
 0x733   : > { %v2514_v43 = vld [vmem:[%s3229_s9 + $0xd0] ss:$8 sps:$4 sm:$0xff]  }
 0x7bf   : > { %v1543_v44 = vpop.xlane.xlu1 %1542 }
 0x7c0   : > { %v1544_v45 = vsub.f32 %v1540_v38, %v1543_v44  ;;  %v2508_v38 = vld [vmem:[%s3229_s9 + $0xb0] ss:$8 sps:$4 sm:$0xff]   ;;  %v2519_v44 = vld [vmem:[%s3229_s9 + $0xe4] ss:$8 sps:$4 sm:$0xff]  }
 0x7c2   : > { %v1545_v46 = vmul.f32 1.442695, %v1544_v45  ;;  %v2517_v45 = vld [vmem:[%s3229_s9 + $0xe0] ss:$8 sps:$4 sm:$0xff]  }
 0x7c4   : > { %2533 = vpow2.f32 %v1545_v46  ;;  %v2522_v46 = vld [vmem:[%s3229_s9 + $0xf4] ss:$8 sps:$4 sm:$0xff]  }
 0x7ce   : > { %v2534_v47 = vpop.eup %2533 }
 0x7cf   : > { %v1547_v48 = vsel %vm1326_vm4, %v2534_v47, 0.0 }
 0x7d0   : > { %1548 = vadd.xlane.f32.xlu1 %v1547_v48 }
 0x7e1   : > { %1600 = vrot.lane.b32.xlu1 %v2997_v10, %s2568_s22 }
 0x85d   : > { %v1549_v51 = vpop.xlane.xlu1 %1548 }
 0x85e   : > { %2535 = vrcp.f32 %v1549_v51 }
 0x861   : > { %v1601_v54 = vpop.permute.xlu1 %1600 }
 0x862   : > { %v1606_v58 = vsel %vm1278_vm0, %v1601_v54, 0 }
 0x868   : > { %v2536_v52 = vpop.eup %2535 }
 0x869   : > { %v1551_v53 = vmul.f32 %v2536_v52, %v2534_v47  ;;  %v2520_v47 = vld [vmem:[%s3229_s9 + $0xf0] ss:$8 sps:$4 sm:$0xff]  }
 0x86b   : > { %v1552_v55 = vpack.c.bf16 %v1551_v53, %v1551_v53 }
 0x86d   : > { %2283 = vmatmul.mubr.msk.bf16.vlgmr.msra.gmra.mrb[24].mxu1 %vm1326_vm4, %v1552_v55 }
 0x86e   : > { %2287 = vmatpush3.bf16.xpose.msra.mxu1 %v1606_v58  ;;  %2288 = vmatprep.mubr.msk.bf16.mxu1 %vm2569_vm1, %v2567_v49 }
 0x86f   : > { %2292 = vmatprep.subr.bf16.mxu1 %v2567_v49 }
 0x875   : > { %2289 = vmatmul.mubr.msk.bf16.vlgmr.msra.gmra.mrb[28].mxu1 %vm1278_vm0, %v1598_v59 }
 0x876   : > { %2294 = vmatprep.mubr.msk.bf16.mxu1 %vm2569_vm1, %v2567_v49 }
 0x940   : > { %v3088_v10 = vpop.f32.mrb[24].mxu1 }
 0x941   : > { %v2284_v60 = vpop.f32.mrb[25].mxu1 }
 0x942   : > { %v1593_v41 = vpop.f32.mrb[26].mxu1 }
 0x943   : > { %v2285_v61 = vpop.f32.mrb[27].mxu1 }
 0x948   : > { %v1642_v62 = vpop.f32.mrb[28].mxu1 }
 0x949   : > { %v1648_v3 = vsel %vm3031_vm3, -1e+18, %v1642_v62  ;;  %v2290_v4 = vpop.f32.mrb[29].mxu1 }
 0x94a   : > { %v1645_v5 = vpop.f32.mrb[30].mxu1  ;;  %v1649_v6 = vsel %vm1326_vm4, %v1648_v3, -inf }
 0x94b   : > { %1650 = vmax.xlane.f32.xlu1 %v1649_v6  ;;  %v2291_v0 = vpop.f32.mrb[31].mxu1 }
 0x9d8   : > { %v1651_v1 = vpop.xlane.xlu1 %1650 }
 0x9d9   : > { %v1652_v7 = vsub.f32 %v1648_v3, %v1651_v1  ;;  %v2541_v1 = vld [vmem:[%s2657_s24] sm:$0xff] }
 0x9db   : > { %v1653_v9 = vmul.f32 1.442695, %v1652_v7 }
 0x9dd   : > { %2537 = vpow2.f32 %v1653_v9 }
 0x9e7   : > { %v2538_v49 = vpop.eup %2537 }
 0x9e8   : > { %v1655_v11 = vsel %vm1326_vm4, %v2538_v49, 0.0 }
 0x9e9   : > { %1656 = vadd.xlane.f32.xlu0 %v1655_v11 }
 0x9ff   : > { %1662 = vrot.lane.b32.xlu0 %v3010_v34, %s2568_s22  ;;  %v2480_v34 = vld [vmem:[%s3229_s9 + $0x14] ss:$8 sps:$4 sm:$0xff]  }
 0xa00   : > { %1926 = vmatprep.subr.bf16.mxu0 %v2480_v34 }
 0xa01   : > { %1927 = vmatpush1.bf16.msra.mxu0 %v2478_v18 }
 0xa02   : > { %1928 = vmatprep.subr.bf16.mxu0 %v2483_v19 }
 0xa05   : > { %1929 = vmatpush1.bf16.msra.mxu0 %v2481_v20 }
 0xa06   : > { %1930 = vmatprep.subr.bf16.mxu0 %v2486_v21 }
 0xa09   : > { %1931 = vmatpush1.bf16.msra.mxu0 %v2484_v22 }
 0xa0a   : > { %1932 = vmatprep.subr.bf16.mxu0 %v2489_v2 }
 0xa0d   : > { %1933 = vmatpush1.bf16.msra.mxu0 %v2487_v23 }
 0xa0e   : > { %1934 = vmatprep.subr.bf16.mxu0 %v2492_v24 }
 0xa11   : > { %1935 = vmatpush1.bf16.msra.mxu0 %v2490_v25 }
 0xa12   : > { %1936 = vmatprep.subr.bf16.mxu0 %v2495_v63 }
 0xa15   : > { %1937 = vmatpush1.bf16.msra.mxu0 %v2493_v26 }
 0xa16   : > { %1938 = vmatprep.subr.bf16.mxu0 %v2498_v27 }
 0xa19   : > { %1939 = vmatpush1.bf16.msra.mxu0 %v2496_v28 }
 0xa1a   : > { %1940 = vmatprep.subr.bf16.mxu0 %v2501_v29 }
 0xa1d   : > { %1941 = vmatpush1.bf16.msra.mxu0 %v2499_v30 }
 0xa1e   : > { %1942 = vmatprep.subr.bf16.mxu0 %v2504_v31 }
 0xa21   : > { %1943 = vmatpush1.bf16.msra.mxu0 %v2502_v33 }
 0xa22   : > { %1944 = vmatprep.subr.bf16.mxu0 %v2507_v35 }
 0xa25   : > { %1945 = vmatpush1.bf16.msra.mxu0 %v2505_v36 }
 0xa26   : > { %1946 = vmatprep.subr.bf16.mxu0 %v2510_v37 }
 0xa29   : > { %1947 = vmatpush1.bf16.msra.mxu0 %v2508_v38 }
 0xa2a   : > { %1948 = vmatprep.subr.bf16.mxu0 %v2513_v39 }
 0xa2d   : > { %1949 = vmatpush1.bf16.msra.mxu0 %v2511_v40 }
 0xa2e   : > { %1950 = vmatprep.subr.bf16.mxu0 %v2516_v42 }
 0xa31   : > { %1951 = vmatpush1.bf16.msra.mxu0 %v2514_v43 }
 0xa32   : > { %1952 = vmatprep.subr.bf16.mxu0 %v2519_v44 }
 0xa35   : > { %1953 = vmatpush1.bf16.msra.mxu0 %v2517_v45 }
 0xa36   : > { %1954 = vmatprep.subr.bf16.mxu0 %v2522_v46 }
 0xa39   : > { %1955 = vmatpush1.bf16.msra.mxu0 %v2520_v47 }
 0xa76   : > { %v1657_v12 = vpop.xlane.xlu0 %1656 }
 0xa77   : > { %2539 = vrcp.f32 %v1657_v12 }
 0xa7a   : > { %v1663_v50 = vpop.permute.xlu0 %1662 }
 0xa7b   : > { %2293 = vmatpush3.bf16.msra.mxu1 %v1663_v50 }
 0xa81   : > { %v2540_v13 = vpop.eup %2539 }
 0xa82   : > { %v1659_v14 = vmul.f32 %v2540_v13, %v2538_v49  ;;  %v2542_v49 = vld [vmem:[%s2657_s24 + $0x8] sm:$0xff] }
 0xa84   : > { %v1660_v15 = vpack.c.bf16 %v1659_v14, %v1659_v14 }
 0xa86   : > { %2295 = vmatmul.mubr.msk.bf16.vlgmr.msra.gmra.mrb[32].mxu1 %vm1326_vm4, %v1660_v15 }
 0xb59   : > { %v1702_v48 = vpop.f32.mrb[32].mxu1 }
 0xb5a   : > { %v2326_v51 = vpack.i.bf16 %v3072_v32, %v1702_v48  ;;  %v2296_v52 = vpop.f32.mrb[33].mxu1  ;;  %v1752_v32 = vld [vmem:[%s3230_s10] sm:$0x3] }
 0xb5b   : > { %v1705_v53 = vpop.f32.mrb[34].mxu1  ;;  %v1757_v3 = vrot.slane %v1752_v32, %v2983_v56  ;;  %v1761_v4 = vrot.slane %v1752_v32, %v2985_v57 }
 0xb5c   : > { %2327 = vrot.lane.b32.xlu1 %v2326_v51, %s2568_s22  ;;  %v2297_v54 = vpop.f32.mrb[35].mxu1 }
 0xbce   : > { %v2328_v55 = vpop.permute.xlu1 %2327 }
 0xbcf   : > { %v2330_v58 = vunpack.i.h.bf16 %v2328_v55  ;;  %v2329_v59 = vunpack.i.l.bf16 %v2328_v55 }
 0xbd1   : > { %v1716_v60 = vsel %vm1278_vm0, %v3048_v8, %v2330_v58  ;;  %v1717_v41 = vsel %vm1278_vm0, %v3088_v10, %v2329_v59 }
 0xbd2   : > { %v1718_v61 = vpack.c.bf16 %v1716_v60, %v1716_v60  ;;  %v1719_v62 = vpack.c.bf16 %v1717_v41, %v1717_v41 }
 0xbd4   : > { %1956 = vmatprep.mubr.bf16.mxu0 %v1719_v62 }
 0xbd5   : > { %1957 = vmatmul.mubr.bf16.vlgmr.msra.gmra.mrb[8].mxu0 %v1718_v61 }
 0xca8   : > { %v1958_v5 = vpop.f32.mrb[8].mxu0 }
 0xca9   : > { %v1959_v6 = vadd.f32 %v1958_v5, %v1757_v3  ;;  %v1960_v0 = vpop.f32.mrb[9].mxu0 }
 0xcaa   : > { %v1961_v8 = vadd.f32 %v1960_v0, %v1761_v4  ;;  %v1962_v10 = vpop.f32.mrb[10].mxu0 }
 0xcab   : > { %v1965_v7 = vadd.f32 %v2541_v1, %v1959_v6  ;;  %v1963_v9 = vpop.f32.mrb[11].mxu0 }
 0xcac   : > { %v1966_v11 = vadd.f32 %v2542_v49, %v1961_v8 }
 0xcad   : > { %1967 = vst [vmem:[%s456_s23] sm:$0xff] %v1965_v7 }
 0xcae   : > { %1968 = vst [vmem:[%s456_s23 + $0x8] sm:$0xff] %v1966_v11 }
 0xcaf PF: > { %s21_s19 = sadd.s32 1, %s2565_s19   ;;  %s3234_s17 = smov %s2561_s18 }
 0xcb0   : > { %p18_p5 = scmp.ge.s32.totalorder %s21_s19, 4   ;;  %s3235_s18 = smov %s3237_s20 }
 0xcb2   :  { %20 = sbr.rel (!%p18_p5) target bundleno = 2 (0x2), region = 104 }

// kernel: transformer_decoder_layer.5
= control target key start
LH: loop header
LB: loop body
LE: loop exit
PB: predicated region body
PF: predicated region fallthrough
CT: control target
= control target key end

     0   :  { %s2081_s0 = inlined_call_operand.vmem [shape: f32[16,256], index: 0, kind: input, shape index: {}]   ;;  %s2082_s1 = inlined_call_operand.vmem [shape: f32[1,256], index: 1, kind: input, shape index: {}]   ;;  %s2083_s2 = inlined_call_operand.vmem [shape: f32[1,256], index: 2, kind: input, shape index: {}]   ;;  %s2084_s3 = inlined_call_operand.vmem [shape: bf16[256,512], index: 3, kind: input, shape index: {}]   ;;  %s2085_s4 = inlined_call_operand.vmem [shape: f32[1,512], index: 4, kind: input, shape index: {}]   ;;  %s2086_s5 = inlined_call_operand.vmem [shape: bf16[512,256], index: 5, kind: input, shape index: {}]   ;;  %s2087_s6 = inlined_call_operand.vmem [shape: f32[1,256], index: 6, kind: input, shape index: {}]   ;;  %s2088_s7 = inlined_call_operand.hbm [shape: f32[16,256], index: 7, kind: output, shape index: {}]  }
   0x1   :  { %v27_v0 = vld [vmem:[%s2081_s0] sm:$0xff]  ;;  %v28_v1 = vld [vmem:[%s2081_s0 + $0x8] sm:$0xff]  ;;  %v29_v2 = vld [vmem:[%s2081_s0 + $0x10] sm:$0xff] }
   0x2   :  { %v31_v3 = vadd.f32 %v28_v1, %v27_v0  ;;  %v30_v4 = vld [vmem:[%s2081_s0 + $0x18] sm:$0xff]  ;;  %v1311_v6 = vld [vmem:[%s2084_s3 + $0x4] ss:$16 sps:$4 sm:$0xff]   ;;  %v1313_v7 = vld [vmem:[%s2084_s3] ss:$16 sps:$4 sm:$0xff]  }
   0x3   :  { %v34_v5 = vadd.f32 %v30_v4, %v29_v2  ;;  %v1314_v8 = vld [vmem:[%s2084_s3 + $0x24] ss:$16 sps:$4 sm:$0xff]   ;;  %504 = vmatprep.subr.bf16.mxu1 %v1311_v6  ;;  %v1316_v9 = vld [vmem:[%s2084_s3 + $0x20] ss:$16 sps:$4 sm:$0xff]  }
   0x4   :  { %32 = vadd.xlane.f32.xlu0 %v31_v3  ;;  %505 = vmatpush1.bf16.msra.mxu1 %v1313_v7  ;;  %v1317_v10 = vld [vmem:[%s2084_s3 + $0x44] ss:$16 sps:$4 sm:$0xff]   ;;  %v1319_v11 = vld [vmem:[%s2084_s3 + $0x40] ss:$16 sps:$4 sm:$0xff]  }
   0x5   :  { %506 = vmatprep.subr.bf16.mxu1 %v1314_v8  ;;  %v1320_v12 = vld [vmem:[%s2084_s3 + $0x64] ss:$16 sps:$4 sm:$0xff]   ;;  %v1322_v13 = vld [vmem:[%s2084_s3 + $0x60] ss:$16 sps:$4 sm:$0xff]  }
   0x6   :  { %v1323_v14 = vld [vmem:[%s2084_s3 + $0x84] ss:$16 sps:$4 sm:$0xff]   ;;  %v1325_v15 = vld [vmem:[%s2084_s3 + $0x80] ss:$16 sps:$4 sm:$0xff]  }
   0x7   :  { %v1326_v16 = vld [vmem:[%s2084_s3 + $0xa4] ss:$16 sps:$4 sm:$0xff]   ;;  %v1328_v17 = vld [vmem:[%s2084_s3 + $0xa0] ss:$16 sps:$4 sm:$0xff]  }
   0x8   :  { %35 = vadd.xlane.f32.xlu0 %v34_v5  ;;  %507 = vmatpush1.bf16.msra.mxu1 %v1316_v9  ;;  %v1329_v18 = vld [vmem:[%s2084_s3 + $0xc4] ss:$16 sps:$4 sm:$0xff]  }
   0x9   :  { %508 = vmatprep.subr.bf16.mxu1 %v1317_v10 }
   0xc   :  { %509 = vmatpush1.bf16.msra.mxu1 %v1319_v11 }
   0xd   :  { %510 = vmatprep.subr.bf16.mxu1 %v1320_v12 }
  0x10   :  { %511 = vmatpush1.bf16.msra.mxu1 %v1322_v13 }
  0x11   :  { %512 = vmatprep.subr.bf16.mxu1 %v1323_v14 }
  0x14   :  { %513 = vmatpush1.bf16.msra.mxu1 %v1325_v15 }
  0x15   :  { %514 = vmatprep.subr.bf16.mxu1 %v1326_v16 }
  0x16   :  { %12 = vsyncpa [#allocation3], 0  ;;  %v1331_v19 = vld [vmem:[%s2084_s3 + $0xc0] ss:$16 sps:$4 sm:$0xff]   ;;  %v1332_v20 = vld [vmem:[%s2084_s3 + $0xe4] ss:$16 sps:$4 sm:$0xff]   ;;  %v66_v9 = vlaneseq }
  0x17   :  { %v1334_v21 = vld [vmem:[%s2084_s3 + $0xe0] ss:$16 sps:$4 sm:$0xff]   ;;  %v1335_v22 = vld [vmem:[%s2084_s3 + $0x104] ss:$16 sps:$4 sm:$0xff]   ;;  %v1361_v52 = vld [vmem:[%s2084_s3 + $0xc] ss:$16 sps:$4 sm:$0xff]  }
  0x18   :  { %515 = vmatpush1.bf16.msra.mxu1 %v1328_v17  ;;  %v1337_v23 = vld [vmem:[%s2084_s3 + $0x100] ss:$16 sps:$4 sm:$0xff]   ;;  %v1338_v24 = vld [vmem:[%s2084_s3 + $0x124] ss:$16 sps:$4 sm:$0xff]   ;;  %v1769_v12 = vshrl.u32 %v66_v9, 7 }
  0x19   :  { %516 = vmatprep.subr.bf16.mxu1 %v1329_v18  ;;  %v1340_v39 = vld [vmem:[%s2084_s3 + $0x120] ss:$16 sps:$4 sm:$0xff]   ;;  %v1341_v40 = vld [vmem:[%s2084_s3 + $0x144] ss:$16 sps:$4 sm:$0xff]  }
  0x1a   :  { %v1343_v41 = vld [vmem:[%s2084_s3 + $0x140] ss:$16 sps:$4 sm:$0xff]   ;;  %v1344_v42 = vld [vmem:[%s2084_s3 + $0x164] ss:$16 sps:$4 sm:$0xff]   ;;  %v1772_v13 = vsub.s32 0, %v1769_v12  ;;  %v1775_v14 = vsub.s32 1, %v1769_v12 }
  0x1b   :  { %v1346_v43 = vld [vmem:[%s2084_s3 + $0x160] ss:$16 sps:$4 sm:$0xff]   ;;  %v1347_v44 = vld [vmem:[%s2084_s3 + $0x184] ss:$16 sps:$4 sm:$0xff]  }
  0x1c   :  { %517 = vmatpush1.bf16.msra.mxu1 %v1331_v19  ;;  %v1349_v45 = vld [vmem:[%s2084_s3 + $0x180] ss:$16 sps:$4 sm:$0xff]   ;;  %v1350_v46 = vld [vmem:[%s2084_s3 + $0x1a4] ss:$16 sps:$4 sm:$0xff]  }
  0x1d   :  { %518 = vmatprep.subr.bf16.mxu1 %v1332_v20  ;;  %v1352_v47 = vld [vmem:[%s2084_s3 + $0x1a0] ss:$16 sps:$4 sm:$0xff]   ;;  %v1353_v48 = vld [vmem:[%s2084_s3 + $0x1c4] ss:$16 sps:$4 sm:$0xff]  }
  0x1e   :  { %v1355_v49 = vld [vmem:[%s2084_s3 + $0x1c0] ss:$16 sps:$4 sm:$0xff]   ;;  %v1356_v50 = vld [vmem:[%s2084_s3 + $0x1e4] ss:$16 sps:$4 sm:$0xff]  }
  0x1f   :  { %v1358_v51 = vld [vmem:[%s2084_s3 + $0x1e0] ss:$16 sps:$4 sm:$0xff]   ;;  %v1407_v53 = vld [vmem:[%s2086_s5 + $0x4] ss:$8 sps:$4 sm:$0xff]   ;;  %v1410_v55 = vld [vmem:[%s2086_s5 + $0x14] ss:$8 sps:$4 sm:$0xff]  }
  0x20   :  { %519 = vmatpush1.bf16.msra.mxu1 %v1334_v21  ;;  %v1409_v54 = vld [vmem:[%s2086_s5] ss:$8 sps:$4 sm:$0xff]   ;;  %1062 = vmatprep.subr.bf16.mxu0 %v1407_v53  ;;  %v1412_v56 = vld [vmem:[%s2086_s5 + $0x10] ss:$8 sps:$4 sm:$0xff]   ;;  %v1413_v57 = vld [vmem:[%s2086_s5 + $0x24] ss:$8 sps:$4 sm:$0xff]  }
  0x21   :  { %520 = vmatprep.subr.bf16.mxu1 %v1335_v22  ;;  %1063 = vmatpush1.bf16.msra.mxu0 %v1409_v54  ;;  %v1415_v58 = vld [vmem:[%s2086_s5 + $0x20] ss:$8 sps:$4 sm:$0xff]   ;;  %v1416_v59 = vld [vmem:[%s2086_s5 + $0x34] ss:$8 sps:$4 sm:$0xff]   ;;  %v1418_v60 = vld [vmem:[%s2086_s5 + $0x30] ss:$8 sps:$4 sm:$0xff]  }
  0x22   :  { %1064 = vmatprep.subr.bf16.mxu0 %v1410_v55  ;;  %v1419_v61 = vld [vmem:[%s2086_s5 + $0x44] ss:$8 sps:$4 sm:$0xff]   ;;  %v1421_v62 = vld [vmem:[%s2086_s5 + $0x40] ss:$8 sps:$4 sm:$0xff]   ;;  %v1422_v63 = vld [vmem:[%s2086_s5 + $0x54] ss:$8 sps:$4 sm:$0xff]  }
  0x23   :  { %v1428_v3 = vld [vmem:[%s2086_s5 + $0x74] ss:$8 sps:$4 sm:$0xff]   ;;  %v64_v15 = vld [vmem:[%s2082_s1] sm:$0x3]  ;;  %v1383_v53 = vld [vmem:[%s2084_s3 + $0x108] ss:$16 sps:$4 sm:$0xff]  }
  0x24   :  { %521 = vmatpush1.bf16.msra.mxu1 %v1337_v23  ;;  %v69_v18 = vrot.slane %v64_v15, %v1772_v13  ;;  %v73_v19 = vrot.slane %v64_v15, %v1775_v14  ;;  %v80_v20 = vld [vmem:[%s2083_s2] sm:$0x3]  ;;  %v1388_v54 = vld [vmem:[%s2084_s3 + $0x12c] ss:$16 sps:$4 sm:$0xff]   ;;  %v1386_v55 = vld [vmem:[%s2084_s3 + $0x128] ss:$16 sps:$4 sm:$0xff]  }
  0x25   :  { %522 = vmatprep.subr.bf16.mxu1 %v1338_v24  ;;  %1065 = vmatpush1.bf16.msra.mxu0 %v1412_v56  ;;  %v85_v23 = vrot.slane %v80_v20, %v1772_v13  ;;  %v89_v24 = vrot.slane %v80_v20, %v1775_v14  ;;  %v1391_v56 = vld [vmem:[%s2084_s3 + $0x14c] ss:$16 sps:$4 sm:$0xff]   ;;  %v1439_v9 = vld [vmem:[%s2086_s5 + $0xa0] ss:$8 sps:$4 sm:$0xff]  }
  0x26   :  { %1066 = vmatprep.subr.bf16.mxu0 %v1413_v57  ;;  %v1389_v57 = vld [vmem:[%s2084_s3 + $0x148] ss:$16 sps:$4 sm:$0xff]   ;;  %v1443_v15 = vld [vmem:[%s2086_s5 + $0xc4] ss:$8 sps:$4 sm:$0xff]  }
  0x27   :  { %v1451_v20 = vld [vmem:[%s2086_s5 + $0xe0] ss:$8 sps:$4 sm:$0xff]  }
  0x28   :  { %523 = vmatpush1.bf16.msra.mxu1 %v1340_v39 }
  0x29   :  { %524 = vmatprep.subr.bf16.mxu1 %v1341_v40  ;;  %1067 = vmatpush1.bf16.msra.mxu0 %v1415_v58  ;;  %v1367_v40 = vld [vmem:[%s2084_s3 + $0x4c] ss:$16 sps:$4 sm:$0xff]  }
  0x2a   :  { %1068 = vmatprep.subr.bf16.mxu0 %v1416_v59  ;;  %v1394_v58 = vld [vmem:[%s2084_s3 + $0x16c] ss:$16 sps:$4 sm:$0xff]   ;;  %v1392_v59 = vld [vmem:[%s2084_s3 + $0x168] ss:$16 sps:$4 sm:$0xff]  }
  0x2c   :  { %525 = vmatpush1.bf16.msra.mxu1 %v1343_v41  ;;  %v1365_v41 = vld [vmem:[%s2084_s3 + $0x48] ss:$16 sps:$4 sm:$0xff]  }
  0x2d   :  { %526 = vmatprep.subr.bf16.mxu1 %v1344_v42  ;;  %1069 = vmatpush1.bf16.msra.mxu0 %v1418_v60  ;;  %v1370_v42 = vld [vmem:[%s2084_s3 + $0x6c] ss:$16 sps:$4 sm:$0xff]  }
  0x2e   :  { %1070 = vmatprep.subr.bf16.mxu0 %v1419_v61  ;;  %v1397_v60 = vld [vmem:[%s2084_s3 + $0x18c] ss:$16 sps:$4 sm:$0xff]   ;;  %v1395_v61 = vld [vmem:[%s2084_s3 + $0x188] ss:$16 sps:$4 sm:$0xff]  }
  0x30   :  { %527 = vmatpush1.bf16.msra.mxu1 %v1346_v43  ;;  %v1368_v43 = vld [vmem:[%s2084_s3 + $0x68] ss:$16 sps:$4 sm:$0xff]  }
  0x31   :  { %528 = vmatprep.subr.bf16.mxu1 %v1347_v44  ;;  %1071 = vmatpush1.bf16.msra.mxu0 %v1421_v62  ;;  %v1373_v44 = vld [vmem:[%s2084_s3 + $0x8c] ss:$16 sps:$4 sm:$0xff]  }
  0x32   :  { %1072 = vmatprep.subr.bf16.mxu0 %v1422_v63  ;;  %v1400_v62 = vld [vmem:[%s2084_s3 + $0x1ac] ss:$16 sps:$4 sm:$0xff]   ;;  %v1398_v63 = vld [vmem:[%s2084_s3 + $0x1a8] ss:$16 sps:$4 sm:$0xff]  }
  0x34   :  { %529 = vmatpush1.bf16.msra.mxu1 %v1349_v45  ;;  %v1371_v45 = vld [vmem:[%s2084_s3 + $0x88] ss:$16 sps:$4 sm:$0xff]  }
  0x35   :  { %530 = vmatprep.subr.bf16.mxu1 %v1350_v46  ;;  %v1376_v46 = vld [vmem:[%s2084_s3 + $0xac] ss:$16 sps:$4 sm:$0xff]  }
  0x38   :  { %531 = vmatpush1.bf16.msra.mxu1 %v1352_v47  ;;  %v1374_v47 = vld [vmem:[%s2084_s3 + $0xa8] ss:$16 sps:$4 sm:$0xff]  }
  0x39   :  { %532 = vmatprep.subr.bf16.mxu1 %v1353_v48  ;;  %v1379_v48 = vld [vmem:[%s2084_s3 + $0xcc] ss:$16 sps:$4 sm:$0xff]  }
  0x3c   :  { %533 = vmatpush1.bf16.msra.mxu1 %v1355_v49  ;;  %v1377_v49 = vld [vmem:[%s2084_s3 + $0xc8] ss:$16 sps:$4 sm:$0xff]  }
  0x3d   :  { %534 = vmatprep.subr.bf16.mxu1 %v1356_v50  ;;  %v1382_v50 = vld [vmem:[%s2084_s3 + $0xec] ss:$16 sps:$4 sm:$0xff]  }
  0x40   :  { %535 = vmatpush1.bf16.msra.mxu1 %v1358_v51  ;;  %v1380_v51 = vld [vmem:[%s2084_s3 + $0xe8] ss:$16 sps:$4 sm:$0xff]  }
  0x41   :  { %547 = vmatprep.subr.bf16.mxu1 %v1361_v52  ;;  %v1385_v52 = vld [vmem:[%s2084_s3 + $0x10c] ss:$16 sps:$4 sm:$0xff]  }
  0x91   :  { %v33_v25 = vpop.xlane.xlu0 %32 }
  0x92   :  { %v38_v26 = vmul.f32 0.00390625, %v33_v25 }
  0x94   :  { %v1663_v27 = vsub.f32 %v27_v0, %v38_v26  ;;  %v1665_v28 = vsub.f32 %v28_v1, %v38_v26  ;;  %v1424_v0 = vld [vmem:[%s2086_s5 + $0x50] ss:$8 sps:$4 sm:$0xff]   ;;  %v1425_v1 = vld [vmem:[%s2086_s5 + $0x64] ss:$8 sps:$4 sm:$0xff]  }
  0x95   :  { %v36_v29 = vpop.xlane.xlu0 %35  ;;  %1073 = vmatpush1.bf16.msra.mxu0 %v1424_v0  ;;  %v1403_v0 = vld [vmem:[%s2084_s3 + $0x1cc] ss:$16 sps:$4 sm:$0xff]  }
  0x96   :  { %v39_v30 = vmul.f32 0.00390625, %v36_v29  ;;  %v44_v31 = vmul.f32 %v1663_v27, %v1663_v27  ;;  %v45_v32 = vmul.f32 %v1665_v28, %v1665_v28  ;;  %1074 = vmatprep.subr.bf16.mxu0 %v1425_v1  ;;  %v1401_v1 = vld [vmem:[%s2084_s3 + $0x1c8] ss:$16 sps:$4 sm:$0xff]  }
  0x98   :  { %v1671_v33 = vsub.f32 %v29_v2, %v39_v30  ;;  %v1673_v34 = vsub.f32 %v30_v4, %v39_v30  ;;  %v48_v35 = vadd.f32 %v45_v32, %v44_v31  ;;  %v1427_v2 = vld [vmem:[%s2086_s5 + $0x60] ss:$8 sps:$4 sm:$0xff]   ;;  %v1430_v4 = vld [vmem:[%s2086_s5 + $0x70] ss:$8 sps:$4 sm:$0xff]  }
  0x99   :  { %1075 = vmatpush1.bf16.msra.mxu0 %v1427_v2  ;;  %v1406_v2 = vld [vmem:[%s2084_s3 + $0x1ec] ss:$16 sps:$4 sm:$0xff]  }
  0x9a   :  { %49 = vadd.xlane.f32.xlu1 %v48_v35  ;;  %v46_v36 = vmul.f32 %v1671_v33, %v1671_v33  ;;  %v47_v37 = vmul.f32 %v1673_v34, %v1673_v34  ;;  %1076 = vmatprep.subr.bf16.mxu0 %v1428_v3  ;;  %v1404_v3 = vld [vmem:[%s2084_s3 + $0x1e8] ss:$16 sps:$4 sm:$0xff]  }
  0x9c   :  { %v51_v38 = vadd.f32 %v47_v37, %v46_v36 }
  0x9d   :  { %1077 = vmatpush1.bf16.msra.mxu0 %v1430_v4  ;;  %v1431_v4 = vld [vmem:[%s2086_s5 + $0x84] ss:$8 sps:$4 sm:$0xff]  }
  0x9e   :  { %52 = vadd.xlane.f32.xlu1 %v51_v38  ;;  %1078 = vmatprep.subr.bf16.mxu0 %v1431_v4 }
 0x127   :  { %v50_v5 = vpop.xlane.xlu1 %49 }
 0x128   :  { %v54_v6 = vmul.f32 0.00390625, %v50_v5  ;;  %v1433_v5 = vld [vmem:[%s2086_s5 + $0x80] ss:$8 sps:$4 sm:$0xff]  }
 0x129   :  { %1079 = vmatpush1.bf16.msra.mxu0 %v1433_v5 }
 0x12a   :  { %v56_v7 = vadd.f32 1e-06, %v54_v6  ;;  %v1434_v6 = vld [vmem:[%s2086_s5 + $0x94] ss:$8 sps:$4 sm:$0xff]  }
 0x12b   :  { %v53_v8 = vpop.xlane.xlu1 %52  ;;  %1080 = vmatprep.subr.bf16.mxu0 %v1434_v6 }
 0x12c   :  { %1503 = vrsqrt.f32 %v56_v7  ;;  %v55_v10 = vmul.f32 0.00390625, %v53_v8  ;;  %v1436_v7 = vld [vmem:[%s2086_s5 + $0x90] ss:$8 sps:$4 sm:$0xff]   ;;  %v1437_v8 = vld [vmem:[%s2086_s5 + $0xa4] ss:$8 sps:$4 sm:$0xff]  }
 0x12d   :  { %1081 = vmatpush1.bf16.msra.mxu0 %v1436_v7 }
 0x12e   :  { %v57_v11 = vadd.f32 1e-06, %v55_v10  ;;  %1082 = vmatprep.subr.bf16.mxu0 %v1437_v8  ;;  %v1440_v10 = vld [vmem:[%s2086_s5 + $0xb4] ss:$8 sps:$4 sm:$0xff]  }
 0x130   :  { %1505 = vrsqrt.f32 %v57_v11  ;;  %v1442_v11 = vld [vmem:[%s2086_s5 + $0xb0] ss:$8 sps:$4 sm:$0xff]  }
 0x131   :  { %1083 = vmatpush1.bf16.msra.mxu0 %v1439_v9  ;;  %v1455_v9 = vld [vmem:[%s2086_s5 + $0x100] ss:$8 sps:$4 sm:$0xff]  }
 0x132   :  { %1084 = vmatprep.subr.bf16.mxu0 %v1440_v10  ;;  %v1460_v10 = vld [vmem:[%s2086_s5 + $0x114] ss:$8 sps:$4 sm:$0xff]  }
 0x135   :  { %1085 = vmatpush1.bf16.msra.mxu0 %v1442_v11  ;;  %v1458_v11 = vld [vmem:[%s2086_s5 + $0x110] ss:$8 sps:$4 sm:$0xff]  }
 0x136   :  { %v1504_v16 = vpop.eup %1503  ;;  %1086 = vmatprep.subr.bf16.mxu0 %v1443_v15  ;;  %v1463_v15 = vld [vmem:[%s2086_s5 + $0x124] ss:$8 sps:$4 sm:$0xff]  }
 0x137   :  { %v61_v17 = vmul.f32 %v1504_v16, %v1665_v28  ;;  %v60_v21 = vmul.f32 %v1504_v16, %v1663_v27  ;;  %v1359_v27 = vld [vmem:[%s2084_s3 + $0x8] ss:$16 sps:$4 sm:$0xff]  }
 0x138   :  { %v1445_v16 = vld [vmem:[%s2086_s5 + $0xc0] ss:$8 sps:$4 sm:$0xff]  }
 0x139   :  { %v77_v26 = vmul.f32 %v73_v19, %v61_v17  ;;  %v76_v29 = vmul.f32 %v69_v18, %v60_v21  ;;  %v1446_v17 = vld [vmem:[%s2086_s5 + $0xd4] ss:$8 sps:$4 sm:$0xff]   ;;  %1087 = vmatpush1.bf16.msra.mxu0 %v1445_v16  ;;  %v1461_v16 = vld [vmem:[%s2086_s5 + $0x120] ss:$8 sps:$4 sm:$0xff]  }
 0x13a   :  { %v1506_v22 = vpop.eup %1505  ;;  %1088 = vmatprep.subr.bf16.mxu0 %v1446_v17  ;;  %v1452_v21 = vld [vmem:[%s2086_s5 + $0xf4] ss:$8 sps:$4 sm:$0xff]  }
 0x13b   :  { %v63_v25 = vmul.f32 %v1506_v22, %v1673_v34  ;;  %v62_v28 = vmul.f32 %v1506_v22, %v1671_v33  ;;  %v93_v32 = vadd.f32 %v89_v24, %v77_v26  ;;  %v92_v36 = vadd.f32 %v85_v23, %v76_v29  ;;  %v1364_v34 = vld [vmem:[%s2084_s3 + $0x2c] ss:$16 sps:$4 sm:$0xff]   ;;  %v1362_v33 = vld [vmem:[%s2084_s3 + $0x28] ss:$16 sps:$4 sm:$0xff]  }
 0x13c   :  { %v1454_v22 = vld [vmem:[%s2086_s5 + $0xf0] ss:$8 sps:$4 sm:$0xff]   ;;  %v1466_v17 = vld [vmem:[%s2086_s5 + $0x134] ss:$8 sps:$4 sm:$0xff]  }
 0x13d   :  { %v79_v30 = vmul.f32 %v73_v19, %v63_v25  ;;  %v78_v31 = vmul.f32 %v69_v18, %v62_v28  ;;  %v1448_v18 = vld [vmem:[%s2086_s5 + $0xd0] ss:$8 sps:$4 sm:$0xff]   ;;  %v1449_v19 = vld [vmem:[%s2086_s5 + $0xe4] ss:$8 sps:$4 sm:$0xff]  }
 0x13e   :  { %1089 = vmatpush1.bf16.msra.mxu0 %v1448_v18  ;;  %v1464_v18 = vld [vmem:[%s2086_s5 + $0x130] ss:$8 sps:$4 sm:$0xff]  }
 0x13f   :  { %v95_v35 = vadd.f32 %v89_v24, %v79_v30  ;;  %v94_v37 = vadd.f32 %v85_v23, %v78_v31  ;;  %1090 = vmatprep.subr.bf16.mxu0 %v1449_v19  ;;  %v1457_v23 = vld [vmem:[%s2086_s5 + $0x104] ss:$8 sps:$4 sm:$0xff]   ;;  %v1942_v24 = vld [vmem:[%s2085_s4] sm:$0xf] }
 0x140   :  { %v167_v25 = vrot.slane %v1942_v24, %v1772_v13  ;;  %v171_v26 = vrot.slane %v1942_v24, %v1775_v14  ;;  %v1469_v19 = vld [vmem:[%s2086_s5 + $0x144] ss:$8 sps:$4 sm:$0xff]  }
 0x141   :  { %v97_v38 = vpack.c.bf16 %v95_v35, %v93_v32  ;;  %v1794_v39 = vpack.c.bf16 %v94_v37, %v92_v36 }
 0x142   :  { %1091 = vmatpush1.bf16.msra.mxu0 %v1451_v20  ;;  %v1467_v20 = vld [vmem:[%s2086_s5 + $0x140] ss:$8 sps:$4 sm:$0xff]  }
 0x143   :  { %536 = vmatprep.mubr.bf16.mxu1 %v97_v38  ;;  %1092 = vmatprep.subr.bf16.mxu0 %v1452_v21  ;;  %v1472_v21 = vld [vmem:[%s2086_s5 + $0x154] ss:$8 sps:$4 sm:$0xff]  }
 0x144   :  { %537 = vmatmul.mubr.bf16.vlgmr.msra.gmra.mrb[0].mxu1 %v1794_v39 }
 0x145   :  { %548 = vmatpush1.bf16.msra.mxu1 %v1359_v27  ;;  %579 = vmatprep.mubr.bf16.mxu1 %v97_v38 }
 0x146   :  { %549 = vmatprep.subr.bf16.mxu1 %v1364_v34  ;;  %1093 = vmatpush1.bf16.msra.mxu0 %v1454_v22  ;;  %v1470_v22 = vld [vmem:[%s2086_s5 + $0x150] ss:$8 sps:$4 sm:$0xff]  }
 0x147   :  { %1105 = vmatprep.subr.bf16.mxu0 %v1457_v23  ;;  %v1475_v23 = vld [vmem:[%s2086_s5 + $0x164] ss:$8 sps:$4 sm:$0xff]  }
 0x149   :  { %550 = vmatpush1.bf16.msra.mxu1 %v1362_v33 }
 0x14a   :  { %551 = vmatprep.subr.bf16.mxu1 %v1367_v40 }
 0x14d   :  { %552 = vmatpush1.bf16.msra.mxu1 %v1365_v41 }
 0x14e   :  { %553 = vmatprep.subr.bf16.mxu1 %v1370_v42 }
 0x151   :  { %554 = vmatpush1.bf16.msra.mxu1 %v1368_v43 }
 0x152   :  { %555 = vmatprep.subr.bf16.mxu1 %v1373_v44 }
 0x155   :  { %556 = vmatpush1.bf16.msra.mxu1 %v1371_v45 }
 0x156   :  { %557 = vmatprep.subr.bf16.mxu1 %v1376_v46 }
 0x159   :  { %558 = vmatpush1.bf16.msra.mxu1 %v1374_v47 }
 0x15a   :  { %559 = vmatprep.subr.bf16.mxu1 %v1379_v48 }
 0x15d   :  { %560 = vmatpush1.bf16.msra.mxu1 %v1377_v49 }
 0x15e   :  { %561 = vmatprep.subr.bf16.mxu1 %v1382_v50 }
 0x161   :  { %562 = vmatpush1.bf16.msra.mxu1 %v1380_v51 }
 0x162   :  { %563 = vmatprep.subr.bf16.mxu1 %v1385_v52 }
 0x165   :  { %564 = vmatpush1.bf16.msra.mxu1 %v1383_v53 }
 0x166   :  { %565 = vmatprep.subr.bf16.mxu1 %v1388_v54 }
 0x169   :  { %566 = vmatpush1.bf16.msra.mxu1 %v1386_v55 }
 0x16a   :  { %567 = vmatprep.subr.bf16.mxu1 %v1391_v56 }
 0x16d   :  { %568 = vmatpush1.bf16.msra.mxu1 %v1389_v57 }
 0x16e   :  { %569 = vmatprep.subr.bf16.mxu1 %v1394_v58 }
 0x171   :  { %570 = vmatpush1.bf16.msra.mxu1 %v1392_v59 }
 0x172   :  { %571 = vmatprep.subr.bf16.mxu1 %v1397_v60 }
 0x175   :  { %572 = vmatpush1.bf16.msra.mxu1 %v1395_v61 }
 0x176   :  { %573 = vmatprep.subr.bf16.mxu1 %v1400_v62 }
 0x179   :  { %574 = vmatpush1.bf16.msra.mxu1 %v1398_v63 }
 0x17a   :  { %575 = vmatprep.subr.bf16.mxu1 %v1403_v0 }
 0x17d   :  { %576 = vmatpush1.bf16.msra.mxu1 %v1401_v1 }
 0x17e   :  { %577 = vmatprep.subr.bf16.mxu1 %v1406_v2 }
 0x181   :  { %578 = vmatpush1.bf16.msra.mxu1 %v1404_v3 }
 0x184   :  { %580 = vmatmul.mubr.bf16.vlgmr.msra.gmra.mrb[4].mxu1 %v1794_v39 }
 0x217   :  { %v538_v28 = vpop.f32.mrb[0].mxu1 }
 0x218   :  { %v539_v29 = vadd.f32 %v538_v28, %v167_v25  ;;  %v540_v30 = vpop.f32.mrb[1].mxu1  ;;  %v174_v28 = vsub.s32 2, %v1769_v12 }
 0x219   :  { %v541_v31 = vadd.f32 %v540_v30, %v171_v26  ;;  %v542_v32 = vpop.f32.mrb[2].mxu1  ;;  %v1476_v30 = vld [vmem:[%s2086_s5 + $0x170] ss:$8 sps:$4 sm:$0xff]  }
 0x21a   :  { %v590_v35 = vmul.f32 %v539_v29, %v539_v29  ;;  %v543_v36 = vadd.f32 %v542_v32, %v167_v25  ;;  %v544_v37 = vpop.f32.mrb[3].mxu1  ;;  %v598_v61 = vmul.f32 0.5, %v539_v29  ;;  %v1473_v25 = vld [vmem:[%s2086_s5 + $0x160] ss:$8 sps:$4 sm:$0xff]   ;;  %v175_v32 = vrot.slane %v1942_v24, %v174_v28 }
 0x21b   :  { %v591_v38 = vmul.f32 %v541_v31, %v541_v31  ;;  %v545_v27 = vadd.f32 %v544_v37, %v171_v26  ;;  %v599_v0 = vmul.f32 0.5, %v541_v31  ;;  %v1478_v26 = vld [vmem:[%s2086_s5 + $0x174] ss:$8 sps:$4 sm:$0xff]  }
 0x21c   :  { %v606_v39 = vmul.f32 %v590_v35, %v539_v29  ;;  %v594_v34 = vmul.f32 %v543_v36, %v543_v36  ;;  %v602_v62 = vmul.f32 0.5, %v543_v36  ;;  %v1484_v37 = vld [vmem:[%s2086_s5 + $0x194] ss:$8 sps:$4 sm:$0xff]  }
 0x21d   :  { %v607_v33 = vmul.f32 %v591_v38, %v541_v31  ;;  %v595_v40 = vmul.f32 %v545_v27, %v545_v27  ;;  %v603_v1 = vmul.f32 0.5, %v545_v27 }
 0x21e   :  { %v614_v41 = vmul.f32 0.044715, %v606_v39  ;;  %v610_v42 = vmul.f32 %v594_v34, %v543_v36 }
 0x21f   :  { %v615_v43 = vmul.f32 0.044715, %v607_v33  ;;  %v611_v44 = vmul.f32 %v595_v40, %v545_v27 }
 0x220   :  { %v622_v45 = vadd.f32 %v614_v41, %v539_v29  ;;  %v618_v46 = vmul.f32 0.044715, %v610_v42  ;;  %v178_v29 = vsub.s32 3, %v1769_v12 }
 0x221   :  { %v619_v47 = vmul.f32 0.044715, %v611_v44  ;;  %v623_v48 = vadd.f32 %v615_v43, %v541_v31  ;;  %v1481_v31 = vld [vmem:[%s2086_s5 + $0x184] ss:$8 sps:$4 sm:$0xff]  }
 0x222   :  { %v630_v49 = vmul.f32 0.7978846, %v622_v45  ;;  %v626_v50 = vadd.f32 %v618_v46, %v543_v36  ;;  %v179_v35 = vrot.slane %v1942_v24, %v178_v29  ;;  %v1479_v36 = vld [vmem:[%s2086_s5 + $0x180] ss:$8 sps:$4 sm:$0xff]   ;;  %v1482_v24 = vld [vmem:[%s2086_s5 + $0x190] ss:$8 sps:$4 sm:$0xff]  }
 0x223   :  { %v627_v51 = vadd.f32 %v619_v47, %v545_v27  ;;  %v631_v52 = vmul.f32 0.7978846, %v623_v48  ;;  %v1487_v44 = vld [vmem:[%s2086_s5 + $0x1a4] ss:$8 sps:$4 sm:$0xff]  }
 0x224   :  { %1507 = vtanh.f32 %v630_v49  ;;  %v634_v53 = vmul.f32 0.7978846, %v626_v50 }
 0x225   :  { %v635_v54 = vmul.f32 0.7978846, %v627_v51  ;;  %1509 = vtanh.f32 %v631_v52  ;;  %v1485_v51 = vld [vmem:[%s2086_s5 + $0x1a0] ss:$8 sps:$4 sm:$0xff]  }
 0x226   :  { %1511 = vtanh.f32 %v634_v53 }
 0x227   :  { %1513 = vtanh.f32 %v635_v54  ;;  %v1490_v54 = vld [vmem:[%s2086_s5 + $0x1b4] ss:$8 sps:$4 sm:$0xff]  }
 0x22e   :  { %v1508_v55 = vpop.eup %1507 }
 0x22f   :  { %v1510_v56 = vpop.eup %1509  ;;  %v646_v57 = vadd.f32 1.0, %v1508_v55 }
 0x230   :  { %v1512_v58 = vpop.eup %1511  ;;  %v647_v59 = vadd.f32 1.0, %v1510_v56 }
 0x231   :  { %v1514_v60 = vpop.eup %1513  ;;  %v650_v63 = vadd.f32 1.0, %v1512_v58  ;;  %v654_v3 = vmul.f32 %v646_v57, %v598_v61  ;;  %v1488_v61 = vld [vmem:[%s2086_s5 + $0x1b0] ss:$8 sps:$4 sm:$0xff]  }
 0x232   :  { %v651_v2 = vadd.f32 1.0, %v1514_v60  ;;  %v655_v5 = vmul.f32 %v647_v59, %v599_v0  ;;  %v1493_v0 = vld [vmem:[%s2086_s5 + $0x1c4] ss:$8 sps:$4 sm:$0xff]  }
 0x233   :  { %v658_v4 = vmul.f32 %v650_v63, %v602_v62 }
 0x234   :  { %v659_v6 = vmul.f32 %v651_v2, %v603_v1 }
 0x235   :  { %v662_v7 = vpack.c.bf16 %v658_v4, %v654_v3  ;;  %v1491_v3 = vld [vmem:[%s2086_s5 + $0x1c0] ss:$8 sps:$4 sm:$0xff]   ;;  %v1496_v4 = vld [vmem:[%s2086_s5 + $0x1d4] ss:$8 sps:$4 sm:$0xff]  }
 0x236   :  { %v663_v8 = vpack.c.bf16 %v659_v6, %v655_v5  ;;  %v1494_v5 = vld [vmem:[%s2086_s5 + $0x1d0] ss:$8 sps:$4 sm:$0xff]   ;;  %v1499_v6 = vld [vmem:[%s2086_s5 + $0x1e4] ss:$8 sps:$4 sm:$0xff]  }
 0x238   :  { %1094 = vmatprep.mubr.bf16.mxu0 %v663_v8  ;;  %v1497_v8 = vld [vmem:[%s2086_s5 + $0x1e0] ss:$8 sps:$4 sm:$0xff]  }
 0x239   :  { %1095 = vmatmul.mubr.bf16.vlgmr.msra.gmra.mrb[0].mxu0 %v662_v7 }
 0x23a   :  { %1106 = vmatpush1.bf16.msra.mxu0 %v1455_v9 }
 0x23b   :  { %1107 = vmatprep.subr.bf16.mxu0 %v1460_v10  ;;  %v1502_v10 = vld [vmem:[%s2086_s5 + $0x1f4] ss:$8 sps:$4 sm:$0xff]  }
 0x23e   :  { %1108 = vmatpush1.bf16.msra.mxu0 %v1458_v11 }
 0x23f   :  { %1109 = vmatprep.subr.bf16.mxu0 %v1463_v15 }
 0x242   :  { %1110 = vmatpush1.bf16.msra.mxu0 %v1461_v16 }
 0x243   :  { %1111 = vmatprep.subr.bf16.mxu0 %v1466_v17 }
 0x246   :  { %1112 = vmatpush1.bf16.msra.mxu0 %v1464_v18 }
 0x247   :  { %1113 = vmatprep.subr.bf16.mxu0 %v1469_v19 }
 0x24a   :  { %1114 = vmatpush1.bf16.msra.mxu0 %v1467_v20 }
 0x24b   :  { %1115 = vmatprep.subr.bf16.mxu0 %v1472_v21  ;;  %v1500_v21 = vld [vmem:[%s2086_s5 + $0x1f0] ss:$8 sps:$4 sm:$0xff]   ;;  %s1551_s5 = smov [#allocation2]  }
 0x24c   :  { %s1161_s22 = sshll.u32 %s1551_s5, 4  ;;  %s1162_s22 = int_to_ptr.vmem [resolvable:$true] %s1161_s22 }
 0x24d   :  { %s1527_s30 = scalar_lea.vmem %s1162_s22, 512  ;;  %p1532_p1 = scmp.lt.s32.totalorder %s1162_s22, %s1162_s22 }
 0x24e   :  { %1116 = vmatpush1.bf16.msra.mxu0 %v1470_v22  ;;  %p1528_p0 = scmp.ne.s32.totalorder %s1162_s22, %s1527_s30  ;;  %p1533_p2 = scmp.lt.s32.totalorder %s1527_s30, %s1527_s30 }
 0x24f   :  { %1117 = vmatprep.subr.bf16.mxu0 %v1475_v23 }
 0x250   :  { %p1534_p3 = por %p1533_p2, %p1532_p1 }
 0x252   :  { %1118 = vmatpush1.bf16.msra.mxu0 %v1473_v25  ;;  %p1535_p4 = pnand %p1534_p3, %p1528_p0 }
 0x253   :  { %1119 = vmatprep.subr.bf16.mxu0 %v1478_v26 }
 0x256   :  { %1120 = vmatpush1.bf16.msra.mxu0 %v1476_v30 }
 0x257   :  { %v581_v12 = vpop.f32.mrb[4].mxu1  ;;  %1121 = vmatprep.subr.bf16.mxu0 %v1481_v31 }
 0x258   :  { %v582_v38 = vadd.f32 %v581_v12, %v175_v32  ;;  %v583_v27 = vpop.f32.mrb[5].mxu1 }
 0x259   :  { %v2006_v39 = vadd.f32 %v583_v27, %v179_v35  ;;  %v585_v34 = vpop.f32.mrb[6].mxu1 }
 0x25a   :  { %v592_v33 = vmul.f32 %v582_v38, %v582_v38  ;;  %v586_v40 = vadd.f32 %v585_v34, %v175_v32  ;;  %v587_v41 = vpop.f32.mrb[7].mxu1  ;;  %1122 = vmatpush1.bf16.msra.mxu0 %v1479_v36  ;;  %v600_v18 = vmul.f32 0.5, %v582_v38 }
 0x25b   :  { %v593_v42 = vmul.f32 %v2006_v39, %v2006_v39  ;;  %v588_v43 = vadd.f32 %v587_v41, %v179_v35  ;;  %1123 = vmatprep.subr.bf16.mxu0 %v1484_v37  ;;  %v601_v22 = vmul.f32 0.5, %v2006_v39  ;;  %v730_v35 = vld [vmem:[%s2087_s6] sm:$0x3] }
 0x25c   :  { %v608_v45 = vmul.f32 %v592_v33, %v582_v38  ;;  %v596_v46 = vmul.f32 %v586_v40, %v586_v40  ;;  %v604_v19 = vmul.f32 0.5, %v586_v40  ;;  %v735_v36 = vrot.slane %v730_v35, %v1772_v13  ;;  %v1523_v33 = vld [vmem:[%s2081_s0] sm:$0xff]  ;;  %v1524_v13 = vld [vmem:[%s2081_s0 + $0x8] sm:$0xff] }
 0x25d   :  { %v609_v47 = vmul.f32 %v593_v42, %v2006_v39  ;;  %v597_v48 = vmul.f32 %v588_v43, %v588_v43  ;;  %v605_v23 = vmul.f32 0.5, %v588_v43  ;;  %v739_v12 = vrot.slane %v730_v35, %v1775_v14 }
 0x25e   :  { %v616_v49 = vmul.f32 0.044715, %v608_v45  ;;  %v612_v50 = vmul.f32 %v596_v46, %v586_v40  ;;  %1124 = vmatpush1.bf16.msra.mxu0 %v1482_v24  ;;  %v1526_v45 = vld [vmem:[%s2081_s0 + $0x18] sm:$0xff] }
 0x25f   :  { %v617_v52 = vmul.f32 0.044715, %v609_v47  ;;  %v613_v53 = vmul.f32 %v597_v48, %v588_v43  ;;  %1125 = vmatprep.subr.bf16.mxu0 %v1487_v44 }
 0x260   :  { %v624_v55 = vadd.f32 %v616_v49, %v582_v38  ;;  %v620_v56 = vmul.f32 0.044715, %v612_v50 }
 0x261   :  { %v625_v57 = vadd.f32 %v617_v52, %v2006_v39  ;;  %v621_v58 = vmul.f32 0.044715, %v613_v53 }
 0x262   :  { %v632_v59 = vmul.f32 0.7978846, %v624_v55  ;;  %v628_v60 = vadd.f32 %v620_v56, %v586_v40  ;;  %1126 = vmatpush1.bf16.msra.mxu0 %v1485_v51 }
 0x263   :  { %v633_v62 = vmul.f32 0.7978846, %v625_v57  ;;  %v629_v63 = vadd.f32 %v621_v58, %v588_v43  ;;  %1127 = vmatprep.subr.bf16.mxu0 %v1490_v54  ;;  %v1525_v43 = vld [vmem:[%s2081_s0 + $0x10] sm:$0xff] }
 0x264   :  { %1515 = vtanh.f32 %v632_v59  ;;  %v636_v1 = vmul.f32 0.7978846, %v628_v60 }
 0x265   :  { %1517 = vtanh.f32 %v633_v62  ;;  %v637_v2 = vmul.f32 0.7978846, %v629_v63 }
 0x266   :  { %1519 = vtanh.f32 %v636_v1  ;;  %1128 = vmatpush1.bf16.msra.mxu0 %v1488_v61 }
 0x267   :  { %1521 = vtanh.f32 %v637_v2  ;;  %1129 = vmatprep.subr.bf16.mxu0 %v1493_v0 }
 0x26a   :  { %1130 = vmatpush1.bf16.msra.mxu0 %v1491_v3 }
 0x26b   :  { %1131 = vmatprep.subr.bf16.mxu0 %v1496_v4 }
 0x26e   :  { %v1516_v7 = vpop.eup %1515  ;;  %1132 = vmatpush1.bf16.msra.mxu0 %v1494_v5 }
 0x26f   :  { %v1518_v9 = vpop.eup %1517  ;;  %1133 = vmatprep.subr.bf16.mxu0 %v1499_v6  ;;  %v648_v11 = vadd.f32 1.0, %v1516_v7 }
 0x270   :  { %v1520_v15 = vpop.eup %1519  ;;  %v649_v16 = vadd.f32 1.0, %v1518_v9 }
 0x271   :  { %v1522_v17 = vpop.eup %1521  ;;  %v652_v20 = vadd.f32 1.0, %v1520_v15  ;;  %v656_v26 = vmul.f32 %v648_v11, %v600_v18 }
 0x272   :  { %1134 = vmatpush1.bf16.msra.mxu0 %v1497_v8  ;;  %v653_v25 = vadd.f32 1.0, %v1522_v17  ;;  %v657_v29 = vmul.f32 %v649_v16, %v601_v22 }
 0x273   :  { %1135 = vmatprep.subr.bf16.mxu0 %v1502_v10  ;;  %v660_v28 = vmul.f32 %v652_v20, %v604_v19 }
 0x274   :  { %v661_v30 = vmul.f32 %v653_v25, %v605_v23 }
 0x275   :  { %v664_v31 = vpack.c.bf16 %v660_v28, %v656_v26 }
 0x276   :  { %1136 = vmatpush1.bf16.msra.mxu0 %v1500_v21  ;;  %v665_v32 = vpack.c.bf16 %v661_v30, %v657_v29 }
 0x278   :  { %1137 = vmatprep.mubr.bf16.mxu0 %v665_v32 }
 0x279   :  { %1138 = vmatmul.mubr.bf16.vlgmr.msra.gmra.mrb[0].mxu0 %v664_v31 }
 0x34c   :  { %v1139_v37 = vpop.f32.mrb[0].mxu0 }
 0x34d   :  { %v1300_v38 = vadd.f32 %v1139_v37, %v735_v36  ;;  %v1141_v27 = vpop.f32.mrb[1].mxu0 }
 0x34e   :  { %v1301_v39 = vadd.f32 %v1141_v27, %v739_v12  ;;  %v1143_v34 = vpop.f32.mrb[2].mxu0 }
 0x34f   :  { %v1148_v40 = vadd.f32 %v1523_v33, %v1300_v38  ;;  %v1302_v41 = vadd.f32 %v1143_v34, %v735_v36  ;;  %v1145_v24 = vpop.f32.mrb[3].mxu0 }
 0x350   :  { %v1149_v42 = vadd.f32 %v1524_v13, %v1301_v39  ;;  %v1303_v14 = vadd.f32 %v1145_v24, %v739_v12 }
 0x351   :  { %1152 = vst [vmem:[#allocation2] sm:$0xff] %v1148_v40  ;;  %v1150_v44 = vadd.f32 %v1525_v43, %v1302_v41 }
 0x352   :  { %1153 = vst [vmem:[#allocation2 + $0x8] sm:$0xff] %v1149_v42  ;;  %v1151_v46 = vadd.f32 %v1526_v45, %v1303_v14 }
 0x353   :  { %1154 = vst [vmem:[#allocation2 + $0x10] sm:$0xff] %v1150_v44 }
 0x354   :  { %1155 = vst [vmem:[#allocation2 + $0x18] sm:$0xff] %v1151_v46 }
 0x355   :  { %1538 = shalt.err (!%p1535_p4)
}
 0x356   :  { %s1539_s10 = scalar_lea.hbm %s2088_s7, 512 }
 0x357   :  { %p1540_p5 = scmp.ne.s32.totalorder %s2088_s7, %s1539_s10  ;;  %p1543_p6 = scmp.lt.u32.totalorder %s1539_s10, %s2088_s7 }
 0x359   :  { %p1545_p7 = pnand %p1543_p6, %p1540_p5 }
 0x35b   :  { %1548 = shalt.err (!%p1545_p7)
}
 0x35c   :  { %s1552_s13 = smov 256   ;;  %s1553_s14 = smov 16  }
 0x35d   :  { %1167 = dma.vmem_to_hbm [thread:$0]  %s1162_s22, 512, %s2088_s7, [#allocation3], %s1552_s13, %s1552_s13, %s1553_s14  }
 0x35e   :  { %1549 = dma.done.wait [#allocation3], 512  }
 0x35f   :  { %1550 = vsyncadd [#allocation3], 4294966784 }
 0x360   :  { %1171 = vsyncpa [#allocation3], 1 }

// kernel: transformer_decoder_layer.3
= control target key start
LH: loop header
LB: loop body
LE: loop exit
PB: predicated region body
PF: predicated region fallthrough
CT: control target
= control target key end

     0   :  { %s3610_s0 = inlined_call_operand.vmem [shape: f32[2,8,256], index: 0, kind: input, shape index: {}, may-alias: {0,1}]   ;;  %s3611_s1 = inlined_call_operand.vmem [shape: f32[2,8,256], index: 1, kind: input, shape index: {}, may-alias: {0,1}]   ;;  %s3612_s2 = inlined_call_operand.vmem [shape: s32[2,1,8], index: 2, kind: input, shape index: {}]   ;;  %s3613_s3 = inlined_call_operand.vmem [shape: f32[1,256], index: 3, kind: input, shape index: {}]   ;;  %s3614_s4 = inlined_call_operand.vmem [shape: f32[1,256], index: 4, kind: input, shape index: {}]   ;;  %s3615_s5 = inlined_call_operand.vmem [shape: bf16[256,256], index: 5, kind: input, shape index: {}]   ;;  %s3616_s6 = inlined_call_operand.vmem [shape: f32[1,256], index: 6, kind: input, shape index: {}]   ;;  %s3617_s7 = inlined_call_operand.vmem [shape: bf16[256,512], index: 7, kind: input, shape index: {}]   ;;  %s3618_s8 = inlined_call_operand.vmem [shape: f32[1,512], index: 8, kind: input, shape index: {}]   ;;  %s3619_s9 = inlined_call_operand.vmem [shape: bf16[256,256], index: 9, kind: input, shape index: {}]   ;;  %s3620_s10 = inlined_call_operand.vmem [shape: f32[1,256], index: 10, kind: input, shape index: {}]   ;;  %s3621_s11 = inlined_call_operand.vmem [shape: f32[2,8,256], index: 11, kind: output, shape index: {0}]   ;;  %s3622_s12 = inlined_call_operand.hbm [shape: f32[2,8,256], index: 12, kind: output, shape index: {1}]  }
   0x1   :  { %3627 = sst [smem:[#allocation12_spill]] %s3610_s0 }
   0x2   :  { %3628 = sst [smem:[#allocation13_spill]] %s3611_s1 }
   0x3   :  { %18 = vsyncpa [#allocation5], 0 }
   0x4   :  { %20 = vsyncpa [#allocation5 + $0x1], 0  ;;  %s2913_s21 = smov 0   ;;  %s2915_s22 = smov 0  }
   0x5   :  { %s2917_s23 = smov 0   ;;  %s2919_s24 = smov 0  }
   0x6   :  { %s2921_s25 = smov 0   ;;  %s2923_s26 = smov 0  }
   0x7 LB: > { %3629 = sst [smem:[#allocation7_spill]] %s2829_s23  ;;  %s2251_s27 = sadd.s32 4294967295, %s2841_s26   ;;  %s2841_s26 = sphi %s2923_s26, %s26_s26   ;;  %s2837_s25 = sphi %s2921_s25, %s3642_s25   ;;  %s2833_s24 = sphi %s2919_s24, %s3641_s24   ;;  %s2829_s23 = sphi %s2917_s23, %s3640_s23   ;;  %s2825_s22 = sphi %s2915_s22, %s3644_s22   ;;  %s2821_s21 = sphi %s2913_s21, %s3643_s21  }
   0x8   : > { %3630 = sst [smem:[#allocation8_spill]] %s2837_s25  ;;  %s2252_s28 = sadd.s32 4294967294, %s2841_s26  }
   0x9   : > { %s38_s29 = sadd.s32 1, %s2837_s25  ;;  %s323_s30 = sadd.s32 1, %s2829_s23 }
   0xa   : > { %p40_p0 = scmp.ge.s32.totalorder %s38_s29, 2  ;;  %p333_p1 = scmp.ne.s32.totalorder %s2829_s23, %s2825_s22 }
   0xb   : > { %p334_p2 = scmp.eq.s32.totalorder %s2251_s27, 1  ;;  %p339_p3 = scmp.ne.s32.totalorder %s2825_s22, %s2821_s21 }
   0xc   : > { %s3646_s29 = smov (%p40_p0, %s38_s29), 0  ;;  %p340_p5 = scmp.eq.s32.totalorder %s2252_s28, 1 }
   0xd   : > { %3631 = sst [smem:[#allocation9_spill]] %s3646_s29  ;;  %p2953_p4 = por %p334_p2, %p333_p1 }
   0xe   : > { %s318_s14 = ssub.s32 %s2837_s25, %s3646_s29  ;;  %p2255_p6 = scmp.ge.s32.totalorder %s2841_s26, 1 }
   0xf   : > { %p321_p7 = scmp.eq.s32.totalorder %s318_s14, 0  ;;  %p2960_p8 = por %p340_p5, %p339_p3 }
  0x10   : > { %p408_p9 = scmp.lt.s32.totalorder %s2841_s26, 3 }
  0x11   : > { %s3633_s15 = scalar_select %p2960_p8, 1, 0 }
  0x12   : > { %s2966_s16 = scalar_select %p321_p7, %s2829_s23, %s323_s30  }
  0x13   : > { %3634 = sst [smem:[#allocation10_spill]] %s3633_s15  ;;  %p409_p10 = pnand %p2255_p6, %p408_p9 }
  0x14   : > { %3635 = sst [smem:[#allocation11_spill]] %s2966_s16  ;;  %p471_p11 = scmp.lt.s32.totalorder (!%p409_p10), %s2833_s24, 1  ;;  %v2549_v6 = vld [vmem:[%s3617_s7 + $0x4] ss:$16 sps:$4 sm:$0xff] (!%p409_p10)   ;;  %v2551_v7 = vld [vmem:[%s3617_s7] ss:$16 sps:$4 sm:$0xff] (!%p409_p10)  }
  0x15   : > { %412 = sbr.rel (%p409_p10) target bundleno = 3326 (0xcfe), region = 64  ;;  %s3636_s1 = sld [smem:[#allocation13_spill]] (!%p409_p10)  ;;  %v2552_v8 = vld [vmem:[%s3617_s7 + $0xc] ss:$16 sps:$4 sm:$0xff] (!%p409_p10)   ;;  %v2554_v9 = vld [vmem:[%s3617_s7 + $0x8] ss:$16 sps:$4 sm:$0xff] (!%p409_p10)   ;;  %957 = vmatprep.subr.bf16.mxu0 (!%p409_p10), %v2549_v6 }
  0x16   : > { %s3637_s0 = sld [smem:[#allocation12_spill]] (!%p409_p10)  ;;  %v2555_v10 = vld [vmem:[%s3617_s7 + $0x24] ss:$16 sps:$4 sm:$0xff] (!%p409_p10)   ;;  %998 = vmatprep.subr.bf16.mxu1 (!%p409_p10), %v2552_v8  ;;  %v2558_v11 = vld [vmem:[%s3617_s7 + $0x2c] ss:$16 sps:$4 sm:$0xff] (!%p409_p10)   ;;  %958 = vmatpush1.bf16.msra.mxu0 (!%p409_p10), %v2551_v7  ;;  %s468_s29 = sand.u32 (!%p409_p10), 1, %s2825_s22  }
  0x17   : > { %999 = vmatpush1.bf16.msra.mxu1 (!%p409_p10), %v2554_v9  ;;  %v2557_v12 = vld [vmem:[%s3617_s7 + $0x20] ss:$16 sps:$4 sm:$0xff] (!%p409_p10)   ;;  %v2560_v13 = vld [vmem:[%s3617_s7 + $0x28] ss:$16 sps:$4 sm:$0xff] (!%p409_p10)   ;;  %959 = vmatprep.subr.bf16.mxu0 (!%p409_p10), %v2555_v10  ;;  %v2561_v14 = vld [vmem:[%s3617_s7 + $0x44] ss:$16 sps:$4 sm:$0xff] (!%p409_p10)  }
  0x18   : > { %1000 = vmatprep.subr.bf16.mxu1 (!%p409_p10), %v2558_v11  ;;  %v2564_v15 = vld [vmem:[%s3617_s7 + $0x4c] ss:$16 sps:$4 sm:$0xff] (!%p409_p10)   ;;  %v2563_v16 = vld [vmem:[%s3617_s7 + $0x40] ss:$16 sps:$4 sm:$0xff] (!%p409_p10)   ;;  %v2566_v17 = vld [vmem:[%s3617_s7 + $0x48] ss:$16 sps:$4 sm:$0xff] (!%p409_p10)  }
  0x19   : > { %v2567_v18 = vld [vmem:[%s3617_s7 + $0x64] ss:$16 sps:$4 sm:$0xff] (!%p409_p10)   ;;  %v2570_v19 = vld [vmem:[%s3617_s7 + $0x6c] ss:$16 sps:$4 sm:$0xff] (!%p409_p10)   ;;  %v2569_v20 = vld [vmem:[%s3617_s7 + $0x60] ss:$16 sps:$4 sm:$0xff] (!%p409_p10)  }
  0x1a   : > { %960 = vmatpush1.bf16.msra.mxu0 (!%p409_p10), %v2557_v12  ;;  %v2572_v21 = vld [vmem:[%s3617_s7 + $0x68] ss:$16 sps:$4 sm:$0xff] (!%p409_p10)   ;;  %v2573_v22 = vld [vmem:[%s3617_s7 + $0x84] ss:$16 sps:$4 sm:$0xff] (!%p409_p10)   ;;  %v2576_v23 = vld [vmem:[%s3617_s7 + $0x8c] ss:$16 sps:$4 sm:$0xff] (!%p409_p10)  }
  0x1b   : > { %1001 = vmatpush1.bf16.msra.mxu1 (!%p409_p10), %v2560_v13  ;;  %961 = vmatprep.subr.bf16.mxu0 (!%p409_p10), %v2561_v14  ;;  %v2575_v24 = vld [vmem:[%s3617_s7 + $0x80] ss:$16 sps:$4 sm:$0xff] (!%p409_p10)   ;;  %v2578_v25 = vld [vmem:[%s3617_s7 + $0x88] ss:$16 sps:$4 sm:$0xff] (!%p409_p10)   ;;  %v2579_v26 = vld [vmem:[%s3617_s7 + $0xa4] ss:$16 sps:$4 sm:$0xff] (!%p409_p10)  }
  0x1c   : > { %s2970_s17 = scalar_select %p471_p11, %s2833_s24, 1  ;;  %1002 = vmatprep.subr.bf16.mxu1 %v2564_v15  ;;  %v2582_v27 = vld [vmem:[%s3617_s7 + $0xac] ss:$16 sps:$4 sm:$0xff]   ;;  %v2581_v28 = vld [vmem:[%s3617_s7 + $0xa0] ss:$16 sps:$4 sm:$0xff]   ;;  %vm2844_vm0 = vmmov 0  }
  0x1d   : > { %v2584_v29 = vld [vmem:[%s3617_s7 + $0xa8] ss:$16 sps:$4 sm:$0xff]   ;;  %v2585_v30 = vld [vmem:[%s3617_s7 + $0xc4] ss:$16 sps:$4 sm:$0xff]   ;;  %v2588_v31 = vld [vmem:[%s3617_s7 + $0xcc] ss:$16 sps:$4 sm:$0xff]  }
  0x1e   : > { %s2973_s18 = sshll.u32 %s2970_s17, 4  ;;  %962 = vmatpush1.bf16.msra.mxu0 %v2563_v16  ;;  %v2587_v32 = vld [vmem:[%s3617_s7 + $0xc0] ss:$16 sps:$4 sm:$0xff]   ;;  %v2590_v33 = vld [vmem:[%s3617_s7 + $0xc8] ss:$16 sps:$4 sm:$0xff]   ;;  %s2256_s16 = sshll.u32 %s468_s29, 4 }
  0x1f   : > { %s484_s27 = scalar_lea.vmem %s3636_s1, %s2973_s18  ;;  %s2983_s30 = scalar_lea.vmem %s3637_s0, %s2973_s18  ;;  %1003 = vmatpush1.bf16.msra.mxu1 %v2566_v17  ;;  %963 = vmatprep.subr.bf16.mxu0 %v2567_v18  ;;  %v2591_v34 = vld [vmem:[%s3617_s7 + $0xe4] ss:$16 sps:$4 sm:$0xff]   ;;  %v2594_v35 = vld [vmem:[%s3617_s7 + $0xec] ss:$16 sps:$4 sm:$0xff]   ;;  %v2593_v36 = vld [vmem:[%s3617_s7 + $0xe0] ss:$16 sps:$4 sm:$0xff]  }
  0x20   : > { %v2985_v0 = vld [vmem:[%s484_s27] sm:$0xff]  ;;  %v2987_v1 = vld [vmem:[%s484_s27 + $0x8] sm:$0xff]  ;;  %1004 = vmatprep.subr.bf16.mxu1 %v2570_v19  ;;  %s3251_s0 = scalar_lea.vmem [#allocation4], %s2256_s16  ;;  %vm1371_vm1 = vcmask 523264   ;;  %vm1435_vm2 = vcmask 1043456   ;;  %s487_s25 = scalar_lea.vmem %s3612_s2, %s2970_s17  ;;  %vm1419_vm5 = vcmask 64512  }
  0x21   : > { %v2990_v2 = vld [vmem:[%s2983_s30] sm:$0xff]  ;;  %v506_v3 = vadd.f32 %v2987_v1, %v2985_v0  ;;  %v2995_v4 = vld [vmem:[%s2983_s30 + $0x8] sm:$0xff]  ;;  %s2846_s17 = smov 64   ;;  %s2416_s20 = sshll.u32 %s2833_s24, 8 }
  0x22   : > { %v1059_v5 = vadd.f32 %v2995_v4, %v2990_v2  ;;  %964 = vmatpush1.bf16.msra.mxu0 %v2569_v20  ;;  %v2596_v37 = vld [vmem:[%s3617_s7 + $0xe8] ss:$16 sps:$4 sm:$0xff]   ;;  %v2597_v38 = vld [vmem:[%s3617_s7 + $0x104] ss:$16 sps:$4 sm:$0xff]   ;;  %v2600_v39 = vld [vmem:[%s3617_s7 + $0x10c] ss:$16 sps:$4 sm:$0xff]  }
  0x23   : > { %507 = vadd.xlane.f32.xlu0 %v506_v3  ;;  %1005 = vmatpush1.bf16.msra.mxu1 %v2572_v21  ;;  %v2599_v40 = vld [vmem:[%s3617_s7 + $0x100] ss:$16 sps:$4 sm:$0xff]   ;;  %v2602_v41 = vld [vmem:[%s3617_s7 + $0x108] ss:$16 sps:$4 sm:$0xff]   ;;  %v2603_v42 = vld [vmem:[%s3617_s7 + $0x124] ss:$16 sps:$4 sm:$0xff]  }
  0x24   : > { %965 = vmatprep.subr.bf16.mxu0 %v2573_v22  ;;  %1006 = vmatprep.subr.bf16.mxu1 %v2576_v23  ;;  %v2606_v43 = vld [vmem:[%s3617_s7 + $0x12c] ss:$16 sps:$4 sm:$0xff]   ;;  %v2605_v44 = vld [vmem:[%s3617_s7 + $0x120] ss:$16 sps:$4 sm:$0xff]   ;;  %v2608_v45 = vld [vmem:[%s3617_s7 + $0x128] ss:$16 sps:$4 sm:$0xff]   ;;  %v524_v23 = vlaneseq }
  0x25   : > { %v2609_v46 = vld [vmem:[%s3617_s7 + $0x144] ss:$16 sps:$4 sm:$0xff]   ;;  %v2611_v61 = vld [vmem:[%s3617_s7 + $0x140] ss:$16 sps:$4 sm:$0xff]   ;;  %v2612_v62 = vld [vmem:[%s3617_s7 + $0x14c] ss:$16 sps:$4 sm:$0xff]  }
  0x26   : > { %966 = vmatpush1.bf16.msra.mxu0 %v2575_v24  ;;  %v2614_v63 = vld [vmem:[%s3617_s7 + $0x148] ss:$16 sps:$4 sm:$0xff]   ;;  %v2624_v6 = vld [vmem:[%s3617_s7 + $0x18c] ss:$16 sps:$4 sm:$0xff]   ;;  %v2627_v8 = vld [vmem:[%s3617_s7 + $0x1a4] ss:$16 sps:$4 sm:$0xff]  }
  0x27   : > { %1060 = vadd.xlane.f32.xlu0 %v1059_v5  ;;  %1007 = vmatpush1.bf16.msra.mxu1 %v2578_v25  ;;  %v2620_v3 = vld [vmem:[%s3617_s7 + $0x168] ss:$16 sps:$4 sm:$0xff]   ;;  %v2623_v5 = vld [vmem:[%s3617_s7 + $0x180] ss:$16 sps:$4 sm:$0xff]   ;;  %v2630_v10 = vld [vmem:[%s3617_s7 + $0x1ac] ss:$16 sps:$4 sm:$0xff]  }
  0x28   : > { %967 = vmatprep.subr.bf16.mxu0 %v2579_v26  ;;  %1008 = vmatprep.subr.bf16.mxu1 %v2582_v27  ;;  %v2626_v7 = vld [vmem:[%s3617_s7 + $0x188] ss:$16 sps:$4 sm:$0xff]   ;;  %v2629_v9 = vld [vmem:[%s3617_s7 + $0x1a0] ss:$16 sps:$4 sm:$0xff]   ;;  %v2633_v12 = vld [vmem:[%s3617_s7 + $0x1c4] ss:$16 sps:$4 sm:$0xff]  }
  0x29   : > { %v2632_v11 = vld [vmem:[%s3617_s7 + $0x1a8] ss:$16 sps:$4 sm:$0xff]   ;;  %v2636_v13 = vld [vmem:[%s3617_s7 + $0x1cc] ss:$16 sps:$4 sm:$0xff]   ;;  %v2635_v14 = vld [vmem:[%s3617_s7 + $0x1c0] ss:$16 sps:$4 sm:$0xff]  }
  0x2a   : > { %968 = vmatpush1.bf16.msra.mxu0 %v2581_v28  ;;  %v2638_v15 = vld [vmem:[%s3617_s7 + $0x1c8] ss:$16 sps:$4 sm:$0xff]   ;;  %v2639_v16 = vld [vmem:[%s3617_s7 + $0x1e4] ss:$16 sps:$4 sm:$0xff]   ;;  %v2642_v17 = vld [vmem:[%s3617_s7 + $0x1ec] ss:$16 sps:$4 sm:$0xff]  }
  0x2b   : > { %1009 = vmatpush1.bf16.msra.mxu1 %v2584_v29  ;;  %969 = vmatprep.subr.bf16.mxu0 %v2585_v30  ;;  %v2641_v18 = vld [vmem:[%s3617_s7 + $0x1e0] ss:$16 sps:$4 sm:$0xff]   ;;  %v2644_v19 = vld [vmem:[%s3617_s7 + $0x1e8] ss:$16 sps:$4 sm:$0xff]   ;;  %v2647_v20 = vld [vmem:[%s3615_s5 + $0x4] ss:$8 sps:$4 sm:$0xff]  }
  0x2c   : > { %1010 = vmatprep.subr.bf16.mxu1 %v2588_v31  ;;  %v3215_v27 = vshrl.u32 %v524_v23, 7  ;;  %v498_v31 = vld [vmem:[%s3613_s3] sm:$0x3]  ;;  %s2110_s28 = sshll.u32 %s3251_s0, 4  ;;  %s2091_s1 = scalar_lea.sflag [#allocation5], %s468_s29  ;;  %s2111_s28 = int_to_ptr.vmem [resolvable:$true] %s2110_s28 }
  0x2d   : > { %s2847_s23 = smov [#allocation4]  }
  0x2e   : > { %970 = vmatpush1.bf16.msra.mxu0 %v2587_v32  ;;  %v3218_v29 = vsub.s32 0, %v3215_v27  ;;  %v3221_v30 = vsub.s32 1, %v3215_v27  ;;  %v499_v32 = vld [vmem:[%s3614_s4] sm:$0x3]  ;;  %s2767_s15 = sshll.u32 %s2847_s23, 4  ;;  %s2768_s15 = int_to_ptr.vmem [resolvable:$false] %s2767_s15 }
  0x2f   : > { %1011 = vmatpush1.bf16.msra.mxu1 %v2590_v33  ;;  %971 = vmatprep.subr.bf16.mxu0 %v2591_v34  ;;  %s2769_s16 = scalar_lea.vmem %s2768_s15, 512  ;;  %p2770_p1 = scmp.lt.s32.totalorder %s2111_s28, %s2768_s15 }
  0x30   : > { %1012 = vmatprep.subr.bf16.mxu1 %v2594_v35  ;;  %v527_v33 = vrot.slane %v498_v31, %v3218_v29  ;;  %v531_v34 = vrot.slane %v498_v31, %v3221_v30 }
  0x32   : > { %972 = vmatpush1.bf16.msra.mxu0 %v2593_v36 }
  0x33   : > { %1013 = vmatpush1.bf16.msra.mxu1 %v2596_v37  ;;  %973 = vmatprep.subr.bf16.mxu0 %v2597_v38  ;;  %v540_v37 = vrot.slane %v499_v32, %v3218_v29  ;;  %v544_v38 = vrot.slane %v499_v32, %v3221_v30 }
  0x34   : > { %1014 = vmatprep.subr.bf16.mxu1 %v2600_v39 }
  0x36   : > { %974 = vmatpush1.bf16.msra.mxu0 %v2599_v40 }
  0x37   : > { %1015 = vmatpush1.bf16.msra.mxu1 %v2602_v41  ;;  %975 = vmatprep.subr.bf16.mxu0 %v2603_v42 }
  0x38   : > { %1016 = vmatprep.subr.bf16.mxu1 %v2606_v43 }
  0x3a   : > { %976 = vmatpush1.bf16.msra.mxu0 %v2605_v44 }
  0x3b   : > { %1017 = vmatpush1.bf16.msra.mxu1 %v2608_v45  ;;  %977 = vmatprep.subr.bf16.mxu0 %v2609_v46 }
  0x3c   : > { %1018 = vmatprep.subr.bf16.mxu1 %v2612_v62  ;;  %v2657_v62 = vld [vmem:[%s3615_s5 + $0x40] ss:$8 sps:$4 sm:$0xff]  }
  0x3e   : > { %978 = vmatpush1.bf16.msra.mxu0 %v2611_v61  ;;  %v2659_v61 = vld [vmem:[%s3615_s5 + $0x44] ss:$8 sps:$4 sm:$0xff]  }
  0x3f   : > { %1019 = vmatpush1.bf16.msra.mxu1 %v2614_v63  ;;  %v2662_v63 = vld [vmem:[%s3615_s5 + $0x54] ss:$8 sps:$4 sm:$0xff]  }
  0xb0   : > { %v508_v47 = vpop.xlane.xlu0 %507 }
  0xb1   : > { %v510_v48 = vmul.f32 0.00390625, %v508_v47 }
  0xb3   : > { %v3123_v49 = vsub.f32 %v2985_v0, %v510_v48  ;;  %v3126_v50 = vsub.f32 %v2987_v1, %v510_v48  ;;  %v2615_v0 = vld [vmem:[%s3617_s7 + $0x164] ss:$16 sps:$4 sm:$0xff]   ;;  %v2617_v1 = vld [vmem:[%s3617_s7 + $0x160] ss:$16 sps:$4 sm:$0xff]  }
  0xb4   : > { %v1061_v51 = vpop.xlane.xlu0 %1060  ;;  %979 = vmatprep.subr.bf16.mxu0 %v2615_v0  ;;  %v2660_v0 = vld [vmem:[%s3615_s5 + $0x50] ss:$8 sps:$4 sm:$0xff]  }
  0xb5   : > { %v1063_v52 = vmul.f32 0.00390625, %v1061_v51  ;;  %v513_v53 = vmul.f32 %v3123_v49, %v3123_v49  ;;  %v514_v54 = vmul.f32 %v3126_v50, %v3126_v50  ;;  %980 = vmatpush1.bf16.msra.mxu0 %v2617_v1  ;;  %v2665_v1 = vld [vmem:[%s3615_s5 + $0x64] ss:$8 sps:$4 sm:$0xff]  }
  0xb7   : > { %v3133_v55 = vsub.f32 %v2990_v2, %v1063_v52  ;;  %v3136_v56 = vsub.f32 %v2995_v4, %v1063_v52  ;;  %v515_v57 = vadd.f32 %v514_v54, %v513_v53  ;;  %v2618_v2 = vld [vmem:[%s3617_s7 + $0x16c] ss:$16 sps:$4 sm:$0xff]   ;;  %v2621_v4 = vld [vmem:[%s3617_s7 + $0x184] ss:$16 sps:$4 sm:$0xff]  }
  0xb8   : > { %1020 = vmatprep.subr.bf16.mxu1 %v2618_v2  ;;  %981 = vmatprep.subr.bf16.mxu0 %v2621_v4  ;;  %v2650_v52 = vld [vmem:[%s3615_s5 + $0x14] ss:$8 sps:$4 sm:$0xff]   ;;  %v2663_v2 = vld [vmem:[%s3615_s5 + $0x60] ss:$8 sps:$4 sm:$0xff]   ;;  %v2666_v4 = vld [vmem:[%s3615_s5 + $0x70] ss:$8 sps:$4 sm:$0xff]  }
  0xb9   : > { %516 = vadd.xlane.f32.xlu1 %v515_v57  ;;  %v1066_v58 = vmul.f32 %v3133_v55, %v3133_v55  ;;  %v1067_v59 = vmul.f32 %v3136_v56, %v3136_v56  ;;  %1021 = vmatpush1.bf16.msra.mxu1 %v2620_v3  ;;  %v2653_v57 = vld [vmem:[%s3615_s5 + $0x24] ss:$8 sps:$4 sm:$0xff]   ;;  %v2668_v3 = vld [vmem:[%s3615_s5 + $0x74] ss:$8 sps:$4 sm:$0xff]  }
  0xba   : > { %982 = vmatpush1.bf16.msra.mxu0 %v2623_v5  ;;  %1022 = vmatprep.subr.bf16.mxu1 %v2624_v6  ;;  %v2671_v5 = vld [vmem:[%s3615_s5 + $0x84] ss:$8 sps:$4 sm:$0xff]   ;;  %v2669_v6 = vld [vmem:[%s3615_s5 + $0x80] ss:$8 sps:$4 sm:$0xff]  }
  0xbb   : > { %v1068_v60 = vadd.f32 %v1067_v59, %v1066_v58  ;;  %983 = vmatprep.subr.bf16.mxu0 %v2627_v8  ;;  %v2651_v58 = vld [vmem:[%s3615_s5 + $0x20] ss:$8 sps:$4 sm:$0xff]   ;;  %v2656_v59 = vld [vmem:[%s3615_s5 + $0x34] ss:$8 sps:$4 sm:$0xff]   ;;  %v2672_v8 = vld [vmem:[%s3615_s5 + $0x90] ss:$8 sps:$4 sm:$0xff]  }
  0xbd   : > { %1069 = vadd.xlane.f32.xlu1 %v1068_v60  ;;  %1023 = vmatpush1.bf16.msra.mxu1 %v2626_v7  ;;  %v2654_v60 = vld [vmem:[%s3615_s5 + $0x30] ss:$8 sps:$4 sm:$0xff]   ;;  %v2674_v7 = vld [vmem:[%s3615_s5 + $0x94] ss:$8 sps:$4 sm:$0xff]  }
  0xbe   : > { %1024 = vmatprep.subr.bf16.mxu1 %v2630_v10  ;;  %984 = vmatpush1.bf16.msra.mxu0 %v2629_v9  ;;  %v2677_v9 = vld [vmem:[%s3615_s5 + $0xa4] ss:$8 sps:$4 sm:$0xff]   ;;  %v2675_v10 = vld [vmem:[%s3615_s5 + $0xa0] ss:$8 sps:$4 sm:$0xff]  }
  0xbf   : > { %985 = vmatprep.subr.bf16.mxu0 %v2633_v12  ;;  %v2678_v12 = vld [vmem:[%s3615_s5 + $0xb0] ss:$8 sps:$4 sm:$0xff]  }
  0xc1   : > { %1025 = vmatpush1.bf16.msra.mxu1 %v2632_v11  ;;  %v2680_v11 = vld [vmem:[%s3615_s5 + $0xb4] ss:$8 sps:$4 sm:$0xff]  }
  0xc2   : > { %1026 = vmatprep.subr.bf16.mxu1 %v2636_v13  ;;  %986 = vmatpush1.bf16.msra.mxu0 %v2635_v14  ;;  %v2683_v13 = vld [vmem:[%s3615_s5 + $0xc4] ss:$8 sps:$4 sm:$0xff]   ;;  %v2681_v14 = vld [vmem:[%s3615_s5 + $0xc0] ss:$8 sps:$4 sm:$0xff]  }
  0xc3   : > { %987 = vmatprep.subr.bf16.mxu0 %v2639_v16  ;;  %v2684_v16 = vld [vmem:[%s3615_s5 + $0xd0] ss:$8 sps:$4 sm:$0xff]  }
  0xc5   : > { %1027 = vmatpush1.bf16.msra.mxu1 %v2638_v15  ;;  %v2686_v15 = vld [vmem:[%s3615_s5 + $0xd4] ss:$8 sps:$4 sm:$0xff]  }
  0xc6   : > { %1028 = vmatprep.subr.bf16.mxu1 %v2642_v17  ;;  %988 = vmatpush1.bf16.msra.mxu0 %v2641_v18  ;;  %v2689_v17 = vld [vmem:[%s3615_s5 + $0xe4] ss:$8 sps:$4 sm:$0xff]   ;;  %v2687_v18 = vld [vmem:[%s3615_s5 + $0xe0] ss:$8 sps:$4 sm:$0xff]  }
  0xc7   : > { %1308 = vmatprep.subr.bf16.mxu0 %v2647_v20  ;;  %v2690_v20 = vld [vmem:[%s3615_s5 + $0xf0] ss:$8 sps:$4 sm:$0xff]  }
  0xc9   : > { %1029 = vmatpush1.bf16.msra.mxu1 %v2644_v19  ;;  %v2692_v19 = vld [vmem:[%s3615_s5 + $0xf4] ss:$8 sps:$4 sm:$0xff]  }
 0x146   : > { %v517_v21 = vpop.xlane.xlu1 %516 }
 0x147   : > { %v518_v22 = vmul.f32 0.00390625, %v517_v21 }
 0x149   : > { %v519_v24 = vadd.f32 1e-06, %v518_v22  ;;  %v2843_v22 = vmov 0.0  }
 0x14a   : > { %v1070_v25 = vpop.xlane.xlu1 %1069  ;;  %2437 = vmatprep.subr.bf16.mxu1 %v2843_v22 }
 0x14b   : > { %2741 = vrsqrt.f32 %v519_v24  ;;  %v1071_v26 = vmul.f32 0.00390625, %v1070_v25  ;;  %v627_v24 = vsub.s32 2, %v3215_v27  ;;  %v615_v25 = vld [vmem:[%s3618_s8] sm:$0xf] }
 0x14c   : > { %v624_v32 = vrot.slane %v615_v25, %v3221_v30 }
 0x14d   : > { %v1072_v28 = vadd.f32 1e-06, %v1071_v26  ;;  %v631_v26 = vsub.s32 3, %v3215_v27  ;;  %v628_v31 = vrot.slane %v615_v25, %v627_v24 }
 0x14f   : > { %2743 = vrsqrt.f32 %v1072_v28  ;;  %v620_v28 = vrot.slane %v615_v25, %v3218_v29 }
 0x155   : > { %v2742_v35 = vpop.eup %2741 }
 0x156   : > { %v522_v36 = vmul.f32 %v2742_v35, %v3126_v50  ;;  %v521_v39 = vmul.f32 %v2742_v35, %v3123_v49  ;;  %v2645_v50 = vld [vmem:[%s3615_s5] ss:$8 sps:$4 sm:$0xff]  }
 0x158   : > { %v535_v40 = vmul.f32 %v531_v34, %v522_v36  ;;  %v534_v41 = vmul.f32 %v527_v33, %v521_v39 }
 0x159   : > { %v2744_v42 = vpop.eup %2743 }
 0x15a   : > { %v548_v43 = vadd.f32 %v544_v38, %v535_v40  ;;  %v1074_v44 = vmul.f32 %v2744_v42, %v3133_v55  ;;  %v547_v45 = vadd.f32 %v540_v37, %v534_v41  ;;  %v1075_v46 = vmul.f32 %v2744_v42, %v3136_v56  ;;  %v2648_v55 = vld [vmem:[%s3615_s5 + $0x10] ss:$8 sps:$4 sm:$0xff]  }
 0x15c   : > { %v550_v47 = vpack.c.bf16 %v548_v43, %v548_v43  ;;  %v1087_v48 = vmul.f32 %v1074_v44, %v527_v33  ;;  %v549_v51 = vpack.c.bf16 %v547_v45, %v547_v45  ;;  %v1088_v49 = vmul.f32 %v1075_v46, %v531_v34 }
 0x15d   : > { %v632_v33 = vrot.slane %v615_v25, %v631_v26 }
 0x15e   : > { %989 = vmatprep.mubr.bf16.mxu0 %v550_v47  ;;  %v3246_v53 = vadd.f32 %v1087_v48, %v540_v37  ;;  %1030 = vmatprep.mubr.bf16.mxu1 %v550_v47  ;;  %v1101_v54 = vadd.f32 %v1088_v49, %v544_v38 }
 0x15f   : > { %990 = vmatmul.mubr.bf16.vlgmr.msra.gmra.mrb[0].mxu0 %v549_v51  ;;  %1031 = vmatmul.mubr.bf16.vlgmr.msra.gmra.mrb[0].mxu1 %v549_v51 }
 0x160   : > { %1309 = vmatpush1.bf16.msra.mxu0 %v2645_v50  ;;  %v1103_v56 = vpack.c.bf16 %v1101_v54, %v1101_v54  ;;  %2079 = vst [vmem:[%s3251_s0] sm:$0xff] %v3246_v53  ;;  %2080 = vst [vmem:[%s3251_s0 + $0x8] sm:$0xff] %v1101_v54  ;;  %v1102_v21 = vpack.c.bf16 %v3246_v53, %v3246_v53  ;;  %2439 = vmatprep.mubr.msk.bf16.mxu1 %vm2844_vm0, %v2843_v22  ;;  %v1136_v50 = vld [vmem:[%s3616_s6] sm:$0x3] }
 0x161   : > { %1310 = vmatprep.subr.bf16.mxu0 %v2650_v52  ;;  %v1141_v51 = vrot.slane %v1136_v50, %v3218_v29  ;;  %v1145_v49 = vrot.slane %v1136_v50, %v3221_v30 }
 0x162   : > { %1340 = vmatprep.mubr.bf16.mxu0 %v1103_v56 }
 0x164   : > { %1311 = vmatpush1.bf16.msra.mxu0 %v2648_v55 }
 0x165   : > { %1312 = vmatprep.subr.bf16.mxu0 %v2653_v57 }
 0x168   : > { %1313 = vmatpush1.bf16.msra.mxu0 %v2651_v58 }
 0x169   : > { %1314 = vmatprep.subr.bf16.mxu0 %v2656_v59 }
 0x16c   : > { %1315 = vmatpush1.bf16.msra.mxu0 %v2654_v60 }
 0x16d   : > { %1316 = vmatprep.subr.bf16.mxu0 %v2659_v61  ;;  %v1360_v61 = vand.u32 127, %v524_v23 }
 0x16f   : > { %vm1361_vm3 = vcmp.gt.s32.totalorder %v1360_v61, %v3215_v27 }
 0x170   : > { %1317 = vmatpush1.bf16.msra.mxu0 %v2657_v62  ;;  %v2361_v62 = vld [vmem:[%s487_s25] ss:$0 sm:$0xff]  ;;  %s2763_s25 = scalar_lea.vmem %s2111_s28, 256 }
 0x171   : > { %1318 = vmatprep.subr.bf16.mxu0 %v2662_v63  ;;  %v2845_v63 = vmov 0   ;;  %p2764_p12 = scmp.ne.s32.totalorder %s2111_s28, %s2763_s25  ;;  %p2771_p2 = scmp.lt.s32.totalorder %s2769_s16, %s2763_s25 }
 0x173   : > { %p2765_p13 = pnand %p2764_p12, %p2953_p4  ;;  %p2772_p3 = por %p2771_p2, %p2770_p1 }
 0x174   : > { %1319 = vmatpush1.bf16.msra.mxu0 %v2660_v0  ;;  %v1362_v0 = vsel %vm1361_vm3, 1, %v2845_v63 }
 0x175   : > { %1320 = vmatprep.subr.bf16.mxu0 %v2665_v1  ;;  %v3381_v1 = vadd.s32 %v2361_v62, %v1362_v0  ;;  %p2766_p0 = pneg %p2765_p13 }
 0x177   : > { %vm1368_vm4 = vcmp.gt.s32.totalorder %v3381_v1, 0  ;;  %p2773_p5 = pnand %p2772_p3, %p2766_p0 }
 0x178   : > { %1321 = vmatpush1.bf16.msra.mxu0 %v2663_v2 }
 0x179   : > { %1322 = vmatprep.subr.bf16.mxu0 %v2668_v3 }
 0x17c   : > { %1323 = vmatpush1.bf16.msra.mxu0 %v2666_v4 }
 0x17d   : > { %1324 = vmatprep.subr.bf16.mxu0 %v2671_v5 }
 0x180   : > { %1325 = vmatpush1.bf16.msra.mxu0 %v2669_v6 }
 0x181   : > { %1326 = vmatprep.subr.bf16.mxu0 %v2674_v7 }
 0x184   : > { %1327 = vmatpush1.bf16.msra.mxu0 %v2672_v8 }
 0x185   : > { %1328 = vmatprep.subr.bf16.mxu0 %v2677_v9 }
 0x188   : > { %1329 = vmatpush1.bf16.msra.mxu0 %v2675_v10 }
 0x189   : > { %1330 = vmatprep.subr.bf16.mxu0 %v2680_v11 }
 0x18c   : > { %1331 = vmatpush1.bf16.msra.mxu0 %v2678_v12 }
 0x18d   : > { %1332 = vmatprep.subr.bf16.mxu0 %v2683_v13 }
 0x190   : > { %1333 = vmatpush1.bf16.msra.mxu0 %v2681_v14 }
 0x191   : > { %1334 = vmatprep.subr.bf16.mxu0 %v2686_v15 }
 0x194   : > { %1335 = vmatpush1.bf16.msra.mxu0 %v2684_v16 }
 0x195   : > { %1336 = vmatprep.subr.bf16.mxu0 %v2689_v17 }
 0x198   : > { %1337 = vmatpush1.bf16.msra.mxu0 %v2687_v18 }
 0x199   : > { %1338 = vmatprep.subr.bf16.mxu0 %v2692_v19 }
 0x19c   : > { %1339 = vmatpush1.bf16.msra.mxu0 %v2690_v20 }
 0x19f   : > { %1341 = vmatmul.mubr.bf16.vlgmr.msra.gmra.mrb[4].mxu0 %v1102_v21 }
 0x232   : > { %v991_v34 = vpop.f32.mrb[0].mxu0  ;;  %v1032_v35 = vpop.f32.mrb[0].mxu1 }
 0x233   : > { %v992_v36 = vadd.f32 %v991_v34, %v620_v28  ;;  %v3352_v37 = vadd.f32 %v1032_v35, %v628_v31  ;;  %v993_v38 = vpop.f32.mrb[1].mxu0  ;;  %v1034_v39 = vpop.f32.mrb[1].mxu1 }
 0x234   : > { %v3354_v40 = vadd.f32 %v993_v38, %v624_v32  ;;  %v3356_v41 = vadd.f32 %v1034_v39, %v632_v33  ;;  %v995_v42 = vpop.f32.mrb[2].mxu0  ;;  %v1036_v43 = vpop.f32.mrb[2].mxu1 }
 0x235   : > { %v996_v44 = vpop.f32.mrb[3].mxu0  ;;  %v1037_v45 = vpop.f32.mrb[3].mxu1  ;;  %v2417_v7 = vpack.c.bf16 %v992_v36, %v992_v36  ;;  %v2418_v42 = vpack.c.bf16 %v3352_v37, %v3352_v37 }
 0x236   : > { %v2414_v46 = vpack.c.bf16 %v3354_v40, %v992_v36  ;;  %v2415_v47 = vpack.c.bf16 %v3356_v41, %v3352_v37  ;;  %v2419_v50 = vpack.c.bf16 %v3354_v40, %v3354_v40 }
 0x238   : > { %v1376_v48 = vsel %vm1371_vm1, %v2414_v46, 0  ;;  %v1437_v60 = vsel %vm1435_vm2, %v2415_v47, 0 }
 0x239   : > { %2438 = vmatpush3.bf16.xpose.msra.mxu1 %v1376_v48 }
 0x23a   : > { %2443 = vmatprep.subr.bf16.mxu1 %v2843_v22 }
 0x272   : > { %v1342_v52 = vpop.f32.mrb[4].mxu0 }
 0x273   : > { %v1343_v53 = vadd.f32 %v1342_v52, %v1141_v51  ;;  %v1344_v54 = vpop.f32.mrb[5].mxu0  ;;  %v2420_v52 = vpack.c.bf16 %v3356_v41, %v3356_v41 }
 0x274   : > { %v3368_v55 = vadd.f32 %v1344_v54, %v1145_v49  ;;  %v1346_v56 = vpop.f32.mrb[6].mxu0  ;;  %v1603_v49 = vsel %vm1371_vm1, %v2419_v50, 0 }
 0x275   : > { %v1349_v57 = vmul.f32 0.125, %v1343_v53  ;;  %v1347_v58 = vpop.f32.mrb[7].mxu0  ;;  %v1664_v53 = vsel %vm1435_vm2, %v2420_v52, 0 }
 0x276   : > { %v1350_v43 = vmul.f32 0.125, %v3368_v55 }
 0x277   : > { %v1351_v59 = vpack.c.bf16 %v1349_v57, %v1349_v57 }
 0x278   : > { %v1352_v44 = vpack.c.bf16 %v1350_v43, %v1350_v43  ;;  %v2704_v43 = vld [vmem:[%s3619_s9 + $0x34] ss:$8 sps:$4 sm:$0xff]  }
 0x279   : > { %2440 = vmatmul.mubr.msk.bf16.vlgmr.msra.gmra.mrb[4].mxu1 %vm1371_vm1, %v1351_v59 }
 0x27a   : > { %2444 = vmatpush3.bf16.msra.mxu1 %v1437_v60  ;;  %2445 = vmatprep.mubr.msk.bf16.mxu1 %vm2844_vm0, %v2843_v22 }
 0x27b   : > { %2449 = vmatprep.subr.bf16.mxu1 %v2843_v22 }
 0x34c   : > { %v1412_v2 = vpop.f32.mrb[4].mxu1 }
 0x34d   : > { %v1418_v3 = vsel %vm1368_vm4, -1e+18, %v1412_v2  ;;  %v2441_v4 = vpop.f32.mrb[5].mxu1 }
 0x34e   : > { %v1415_v23 = vpop.f32.mrb[6].mxu1  ;;  %v1420_v5 = vsel %vm1419_vm5, %v1418_v3, -inf }
 0x34f   : > { %1421 = vmax.xlane.f32.xlu0 %v1420_v5  ;;  %v2442_v6 = vpop.f32.mrb[7].mxu1 }
 0x365   : > { %1485 = vrot.lane.b32.xlu0 %v2417_v7, %s2846_s17 }
 0x3dc   : > { %v1422_v27 = vpop.xlane.xlu0 %1421 }
 0x3dd   : > { %v1423_v8 = vsub.f32 %v1418_v3, %v1422_v27 }
 0x3df   : > { %v1424_v9 = vmul.f32 1.442695, %v1423_v8 }
 0x3e0   : > { %v1486_v15 = vpop.permute.xlu0 %1485 }
 0x3e1   : > { %2745 = vpow2.f32 %v1424_v9  ;;  %v1491_v17 = vsel %vm1371_vm1, %v1486_v15, 0 }
 0x3eb   : > { %v2746_v10 = vpop.eup %2745 }
 0x3ec   : > { %v1426_v11 = vsel %vm1419_vm5, %v2746_v10, 0.0 }
 0x3ed   : > { %1427 = vadd.xlane.f32.xlu1 %v1426_v11 }
 0x3fe   : > { %1480 = vrot.lane.b32.xlu1 %v1351_v59, %s2846_s17 }
 0x47a   : > { %v1428_v12 = vpop.xlane.xlu1 %1427 }
 0x47b   : > { %2747 = vrcp.f32 %v1428_v12 }
 0x47e   : > { %v1481_v18 = vpop.permute.xlu1 %1480 }
 0x485   : > { %v2748_v13 = vpop.eup %2747 }
 0x486   : > { %v1430_v14 = vmul.f32 %v2748_v13, %v2746_v10 }
 0x488   : > { %v1431_v16 = vpack.c.bf16 %v1430_v14, %v1430_v14 }
 0x48a   : > { %2446 = vmatmul.mubr.msk.bf16.vlgmr.msra.gmra.mrb[8].mxu1 %vm1419_vm5, %v1431_v16 }
 0x48b   : > { %2450 = vmatpush3.bf16.xpose.msra.mxu1 %v1491_v17  ;;  %2451 = vmatprep.mubr.msk.bf16.mxu1 %vm2844_vm0, %v2843_v22 }
 0x48c   : > { %2455 = vmatprep.subr.bf16.mxu1 %v2843_v22 }
 0x492   : > { %2452 = vmatmul.mubr.msk.bf16.vlgmr.msra.gmra.mrb[12].mxu1 %vm1371_vm1, %v1481_v18 }
 0x493   : > { %2457 = vmatprep.mubr.msk.bf16.mxu1 %vm2844_vm0, %v2843_v22 }
 0x55d   : > { %v3398_v19 = vpop.f32.mrb[8].mxu1 }
 0x55e   : > { %v2447_v20 = vpop.f32.mrb[9].mxu1 }
 0x55f   : > { %v1476_v21 = vpop.f32.mrb[10].mxu1 }
 0x560   : > { %v2448_v24 = vpop.f32.mrb[11].mxu1 }
 0x565   : > { %v1527_v25 = vpop.f32.mrb[12].mxu1 }
 0x566   : > { %v1533_v26 = vsel %vm1368_vm4, -1e+18, %v1527_v25  ;;  %v2453_v28 = vpop.f32.mrb[13].mxu1 }
 0x567   : > { %v1530_v31 = vpop.f32.mrb[14].mxu1  ;;  %v1534_v32 = vsel %vm1419_vm5, %v1533_v26, -inf }
 0x568   : > { %1535 = vmax.xlane.f32.xlu1 %v1534_v32  ;;  %v2454_v33 = vpop.f32.mrb[15].mxu1 }
 0x5f5   : > { %v1536_v34 = vpop.xlane.xlu1 %1535 }
 0x5f6   : > { %v1537_v35 = vsub.f32 %v1533_v26, %v1536_v34  ;;  %v2693_v34 = vld [vmem:[%s3619_s9] ss:$8 sps:$4 sm:$0xff]  }
 0x5f8   : > { %v1538_v36 = vmul.f32 1.442695, %v1537_v35  ;;  %v2695_v35 = vld [vmem:[%s3619_s9 + $0x4] ss:$8 sps:$4 sm:$0xff]  }
 0x5f9   : > { %2034 = vmatprep.subr.bf16.mxu0 %v2695_v35 }
 0x5fa   : > { %2749 = vpow2.f32 %v1538_v36  ;;  %v2698_v36 = vld [vmem:[%s3619_s9 + $0x14] ss:$8 sps:$4 sm:$0xff]   ;;  %2035 = vmatpush1.bf16.msra.mxu0 %v2693_v34 }
 0x5fb   : > { %2036 = vmatprep.subr.bf16.mxu0 %v2698_v36 }
 0x604   : > { %v2750_v38 = vpop.eup %2749 }
 0x605   : > { %v1540_v39 = vsel %vm1419_vm5, %v2750_v38, 0.0 }
 0x606   : > { %1541 = vadd.xlane.f32.xlu0 %v1540_v39  ;;  %v2701_v39 = vld [vmem:[%s3619_s9 + $0x24] ss:$8 sps:$4 sm:$0xff]  }
 0x61c   : > { %1549 = vrot.lane.b32.xlu0 %v2418_v42, %s2846_s17  ;;  %v2699_v42 = vld [vmem:[%s3619_s9 + $0x20] ss:$8 sps:$4 sm:$0xff]  }
 0x620   : > { %1707 = vrot.lane.b32.xlu0 %v1352_v44, %s2846_s17 }
 0x693   : > { %v1542_v45 = vpop.xlane.xlu0 %1541 }
 0x694   : > { %2751 = vrcp.f32 %v1542_v45  ;;  %v2707_v45 = vld [vmem:[%s3619_s9 + $0x44] ss:$8 sps:$4 sm:$0xff]  }
 0x697   : > { %v1550_v46 = vpop.permute.xlu0 %1549 }
 0x698   : > { %v1555_v47 = vsel %vm1435_vm2, %v1550_v46, 0  ;;  %v2705_v46 = vld [vmem:[%s3619_s9 + $0x40] ss:$8 sps:$4 sm:$0xff]  }
 0x699   : > { %2456 = vmatpush3.bf16.msra.mxu1 %v1555_v47  ;;  %v2710_v47 = vld [vmem:[%s3619_s9 + $0x54] ss:$8 sps:$4 sm:$0xff]  }
 0x69a   : > { %2461 = vmatprep.subr.bf16.mxu1 %v2843_v22 }
 0x69b   : > { %v1708_v8 = vpop.permute.xlu0 %1707 }
 0x69e   : > { %v2752_v48 = vpop.eup %2751 }
 0x69f   : > { %v1544_v37 = vmul.f32 %v2752_v48, %v2750_v38  ;;  %v2696_v38 = vld [vmem:[%s3619_s9 + $0x10] ss:$8 sps:$4 sm:$0xff]  }
 0x6a0   : > { %2037 = vmatpush1.bf16.msra.mxu0 %v2696_v38  ;;  %v2708_v48 = vld [vmem:[%s3619_s9 + $0x50] ss:$8 sps:$4 sm:$0xff]  }
 0x6a1   : > { %v1545_v51 = vpack.c.bf16 %v1544_v37, %v1544_v37  ;;  %2038 = vmatprep.subr.bf16.mxu0 %v2701_v39  ;;  %v2711_v37 = vld [vmem:[%s3619_s9 + $0x60] ss:$8 sps:$4 sm:$0xff]  }
 0x6a3   : > { %2458 = vmatmul.mubr.msk.bf16.vlgmr.msra.gmra.mrb[16].mxu1 %vm1419_vm5, %v1545_v51  ;;  %v2716_v51 = vld [vmem:[%s3619_s9 + $0x74] ss:$8 sps:$4 sm:$0xff]  }
 0x6a4   : > { %2462 = vmatpush3.bf16.xpose.msra.mxu1 %v1603_v49  ;;  %2463 = vmatprep.mubr.msk.bf16.mxu1 %vm2844_vm0, %v2843_v22  ;;  %v2714_v49 = vld [vmem:[%s3619_s9 + $0x70] ss:$8 sps:$4 sm:$0xff]  }
 0x6a5   : > { %2467 = vmatprep.subr.bf16.mxu1 %v2843_v22  ;;  %2039 = vmatpush1.bf16.msra.mxu0 %v2699_v42 }
 0x6a6   : > { %2040 = vmatprep.subr.bf16.mxu0 %v2704_v43 }
 0x6ab   : > { %2464 = vmatmul.mubr.msk.bf16.vlgmr.msra.gmra.mrb[20].mxu1 %vm1371_vm1, %v1352_v44  ;;  %v2702_v44 = vld [vmem:[%s3619_s9 + $0x30] ss:$8 sps:$4 sm:$0xff]  }
 0x6ac   : > { %2468 = vmatpush3.bf16.msra.mxu1 %v1664_v53  ;;  %2469 = vmatprep.mubr.msk.bf16.mxu1 %vm2844_vm0, %v2843_v22  ;;  %v2717_v53 = vld [vmem:[%s3619_s9 + $0x80] ss:$8 sps:$4 sm:$0xff]  }
 0x6ad   : > { %2473 = vmatprep.subr.bf16.mxu1 %v2843_v22  ;;  %2041 = vmatpush1.bf16.msra.mxu0 %v2702_v44 }
 0x6ae   : > { %2042 = vmatprep.subr.bf16.mxu0 %v2707_v45 }
 0x6b1   : > { %2043 = vmatpush1.bf16.msra.mxu0 %v2705_v46 }
 0x6b2   : > { %2044 = vmatprep.subr.bf16.mxu0 %v2710_v47 }
 0x6b5   : > { %2045 = vmatpush1.bf16.msra.mxu0 %v2708_v48 }
 0x776   : > { %v3425_v40 = vpop.f32.mrb[16].mxu1 }
 0x777   : > { %v2459_v54 = vpop.f32.mrb[17].mxu1 }
 0x778   : > { %v1594_v55 = vpop.f32.mrb[18].mxu1  ;;  %v2722_v54 = vld [vmem:[%s3619_s9 + $0x94] ss:$8 sps:$4 sm:$0xff]  }
 0x779   : > { %v2460_v56 = vpop.f32.mrb[19].mxu1  ;;  %v2720_v55 = vld [vmem:[%s3619_s9 + $0x90] ss:$8 sps:$4 sm:$0xff]  }
 0x77a   : > { %v2725_v56 = vld [vmem:[%s3619_s9 + $0xa4] ss:$8 sps:$4 sm:$0xff]  }
 0x77e   : > { %v1639_v57 = vpop.f32.mrb[20].mxu1 }
 0x77f   : > { %v1645_v58 = vsel %vm1368_vm4, -1e+18, %v1639_v57  ;;  %v2465_v41 = vpop.f32.mrb[21].mxu1  ;;  %v2723_v57 = vld [vmem:[%s3619_s9 + $0xa0] ss:$8 sps:$4 sm:$0xff]  }
 0x780   : > { %v1642_v59 = vpop.f32.mrb[22].mxu1  ;;  %v1646_v60 = vsel %vm1419_vm5, %v1645_v58, -inf  ;;  %v2726_v41 = vld [vmem:[%s3619_s9 + $0xb0] ss:$8 sps:$4 sm:$0xff]  }
 0x781   : > { %1647 = vmax.xlane.f32.xlu1 %v1646_v60  ;;  %v2466_v61 = vpop.f32.mrb[23].mxu1  ;;  %v2731_v59 = vld [vmem:[%s3619_s9 + $0xc4] ss:$8 sps:$4 sm:$0xff]   ;;  %v2729_v60 = vld [vmem:[%s3619_s9 + $0xc0] ss:$8 sps:$4 sm:$0xff]  }
 0x782   : > { %v2734_v61 = vld [vmem:[%s3619_s9 + $0xd4] ss:$8 sps:$4 sm:$0xff]  }
 0x80e   : > { %v1648_v62 = vpop.xlane.xlu1 %1647 }
 0x80f   : > { %v1649_v63 = vsub.f32 %v1645_v58, %v1648_v62  ;;  %v2728_v58 = vld [vmem:[%s3619_s9 + $0xb4] ss:$8 sps:$4 sm:$0xff]   ;;  %v2732_v62 = vld [vmem:[%s3619_s9 + $0xd0] ss:$8 sps:$4 sm:$0xff]  }
 0x811   : > { %v1650_v0 = vmul.f32 1.442695, %v1649_v63  ;;  %v2737_v63 = vld [vmem:[%s3619_s9 + $0xe4] ss:$8 sps:$4 sm:$0xff]  }
 0x813   : > { %2753 = vpow2.f32 %v1650_v0  ;;  %v2735_v0 = vld [vmem:[%s3619_s9 + $0xe0] ss:$8 sps:$4 sm:$0xff]  }
 0x81d   : > { %v2754_v2 = vpop.eup %2753 }
 0x81e   : > { %v1652_v3 = vsel %vm1419_vm5, %v2754_v2, 0.0 }
 0x81f   : > { %1653 = vadd.xlane.f32.xlu1 %v1652_v3  ;;  %v2738_v3 = vld [vmem:[%s3619_s9 + $0xf0] ss:$8 sps:$4 sm:$0xff]  }
 0x830   : > { %1709 = vrot.lane.b32.xlu1 %v2419_v50, %s2846_s17  ;;  %v2713_v50 = vld [vmem:[%s3619_s9 + $0x64] ss:$8 sps:$4 sm:$0xff]  }
 0x831   : > { %2046 = vmatprep.subr.bf16.mxu0 %v2713_v50 }
 0x832   : > { %2047 = vmatpush1.bf16.msra.mxu0 %v2711_v37 }
 0x833   : > { %2048 = vmatprep.subr.bf16.mxu0 %v2716_v51 }
 0x836   : > { %2049 = vmatpush1.bf16.msra.mxu0 %v2714_v49 }
 0x8ac   : > { %v1654_v4 = vpop.xlane.xlu1 %1653 }
 0x8ad   : > { %2755 = vrcp.f32 %v1654_v4 }
 0x8b0   : > { %v1710_v6 = vpop.permute.xlu1 %1709 }
 0x8b1   : > { %v1715_v27 = vsel %vm1371_vm1, %v1710_v6, 0 }
 0x8b7   : > { %v2756_v23 = vpop.eup %2755 }
 0x8b8   : > { %v1656_v5 = vmul.f32 %v2756_v23, %v2754_v2  ;;  %v2740_v2 = vld [vmem:[%s3619_s9 + $0xf4] ss:$8 sps:$4 sm:$0xff]  }
 0x8ba   : > { %v1657_v7 = vpack.c.bf16 %v1656_v5, %v1656_v5 }
 0x8bc   : > { %2470 = vmatmul.mubr.msk.bf16.vlgmr.msra.gmra.mrb[24].mxu1 %vm1419_vm5, %v1657_v7 }
 0x8bd   : > { %2474 = vmatpush3.bf16.xpose.msra.mxu1 %v1715_v27  ;;  %2475 = vmatprep.mubr.msk.bf16.mxu1 %vm2844_vm0, %v2843_v22 }
 0x8be   : > { %2479 = vmatprep.subr.bf16.mxu1 %v2843_v22 }
 0x8c4   : > { %2476 = vmatmul.mubr.msk.bf16.vlgmr.msra.gmra.mrb[28].mxu1 %vm1371_vm1, %v1708_v8 }
 0x8c5   : > { %2481 = vmatprep.mubr.msk.bf16.mxu1 %vm2844_vm0, %v2843_v22 }
 0x98f   : > { %v3440_v9 = vpop.f32.mrb[24].mxu1 }
 0x990   : > { %v2471_v10 = vpop.f32.mrb[25].mxu1 }
 0x991   : > { %v1703_v11 = vpop.f32.mrb[26].mxu1 }
 0x992   : > { %v2472_v12 = vpop.f32.mrb[27].mxu1 }
 0x997   : > { %v1751_v13 = vpop.f32.mrb[28].mxu1 }
 0x998   : > { %v1757_v14 = vsel %vm1368_vm4, -1e+18, %v1751_v13  ;;  %v2477_v15 = vpop.f32.mrb[29].mxu1 }
 0x999   : > { %v1754_v16 = vpop.f32.mrb[30].mxu1  ;;  %v1758_v17 = vsel %vm1419_vm5, %v1757_v14, -inf }
 0x99a   : > { %1759 = vmax.xlane.f32.xlu1 %v1758_v17  ;;  %v2478_v18 = vpop.f32.mrb[31].mxu1 }
 0xa27   : > { %v1760_v20 = vpop.xlane.xlu1 %1759 }
 0xa28   : > { %v1761_v21 = vsub.f32 %v1757_v14, %v1760_v20 }
 0xa2a   : > { %v1762_v24 = vmul.f32 1.442695, %v1761_v21 }
 0xa2c   : > { %2757 = vpow2.f32 %v1762_v24 }
 0xa36   : > { %v2758_v22 = vpop.eup %2757 }
 0xa37   : > { %v1764_v25 = vsel %vm1419_vm5, %v2758_v22, 0.0 }
 0xa38   : > { %1765 = vadd.xlane.f32.xlu0 %v1764_v25 }
 0xa4e   : > { %1770 = vrot.lane.b32.xlu0 %v2420_v52, %s2846_s17  ;;  %v2719_v52 = vld [vmem:[%s3619_s9 + $0x84] ss:$8 sps:$4 sm:$0xff]  }
 0xa4f   : > { %2050 = vmatprep.subr.bf16.mxu0 %v2719_v52 }
 0xa50   : > { %2051 = vmatpush1.bf16.msra.mxu0 %v2717_v53 }
 0xa51   : > { %2052 = vmatprep.subr.bf16.mxu0 %v2722_v54 }
 0xa54   : > { %2053 = vmatpush1.bf16.msra.mxu0 %v2720_v55 }
 0xa55   : > { %2054 = vmatprep.subr.bf16.mxu0 %v2725_v56 }
 0xa58   : > { %2055 = vmatpush1.bf16.msra.mxu0 %v2723_v57 }
 0xa59   : > { %2056 = vmatprep.subr.bf16.mxu0 %v2728_v58 }
 0xa5c   : > { %2057 = vmatpush1.bf16.msra.mxu0 %v2726_v41 }
 0xa5d   : > { %2058 = vmatprep.subr.bf16.mxu0 %v2731_v59 }
 0xa60   : > { %2059 = vmatpush1.bf16.msra.mxu0 %v2729_v60 }
 0xa61   : > { %2060 = vmatprep.subr.bf16.mxu0 %v2734_v61 }
 0xa64   : > { %2061 = vmatpush1.bf16.msra.mxu0 %v2732_v62 }
 0xa65   : > { %2062 = vmatprep.subr.bf16.mxu0 %v2737_v63 }
 0xa68   : > { %2063 = vmatpush1.bf16.msra.mxu0 %v2735_v0 }
 0xa69   : > { %2064 = vmatprep.subr.bf16.mxu0 %v2740_v2 }
 0xa6c   : > { %2065 = vmatpush1.bf16.msra.mxu0 %v2738_v3 }
 0xac5   : > { %v1766_v26 = vpop.xlane.xlu0 %1765 }
 0xac6   : > { %2759 = vrcp.f32 %v1766_v26 }
 0xac9   : > { %v1771_v1 = vpop.permute.xlu0 %1770 }
 0xaca   : > { %v1776_v28 = vsel %vm1435_vm2, %v1771_v1, 0 }
 0xacb   : > { %2480 = vmatpush3.bf16.msra.mxu1 %v1776_v28 }
 0xad0   : > { %v2760_v31 = vpop.eup %2759 }
 0xad1   : > { %v1768_v32 = vmul.f32 %v2760_v31, %v2758_v22 }
 0xad3   : > { %v1769_v33 = vpack.c.bf16 %v1768_v32, %v1768_v32 }
 0xad5   : > { %2482 = vmatmul.mubr.msk.bf16.vlgmr.msra.gmra.mrb[32].mxu1 %vm1419_vm5, %v1769_v33 }
 0xba8   : > { %v1812_v4 = vpop.f32.mrb[32].mxu1 }
 0xba9   : > { %v2544_v23 = vpack.i.bf16 %v3425_v40, %v1812_v4  ;;  %v2483_v5 = vpop.f32.mrb[33].mxu1 }
 0xbaa   : > { %v1815_v6 = vpop.f32.mrb[34].mxu1 }
 0xbab   : > { %2545 = vrot.lane.b32.xlu1 %v2544_v23, %s2846_s17  ;;  %v2484_v7 = vpop.f32.mrb[35].mxu1  ;;  %s3556_s17 = scalar_lea.hbm %s3622_s12, %s2416_s20 }
 0xc1d   : > { %v2546_v27 = vpop.permute.xlu1 %2545 }
 0xc1e   : > { %v2548_v8 = vunpack.i.h.bf16 %v2546_v27  ;;  %v2547_v10 = vunpack.i.l.bf16 %v2546_v27 }
 0xc20   : > { %v1826_v11 = vsel %vm1371_vm1, %v3398_v19, %v2548_v8  ;;  %v1827_v12 = vsel %vm1371_vm1, %v3440_v9, %v2547_v10 }
 0xc21   : > { %v1828_v13 = vpack.c.bf16 %v1826_v11, %v1826_v11  ;;  %v1829_v14 = vpack.c.bf16 %v1827_v12, %v1827_v12 }
 0xc23   : > { %2066 = vmatprep.mubr.bf16.mxu0 %v1829_v14 }
 0xc24   : > { %2067 = vmatmul.mubr.bf16.vlgmr.msra.gmra.mrb[8].mxu0 %v1828_v13 }
 0xc25   : > { %2776 = shalt.err (!%p2773_p5)
}
 0xc26   : > { %s2777_s24 = scalar_lea.hbm %s3556_s17, 256  ;;  %s2781_s19 = scalar_lea.hbm %s3622_s12, 512 }
 0xc27   : > { %p2778_p6 = scmp.ne.s32.totalorder %s3556_s17, %s2777_s24  ;;  %p2782_p10 = scmp.lt.u32.totalorder %s3556_s17, %s3622_s12 }
 0xc28   : > { %p2783_p11 = scmp.lt.u32.totalorder %s2781_s19, %s2777_s24  ;;  %p2785_p13 = scmp.lt.u32.totalorder %s2777_s24, %s3556_s17 }
 0xc29   : > { %p2779_p7 = pnand %p2778_p6, %p2953_p4 }
 0xc2a   : > { %p2784_p12 = por %p2783_p11, %p2782_p10 }
 0xc2b   : > { %p2780_p9 = pneg %p2779_p7 }
 0xc2c   : > { %p2786_p0 = por %p2785_p13, %p2784_p12 }
 0xc2e   : > { %p2787_p1 = pnand %p2786_p0, %p2780_p9 }
 0xc30   : > { %2790 = shalt.err (!%p2787_p1)
}
 0xc31   : > { %2485 = dma.vmem_to_hbm [thread:$0]  (%p2953_p4), %s2111_s28, 256, %s3556_s17, %s2091_s1   ;;  %v1862_v19 = vld [vmem:[%s3620_s10] sm:$0x3]  ;;  %v2762_v25 = vld [vmem:[%s2983_s30 + $0x8] sm:$0xff] }
 0xc32   : > { %v1867_v40 = vrot.slane %v1862_v19, %v3218_v29  ;;  %v1871_v9 = vrot.slane %v1862_v19, %v3221_v30  ;;  %s496_s13 = scalar_lea.vmem %s3621_s11, %s2973_s18  ;;  %v2761_v21 = vld [vmem:[%s2983_s30] sm:$0xff] }
 0xcf7   : > { %v2068_v15 = vpop.f32.mrb[8].mxu0 }
 0xcf8   : > { %v2069_v16 = vadd.f32 %v2068_v15, %v1867_v40  ;;  %v2070_v17 = vpop.f32.mrb[9].mxu0 }
 0xcf9   : > { %v2071_v18 = vadd.f32 %v2070_v17, %v1871_v9  ;;  %v2072_v20 = vpop.f32.mrb[10].mxu0 }
 0xcfa   : > { %v2075_v24 = vadd.f32 %v2761_v21, %v2069_v16  ;;  %v2073_v22 = vpop.f32.mrb[11].mxu0 }
 0xcfb   : > { %v2076_v26 = vadd.f32 %v2762_v25, %v2071_v18 }
 0xcfc   : > { %2077 = vst [vmem:[%s496_s13] sm:$0xff] %v2075_v24 }
 0xcfd   : > { %2078 = vst [vmem:[%s496_s13 + $0x8] sm:$0xff] %v2076_v26 }
 0xcfe PF: > { %p2491_p4 = scmp.ge.s32.totalorder %s2841_s26, 2  ;;  %s2134_s17 = sand.u32 1, %s2821_s21  }
 0xcff   : > { %s2135_s1 = scalar_lea.sflag [#allocation5], %s2134_s17 }
 0xd00   : > { %p2488_p2 = pnand %p2491_p4, %p2960_p8 }
 0xd02   : > { %2816 = dma.done.wait (!%p2488_p2), %s2135_s1, 256  }
 0xd03   : > { %2818 = vsyncadd (!%p2488_p2), %s2135_s1, 4294967040  ;;  %s26_s26 = sadd.s32 1, %s2841_s26   ;;  %s3639_s18 = sld [smem:[#allocation7_spill]] }
 0xd04   : > { %p23_p3 = scmp.ge.s32.totalorder %s26_s26, 4   ;;  %s3640_s23 = sld [smem:[#allocation11_spill]] }
 0xd05   : > { %s3641_s24 = sld [smem:[#allocation8_spill]]  ;;  %s3642_s25 = sld [smem:[#allocation9_spill]] }
 0xd06   : > { %s3643_s21 = smov %s2825_s22  ;;  %25 = sbr.rel (!%p23_p3) target bundleno = 7 (0x7), region = 121 }
 0xd09   : > { %s3644_s22 = smov %s3639_s18 }
 0xd0d   :  { %2140 = vsyncpa [#allocation5], 1 }
 0xd0e   :  { %2142 = vsyncpa [#allocation5 + $0x1], 1 }

</bundles_post_ra>
